<compile_context>
chip_gen: v5e
topology: v5e:2x2
jax: 0.10.0
libtpu: 0.0.40
codegen_flags: <defaults>
</compile_context>

<pallas_src>
import math

import jax
import jax.numpy as jnp
from jax.experimental import pallas as pl
from jax.experimental.pallas import tpu as pltpu


NEG_SLOPE = 0.2                                  # LeakyReLU(0.2)
PAD = 128                                        # lane-dense feature slab width
IN_DIM = 74                                      # 11 + 55 + 8
N_BLOCKS = 10                                    # 5 encoder + 5 decoder blocks
BRANCH_COLS = ((0, 11), (11, 55), (66, 8))       # (column offset, dim) / branch
SC_SLOT = {0: 0, 4: 1, 5: 2, 9: 3}               # blocks with a Linear shortcut
NONSC_SLOT = {1: 0, 2: 1, 3: 2, 6: 3, 7: 4, 8: 5}  # identity-shortcut blocks
MAX_BATCH_TILE = 512


def _lrelu(v):
    # LeakyReLU_a(v) == max(v, a*v) for 0 < a < 1 (2 VALU ops vs cmp+sel+mul).
    return jnp.maximum(v, NEG_SLOPE * v)


def _block_dims(d):
    """(in_dim, out_dim) for the 10 blocks of one encoder+decoder chain."""
    enc = [(d, 128), (128, 128), (128, 128), (128, 128), (128, 16)]
    dec = [(16, 128), (128, 128), (128, 128), (128, 128), (128, d)]
    return enc + dec


def _block_offsets(c0, j):
    """Column offsets of this block's input / output inside the 128-lane slab."""
    in_off = c0 if j == 0 else 0
    out_off = c0 if j == N_BLOCKS - 1 else 0
    return in_off, out_off


# ----------------------------------------------------------------------------
# Raw parameters: PyTorch-Linear-style init, zero-padded into lane-dense
# stacked f32 tensors (same layout as the PyTorch module, branch-stacked).
# ----------------------------------------------------------------------------
def init_params(key):
    w1 = jnp.zeros((3, N_BLOCKS, PAD, PAD), jnp.float32)
    b1 = jnp.zeros((3, N_BLOCKS, 1, PAD), jnp.float32)
    w2 = jnp.zeros((3, N_BLOCKS, PAD, PAD), jnp.float32)
    b2 = jnp.zeros((3, N_BLOCKS, 1, PAD), jnp.float32)
    ws = jnp.zeros((3, 4, PAD, PAD), jnp.float32)
    bs = jnp.zeros((3, 4, 1, PAD), jnp.float32)

    branch_keys = jax.random.split(key, 3)
    for br, (c0, d) in enumerate(BRANCH_COLS):
        bkeys = jax.random.split(branch_keys[br], N_BLOCKS)
        for j, (din, dout) in enumerate(_block_dims(d)):
            kk = jax.random.split(bkeys[j], 6)
            in_off, out_off = _block_offsets(c0, j)
            bnd1 = 1.0 / math.sqrt(din)
            bnd2 = 1.0 / math.sqrt(dout)
            w1r = jax.random.uniform(kk[0], (din, dout), jnp.float32, -bnd1, bnd1)
            b1r = jax.random.uniform(kk[1], (dout,), jnp.float32, -bnd1, bnd1)
            w2r = jax.random.uniform(kk[2], (dout, dout), jnp.float32, -bnd2, bnd2)
            b2r = jax.random.uniform(kk[3], (dout,), jnp.float32, -bnd2, bnd2)
            w1 = w1.at[br, j, in_off:in_off + din, out_off:out_off + dout].set(w1r)
            b1 = b1.at[br, j, 0, out_off:out_off + dout].set(b1r)
            w2 = w2.at[br, j, out_off:out_off + dout, out_off:out_off + dout].set(w2r)
            b2 = b2.at[br, j, 0, out_off:out_off + dout].set(b2r)
            if j in SC_SLOT:
                s = SC_SLOT[j]
                wsr = jax.random.uniform(kk[4], (din, dout), jnp.float32, -bnd1, bnd1)
                bsr = jax.random.uniform(kk[5], (dout,), jnp.float32, -bnd1, bnd1)
                ws = ws.at[br, s, in_off:in_off + din, out_off:out_off + dout].set(wsr)
                bs = bs.at[br, s, 0, out_off:out_off + dout].set(bsr)

    return {"w1": w1, "b1": b1, "w2": w2, "b2": b2, "ws": ws, "bs": bs}


# ----------------------------------------------------------------------------
# Kernel-ready parameters: bf16 weights (f32 biases), W1||Ws packed 256-wide
# for the 4 shortcut blocks of each branch.
# ----------------------------------------------------------------------------
def pack_params(raw, dtype=jnp.bfloat16):
    nsc_idx = sorted(NONSC_SLOT, key=NONSC_SLOT.get)     # [1, 2, 3, 6, 7, 8]
    sc_idx = sorted(SC_SLOT, key=SC_SLOT.get)            # [0, 4, 5, 9]

    w1n = raw["w1"][:, nsc_idx].astype(dtype)            # [3, 6, 128, 128]
    b1n = raw["b1"][:, nsc_idx]                          # [3, 6, 1, 128]  f32
    # W1 || Ws along the output dim -> one 128->256 matmul per shortcut block.
    w1s = jnp.concatenate([raw["w1"][:, sc_idx], raw["ws"]], axis=-1).astype(dtype)
    b1s = jnp.concatenate([raw["b1"][:, sc_idx], raw["bs"]], axis=-1)      # f32
    return {
        "w1n": w1n, "b1n": b1n,
        "w1s": w1s, "b1s": b1s,                          # [3, 4, 128, 256]
        "w2": raw["w2"].astype(dtype), "b2": raw["b2"],  # [3, 10, 128, 128]
    }


# ----------------------------------------------------------------------------
# Fused kernel: one grid point == one batch tile; all 3 branches x 10 blocks
# statically unrolled, one lane-dense [tb, 128] output slab stored once.
# ----------------------------------------------------------------------------
def fused_forward_kernel(x_ref, w1n_ref, b1n_ref, w1s_ref, b1s_ref,
                         w2_ref, b2_ref, o_ref):
    wdt = w1n_ref.dtype                       # bf16 matmul operand dtype
    x = x_ref[...]                            # [tb, 128] bf16, all 3 branches
    out = jnp.zeros(x.shape, jnp.float32)     # assembled output slab (f32 acc)

    for br in range(3):                       # static unroll over branch pairs
        h = x                                 # bf16 carried activation
        for j in range(N_BLOCKS):             # static unroll over blocks
            if j in SC_SLOT:                  # real Linear shortcut: packed dot
                s = SC_SLOT[j]
                ts = jnp.dot(h, w1s_ref[br, s],
                             preferred_element_type=jnp.float32) + b1s_ref[br, s]
                t = _lrelu(ts[:, :PAD]).astype(wdt)     # residual intermediate
                z = ts[:, PAD:]                         # shortcut path (f32)
            else:                             # identity shortcut
                n = NONSC_SLOT[j]
                ta = jnp.dot(h, w1n_ref[br, n],
                             preferred_element_type=jnp.float32) + b1n_ref[br, n]
                t = _lrelu(ta).astype(wdt)
                z = h.astype(jnp.float32)
            y = jnp.dot(t, w2_ref[br, j],
                        preferred_element_type=jnp.float32) + b2_ref[br, j]
            hf = _lrelu(y + z)                # f32; shortcut added pre-downcast
            if j == N_BLOCKS - 1:
                # Last-block outputs occupy disjoint columns per branch
                # (zero-padded weights/biases, LeakyReLU(0)=0), so adding the
                # three slabs is exactly concat([y1, y2, y3], axis=1).
                out = out + hf
            else:
                h = hf.astype(wdt)            # single downcast per block

    o_ref[...] = out.astype(o_ref.dtype)


def _choose_tile(B):
    """Pick (tb, padded_B) minimizing padded rows; tile no larger than 512."""
    Bp8 = max(8, -(-B // 8) * 8)
    if Bp8 <= MAX_BATCH_TILE:
        return Bp8, Bp8                       # single tile, minimal padding
    best = None
    for tb in (512, 256, 128):
        Bp = -(-Bp8 // tb) * tb
        key = (Bp - B, -tb)                   # least waste, then largest tile
        if best is None or key < best[0]:
            best = (key, tb, Bp)
    return best[1], best[2]


def aecoder_res_naive_forward(kparams, x):
    """x: [B, 74] = [B, 11 + 55 + 8]; returns [B, 74] float32."""
    B = x.shape[0]
    assert x.shape[1] == IN_DIM, x.shape
    wdt = kparams["w1n"].dtype

    tb, Bp = _choose_tile(B)
    n_bt = Bp // tb
    # One lane-dense 128-wide input slab, matmul operands in bf16.
    xp = jnp.zeros((Bp, PAD), wdt).at[:B, :IN_DIM].set(x.astype(wdt))

    def full_spec(arr):
        nd = arr.ndim
        # Constant block index across the whole grid -> weights stay resident
        # in VMEM; the DMA is issued once.
        return pl.BlockSpec(arr.shape, lambda bi: (0,) * nd)

    out = pl.pallas_call(
        fused_forward_kernel,
        out_shape=jax.ShapeDtypeStruct((Bp, PAD), jnp.float32),
        grid_spec=pltpu.PrefetchScalarGridSpec(
            num_scalar_prefetch=0,
            grid=(n_bt,),
            in_specs=[
                pl.BlockSpec((tb, PAD), lambda bi: (bi, 0)),   # x batch tile
                full_spec(kparams["w1n"]),
                full_spec(kparams["b1n"]),
                full_spec(kparams["w1s"]),
                full_spec(kparams["b1s"]),
                full_spec(kparams["w2"]),
                full_spec(kparams["b2"]),
            ],
            out_specs=pl.BlockSpec((tb, PAD), lambda bi: (bi, 0)),
        ),
        compiler_params=pltpu.CompilerParams(
            dimension_semantics=("parallel",),        # batch tiles independent
            vmem_limit_bytes=64 * 1024 * 1024),       # headroom beyond v5e 16MiB
    )(xp, kparams["w1n"], kparams["b1n"], kparams["w1s"], kparams["b1s"],
      kparams["w2"], kparams["b2"])

    return out[:B, :IN_DIM]


# ----------------------------------------------------------------------------
# Pure-JAX reference mirroring the PyTorch forward with identical numerics
# (bf16 matmul operands, f32 accumulation/biases, bf16-carried activations).
# ----------------------------------------------------------------------------
def reference_forward(raw, x, dtype=jnp.bfloat16):
    outs = []
    for br, (c0, d) in enumerate(BRANCH_COLS):
        h = x[:, c0:c0 + d].astype(dtype)
        for j, (din, dout) in enumerate(_block_dims(d)):
            in_off, out_off = _block_offsets(c0, j)
            w1 = raw["w1"][br, j, in_off:in_off + din,
                           out_off:out_off + dout].astype(dtype)
            b1 = raw["b1"][br, j, 0, out_off:out_off + dout]
            w2 = raw["w2"][br, j, out_off:out_off + dout,
                           out_off:out_off + dout].astype(dtype)
            b2 = raw["b2"][br, j, 0, out_off:out_off + dout]
            t = _lrelu(jnp.dot(h, w1, preferred_element_type=jnp.float32)
                       + b1).astype(dtype)
            y = jnp.dot(t, w2, preferred_element_type=jnp.float32) + b2
            if j in SC_SLOT:
                s = SC_SLOT[j]
                wsm = raw["ws"][br, s, in_off:in_off + din,
                                out_off:out_off + dout].astype(dtype)
                bsm = raw["bs"][br, s, 0, out_off:out_off + dout]
                z = jnp.dot(h, wsm, preferred_element_type=jnp.float32) + bsm
            else:
                z = h.astype(jnp.float32)
            hf = _lrelu(y + z)
            h = hf.astype(dtype) if j < N_BLOCKS - 1 else hf
        outs.append(h)
    return jnp.concatenate(outs, axis=1)


if __name__ == "__main__":
    key = jax.random.PRNGKey(0)
    pkey, xkey = jax.random.split(key)

    raw_params = init_params(pkey)
    kparams = pack_params(raw_params, dtype=jnp.bfloat16)

    batch = 8
    x = jax.random.normal(xkey, (batch, IN_DIM), dtype=jnp.float32)  # 11+55+8

    fwd = jax.jit(aecoder_res_naive_forward)
    y = fwd(kparams, x)
    jax.block_until_ready(y)

    assert y.shape == (batch, IN_DIM), y.shape
    assert y.dtype == jnp.float32, y.dtype

    y_ref = reference_forward(raw_params, x, dtype=jnp.bfloat16)
    max_err = float(jnp.max(jnp.abs(y - y_ref)))
    assert jnp.allclose(y, y_ref, rtol=1e-2, atol=1e-2), max_err

    print("KERNEL_OK")
</pallas_src>

<mosaic_0001>
module attributes {stable_mosaic.version = 11 : i64} {
  func.func @fused_forward_kernel(%arg0: i32, %arg1: memref<8x128xbf16, #tpu.memory_space<vmem>>, %arg2: memref<3x6x128x128xbf16, #tpu.memory_space<vmem>>, %arg3: memref<3x6x1x128xf32, #tpu.memory_space<vmem>>, %arg4: memref<3x4x128x256xbf16, #tpu.memory_space<vmem>>, %arg5: memref<3x4x1x256xf32, #tpu.memory_space<vmem>>, %arg6: memref<3x10x128x128xbf16, #tpu.memory_space<vmem>>, %arg7: memref<3x10x1x128xf32, #tpu.memory_space<vmem>>, %arg8: memref<8x128xf32, #tpu.memory_space<vmem>>) attributes {dimension_semantics = [#tpu.dimension_semantics<parallel>], iteration_bounds = array<i64: 1>, scalar_prefetch = 0 : i64, scratch_operands = 0 : i64, tpu.core_type = #tpu.core_type<tc>, window_params = [{transform_indices = @transform_0, window_bounds = array<i64: 8, 128>}, {pipeline_mode = #tpu.pipeline_mode<synchronous>, transform_indices = @transform_1, window_bounds = array<i64: 3, 6, 128, 128>}, {pipeline_mode = #tpu.pipeline_mode<synchronous>, transform_indices = @transform_2, window_bounds = array<i64: 3, 6, 1, 128>}, {pipeline_mode = #tpu.pipeline_mode<synchronous>, transform_indices = @transform_3, window_bounds = array<i64: 3, 4, 128, 256>}, {pipeline_mode = #tpu.pipeline_mode<synchronous>, transform_indices = @transform_4, window_bounds = array<i64: 3, 4, 1, 256>}, {pipeline_mode = #tpu.pipeline_mode<synchronous>, transform_indices = @transform_5, window_bounds = array<i64: 3, 10, 128, 128>}, {pipeline_mode = #tpu.pipeline_mode<synchronous>, transform_indices = @transform_6, window_bounds = array<i64: 3, 10, 1, 128>}, {transform_indices = @transform_7, window_bounds = array<i64: 8, 128>}]} {
    %c0 = arith.constant 0 : index
    %c0_0 = arith.constant 0 : index
    %0 = vector.load %arg1[%c0, %c0_0] : memref<8x128xbf16, #tpu.memory_space<vmem>>, vector<8x128xbf16>
    %cst = arith.constant 0.000000e+00 : f32
    %1 = vector.broadcast %cst : f32 to vector<8x128xf32>
    %c0_1 = arith.constant 0 : index
    %c0_2 = arith.constant 0 : index
    %c0_3 = arith.constant 0 : index
    %c0_4 = arith.constant 0 : index
    %2 = vector.load %arg4[%c0_1, %c0_2, %c0_3, %c0_4] : memref<3x4x128x256xbf16, #tpu.memory_space<vmem>>, vector<1x1x128x256xbf16>
    %3 = vector.shape_cast %2 : vector<1x1x128x256xbf16> to vector<128x256xbf16>
    %cst_5 = arith.constant dense<0.000000e+00> : vector<8x256xf32>
    %4 = tpu.matmul %0, %3, %cst_5 {dimension_numbers = #tpu.dot_dimension_numbers<[1], [0], [0], [1], [0, 0, 1, 1], [], []>} : vector<8x128xbf16>, vector<128x256xbf16>, vector<8x256xf32> -> vector<8x256xf32>
    %c0_6 = arith.constant 0 : index
    %c0_7 = arith.constant 0 : index
    %c0_8 = arith.constant 0 : index
    %c0_9 = arith.constant 0 : index
    %5 = vector.load %arg5[%c0_6, %c0_7, %c0_8, %c0_9] : memref<3x4x1x256xf32, #tpu.memory_space<vmem>>, vector<1x1x1x256xf32>
    %6 = vector.shape_cast %5 : vector<1x1x1x256xf32> to vector<1x256xf32>
    %7 = vector.broadcast %6 : vector<1x256xf32> to vector<8x256xf32>
    %8 = arith.addf %4, %7 : vector<8x256xf32>
    %9 = vector.extract_strided_slice %8 {offsets = [0, 0], sizes = [8, 128], strides = [1, 1]} : vector<8x256xf32> to vector<8x128xf32>
    %cst_10 = arith.constant 2.000000e-01 : f32
    %10 = vector.broadcast %cst_10 : f32 to vector<8x128xf32>
    %11 = arith.mulf %10, %9 : vector<8x128xf32>
    %12 = arith.maximumf %9, %11 : vector<8x128xf32>
    %13 = arith.truncf %12 : vector<8x128xf32> to vector<8x128xbf16>
    %14 = vector.extract_strided_slice %8 {offsets = [0, 128], sizes = [8, 128], strides = [1, 1]} : vector<8x256xf32> to vector<8x128xf32>
    %c0_11 = arith.constant 0 : index
    %c0_12 = arith.constant 0 : index
    %c0_13 = arith.constant 0 : index
    %c0_14 = arith.constant 0 : index
    %15 = vector.load %arg6[%c0_11, %c0_12, %c0_13, %c0_14] : memref<3x10x128x128xbf16, #tpu.memory_space<vmem>>, vector<1x1x128x128xbf16>
    %16 = vector.shape_cast %15 : vector<1x1x128x128xbf16> to vector<128x128xbf16>
    %cst_15 = arith.constant dense<0.000000e+00> : vector<8x128xf32>
    %17 = tpu.matmul %13, %16, %cst_15 {dimension_numbers = #tpu.dot_dimension_numbers<[1], [0], [0], [1], [0, 0, 1, 1], [], []>} : vector<8x128xbf16>, vector<128x128xbf16>, vector<8x128xf32> -> vector<8x128xf32>
    %c0_16 = arith.constant 0 : index
    %c0_17 = arith.constant 0 : index
    %c0_18 = arith.constant 0 : index
    %c0_19 = arith.constant 0 : index
    %18 = vector.load %arg7[%c0_16, %c0_17, %c0_18, %c0_19] : memref<3x10x1x128xf32, #tpu.memory_space<vmem>>, vector<1x1x1x128xf32>
    %19 = vector.shape_cast %18 : vector<1x1x1x128xf32> to vector<1x128xf32>
    %20 = vector.broadcast %19 : vector<1x128xf32> to vector<8x128xf32>
    %21 = arith.addf %17, %20 : vector<8x128xf32>
    %22 = arith.addf %21, %14 : vector<8x128xf32>
    %cst_20 = arith.constant 2.000000e-01 : f32
    %23 = vector.broadcast %cst_20 : f32 to vector<8x128xf32>
    %24 = arith.mulf %23, %22 : vector<8x128xf32>
    %25 = arith.maximumf %22, %24 : vector<8x128xf32>
    %26 = arith.truncf %25 : vector<8x128xf32> to vector<8x128xbf16>
    %c0_21 = arith.constant 0 : index
    %c0_22 = arith.constant 0 : index
    %c0_23 = arith.constant 0 : index
    %c0_24 = arith.constant 0 : index
    %27 = vector.load %arg2[%c0_21, %c0_22, %c0_23, %c0_24] : memref<3x6x128x128xbf16, #tpu.memory_space<vmem>>, vector<1x1x128x128xbf16>
    %28 = vector.shape_cast %27 : vector<1x1x128x128xbf16> to vector<128x128xbf16>
    %cst_25 = arith.constant dense<0.000000e+00> : vector<8x128xf32>
    %29 = tpu.matmul %26, %28, %cst_25 {dimension_numbers = #tpu.dot_dimension_numbers<[1], [0], [0], [1], [0, 0, 1, 1], [], []>} : vector<8x128xbf16>, vector<128x128xbf16>, vector<8x128xf32> -> vector<8x128xf32>
    %c0_26 = arith.constant 0 : index
    %c0_27 = arith.constant 0 : index
    %c0_28 = arith.constant 0 : index
    %c0_29 = arith.constant 0 : index
    %30 = vector.load %arg3[%c0_26, %c0_27, %c0_28, %c0_29] : memref<3x6x1x128xf32, #tpu.memory_space<vmem>>, vector<1x1x1x128xf32>
    %31 = vector.shape_cast %30 : vector<1x1x1x128xf32> to vector<1x128xf32>
    %32 = vector.broadcast %31 : vector<1x128xf32> to vector<8x128xf32>
    %33 = arith.addf %29, %32 : vector<8x128xf32>
    %cst_30 = arith.constant 2.000000e-01 : f32
    %34 = vector.broadcast %cst_30 : f32 to vector<8x128xf32>
    %35 = arith.mulf %34, %33 : vector<8x128xf32>
    %36 = arith.maximumf %33, %35 : vector<8x128xf32>
    %37 = arith.truncf %36 : vector<8x128xf32> to vector<8x128xbf16>
    %38 = arith.extf %26 : vector<8x128xbf16> to vector<8x128xf32>
    %c0_31 = arith.constant 0 : index
    %c1 = arith.constant 1 : index
    %c0_32 = arith.constant 0 : index
    %c0_33 = arith.constant 0 : index
    %39 = vector.load %arg6[%c0_31, %c1, %c0_32, %c0_33] : memref<3x10x128x128xbf16, #tpu.memory_space<vmem>>, vector<1x1x128x128xbf16>
    %40 = vector.shape_cast %39 : vector<1x1x128x128xbf16> to vector<128x128xbf16>
    %cst_34 = arith.constant dense<0.000000e+00> : vector<8x128xf32>
    %41 = tpu.matmul %37, %40, %cst_34 {dimension_numbers = #tpu.dot_dimension_numbers<[1], [0], [0], [1], [0, 0, 1, 1], [], []>} : vector<8x128xbf16>, vector<128x128xbf16>, vector<8x128xf32> -> vector<8x128xf32>
    %c0_35 = arith.constant 0 : index
    %c1_36 = arith.constant 1 : index
    %c0_37 = arith.constant 0 : index
    %c0_38 = arith.constant 0 : index
    %42 = vector.load %arg7[%c0_35, %c1_36, %c0_37, %c0_38] : memref<3x10x1x128xf32, #tpu.memory_space<vmem>>, vector<1x1x1x128xf32>
    %43 = vector.shape_cast %42 : vector<1x1x1x128xf32> to vector<1x128xf32>
    %44 = vector.broadcast %43 : vector<1x128xf32> to vector<8x128xf32>
    %45 = arith.addf %41, %44 : vector<8x128xf32>
    %46 = arith.addf %45, %38 : vector<8x128xf32>
    %cst_39 = arith.constant 2.000000e-01 : f32
    %47 = vector.broadcast %cst_39 : f32 to vector<8x128xf32>
    %48 = arith.mulf %47, %46 : vector<8x128xf32>
    %49 = arith.maximumf %46, %48 : vector<8x128xf32>
    %50 = arith.truncf %49 : vector<8x128xf32> to vector<8x128xbf16>
    %c0_40 = arith.constant 0 : index
    %c1_41 = arith.constant 1 : index
    %c0_42 = arith.constant 0 : index
    %c0_43 = arith.constant 0 : index
    %51 = vector.load %arg2[%c0_40, %c1_41, %c0_42, %c0_43] : memref<3x6x128x128xbf16, #tpu.memory_space<vmem>>, vector<1x1x128x128xbf16>
    %52 = vector.shape_cast %51 : vector<1x1x128x128xbf16> to vector<128x128xbf16>
    %cst_44 = arith.constant dense<0.000000e+00> : vector<8x128xf32>
    %53 = tpu.matmul %50, %52, %cst_44 {dimension_numbers = #tpu.dot_dimension_numbers<[1], [0], [0], [1], [0, 0, 1, 1], [], []>} : vector<8x128xbf16>, vector<128x128xbf16>, vector<8x128xf32> -> vector<8x128xf32>
    %c0_45 = arith.constant 0 : index
    %c1_46 = arith.constant 1 : index
    %c0_47 = arith.constant 0 : index
    %c0_48 = arith.constant 0 : index
    %54 = vector.load %arg3[%c0_45, %c1_46, %c0_47, %c0_48] : memref<3x6x1x128xf32, #tpu.memory_space<vmem>>, vector<1x1x1x128xf32>
    %55 = vector.shape_cast %54 : vector<1x1x1x128xf32> to vector<1x128xf32>
    %56 = vector.broadcast %55 : vector<1x128xf32> to vector<8x128xf32>
    %57 = arith.addf %53, %56 : vector<8x128xf32>
    %cst_49 = arith.constant 2.000000e-01 : f32
    %58 = vector.broadcast %cst_49 : f32 to vector<8x128xf32>
    %59 = arith.mulf %58, %57 : vector<8x128xf32>
    %60 = arith.maximumf %57, %59 : vector<8x128xf32>
    %61 = arith.truncf %60 : vector<8x128xf32> to vector<8x128xbf16>
    %62 = arith.extf %50 : vector<8x128xbf16> to vector<8x128xf32>
    %c0_50 = arith.constant 0 : index
    %c2 = arith.constant 2 : index
    %c0_51 = arith.constant 0 : index
    %c0_52 = arith.constant 0 : index
    %63 = vector.load %arg6[%c0_50, %c2, %c0_51, %c0_52] : memref<3x10x128x128xbf16, #tpu.memory_space<vmem>>, vector<1x1x128x128xbf16>
    %64 = vector.shape_cast %63 : vector<1x1x128x128xbf16> to vector<128x128xbf16>
    %cst_53 = arith.constant dense<0.000000e+00> : vector<8x128xf32>
    %65 = tpu.matmul %61, %64, %cst_53 {dimension_numbers = #tpu.dot_dimension_numbers<[1], [0], [0], [1], [0, 0, 1, 1], [], []>} : vector<8x128xbf16>, vector<128x128xbf16>, vector<8x128xf32> -> vector<8x128xf32>
    %c0_54 = arith.constant 0 : index
    %c2_55 = arith.constant 2 : index
    %c0_56 = arith.constant 0 : index
    %c0_57 = arith.constant 0 : index
    %66 = vector.load %arg7[%c0_54, %c2_55, %c0_56, %c0_57] : memref<3x10x1x128xf32, #tpu.memory_space<vmem>>, vector<1x1x1x128xf32>
    %67 = vector.shape_cast %66 : vector<1x1x1x128xf32> to vector<1x128xf32>
    %68 = vector.broadcast %67 : vector<1x128xf32> to vector<8x128xf32>
    %69 = arith.addf %65, %68 : vector<8x128xf32>
    %70 = arith.addf %69, %62 : vector<8x128xf32>
    %cst_58 = arith.constant 2.000000e-01 : f32
    %71 = vector.broadcast %cst_58 : f32 to vector<8x128xf32>
    %72 = arith.mulf %71, %70 : vector<8x128xf32>
    %73 = arith.maximumf %70, %72 : vector<8x128xf32>
    %74 = arith.truncf %73 : vector<8x128xf32> to vector<8x128xbf16>
    %c0_59 = arith.constant 0 : index
    %c2_60 = arith.constant 2 : index
    %c0_61 = arith.constant 0 : index
    %c0_62 = arith.constant 0 : index
    %75 = vector.load %arg2[%c0_59, %c2_60, %c0_61, %c0_62] : memref<3x6x128x128xbf16, #tpu.memory_space<vmem>>, vector<1x1x128x128xbf16>
    %76 = vector.shape_cast %75 : vector<1x1x128x128xbf16> to vector<128x128xbf16>
    %cst_63 = arith.constant dense<0.000000e+00> : vector<8x128xf32>
    %77 = tpu.matmul %74, %76, %cst_63 {dimension_numbers = #tpu.dot_dimension_numbers<[1], [0], [0], [1], [0, 0, 1, 1], [], []>} : vector<8x128xbf16>, vector<128x128xbf16>, vector<8x128xf32> -> vector<8x128xf32>
    %c0_64 = arith.constant 0 : index
    %c2_65 = arith.constant 2 : index
    %c0_66 = arith.constant 0 : index
    %c0_67 = arith.constant 0 : index
    %78 = vector.load %arg3[%c0_64, %c2_65, %c0_66, %c0_67] : memref<3x6x1x128xf32, #tpu.memory_space<vmem>>, vector<1x1x1x128xf32>
    %79 = vector.shape_cast %78 : vector<1x1x1x128xf32> to vector<1x128xf32>
    %80 = vector.broadcast %79 : vector<1x128xf32> to vector<8x128xf32>
    %81 = arith.addf %77, %80 : vector<8x128xf32>
    %cst_68 = arith.constant 2.000000e-01 : f32
    %82 = vector.broadcast %cst_68 : f32 to vector<8x128xf32>
    %83 = arith.mulf %82, %81 : vector<8x128xf32>
    %84 = arith.maximumf %81, %83 : vector<8x128xf32>
    %85 = arith.truncf %84 : vector<8x128xf32> to vector<8x128xbf16>
    %86 = arith.extf %74 : vector<8x128xbf16> to vector<8x128xf32>
    %c0_69 = arith.constant 0 : index
    %c3 = arith.constant 3 : index
    %c0_70 = arith.constant 0 : index
    %c0_71 = arith.constant 0 : index
    %87 = vector.load %arg6[%c0_69, %c3, %c0_70, %c0_71] : memref<3x10x128x128xbf16, #tpu.memory_space<vmem>>, vector<1x1x128x128xbf16>
    %88 = vector.shape_cast %87 : vector<1x1x128x128xbf16> to vector<128x128xbf16>
    %cst_72 = arith.constant dense<0.000000e+00> : vector<8x128xf32>
    %89 = tpu.matmul %85, %88, %cst_72 {dimension_numbers = #tpu.dot_dimension_numbers<[1], [0], [0], [1], [0, 0, 1, 1], [], []>} : vector<8x128xbf16>, vector<128x128xbf16>, vector<8x128xf32> -> vector<8x128xf32>
    %c0_73 = arith.constant 0 : index
    %c3_74 = arith.constant 3 : index
    %c0_75 = arith.constant 0 : index
    %c0_76 = arith.constant 0 : index
    %90 = vector.load %arg7[%c0_73, %c3_74, %c0_75, %c0_76] : memref<3x10x1x128xf32, #tpu.memory_space<vmem>>, vector<1x1x1x128xf32>
    %91 = vector.shape_cast %90 : vector<1x1x1x128xf32> to vector<1x128xf32>
    %92 = vector.broadcast %91 : vector<1x128xf32> to vector<8x128xf32>
    %93 = arith.addf %89, %92 : vector<8x128xf32>
    %94 = arith.addf %93, %86 : vector<8x128xf32>
    %cst_77 = arith.constant 2.000000e-01 : f32
    %95 = vector.broadcast %cst_77 : f32 to vector<8x128xf32>
    %96 = arith.mulf %95, %94 : vector<8x128xf32>
    %97 = arith.maximumf %94, %96 : vector<8x128xf32>
    %98 = arith.truncf %97 : vector<8x128xf32> to vector<8x128xbf16>
    %c0_78 = arith.constant 0 : index
    %c1_79 = arith.constant 1 : index
    %c0_80 = arith.constant 0 : index
    %c0_81 = arith.constant 0 : index
    %99 = vector.load %arg4[%c0_78, %c1_79, %c0_80, %c0_81] : memref<3x4x128x256xbf16, #tpu.memory_space<vmem>>, vector<1x1x128x256xbf16>
    %100 = vector.shape_cast %99 : vector<1x1x128x256xbf16> to vector<128x256xbf16>
    %cst_82 = arith.constant dense<0.000000e+00> : vector<8x256xf32>
    %101 = tpu.matmul %98, %100, %cst_82 {dimension_numbers = #tpu.dot_dimension_numbers<[1], [0], [0], [1], [0, 0, 1, 1], [], []>} : vector<8x128xbf16>, vector<128x256xbf16>, vector<8x256xf32> -> vector<8x256xf32>
    %c0_83 = arith.constant 0 : index
    %c1_84 = arith.constant 1 : index
    %c0_85 = arith.constant 0 : index
    %c0_86 = arith.constant 0 : index
    %102 = vector.load %arg5[%c0_83, %c1_84, %c0_85, %c0_86] : memref<3x4x1x256xf32, #tpu.memory_space<vmem>>, vector<1x1x1x256xf32>
    %103 = vector.shape_cast %102 : vector<1x1x1x256xf32> to vector<1x256xf32>
    %104 = vector.broadcast %103 : vector<1x256xf32> to vector<8x256xf32>
    %105 = arith.addf %101, %104 : vector<8x256xf32>
    %106 = vector.extract_strided_slice %105 {offsets = [0, 0], sizes = [8, 128], strides = [1, 1]} : vector<8x256xf32> to vector<8x128xf32>
    %cst_87 = arith.constant 2.000000e-01 : f32
    %107 = vector.broadcast %cst_87 : f32 to vector<8x128xf32>
    %108 = arith.mulf %107, %106 : vector<8x128xf32>
    %109 = arith.maximumf %106, %108 : vector<8x128xf32>
    %110 = arith.truncf %109 : vector<8x128xf32> to vector<8x128xbf16>
    %111 = vector.extract_strided_slice %105 {offsets = [0, 128], sizes = [8, 128], strides = [1, 1]} : vector<8x256xf32> to vector<8x128xf32>
    %c0_88 = arith.constant 0 : index
    %c4 = arith.constant 4 : index
    %c0_89 = arith.constant 0 : index
    %c0_90 = arith.constant 0 : index
    %112 = vector.load %arg6[%c0_88, %c4, %c0_89, %c0_90] : memref<3x10x128x128xbf16, #tpu.memory_space<vmem>>, vector<1x1x128x128xbf16>
    %113 = vector.shape_cast %112 : vector<1x1x128x128xbf16> to vector<128x128xbf16>
    %cst_91 = arith.constant dense<0.000000e+00> : vector<8x128xf32>
    %114 = tpu.matmul %110, %113, %cst_91 {dimension_numbers = #tpu.dot_dimension_numbers<[1], [0], [0], [1], [0, 0, 1, 1], [], []>} : vector<8x128xbf16>, vector<128x128xbf16>, vector<8x128xf32> -> vector<8x128xf32>
    %c0_92 = arith.constant 0 : index
    %c4_93 = arith.constant 4 : index
    %c0_94 = arith.constant 0 : index
    %c0_95 = arith.constant 0 : index
    %115 = vector.load %arg7[%c0_92, %c4_93, %c0_94, %c0_95] : memref<3x10x1x128xf32, #tpu.memory_space<vmem>>, vector<1x1x1x128xf32>
    %116 = vector.shape_cast %115 : vector<1x1x1x128xf32> to vector<1x128xf32>
    %117 = vector.broadcast %116 : vector<1x128xf32> to vector<8x128xf32>
    %118 = arith.addf %114, %117 : vector<8x128xf32>
    %119 = arith.addf %118, %111 : vector<8x128xf32>
    %cst_96 = arith.constant 2.000000e-01 : f32
    %120 = vector.broadcast %cst_96 : f32 to vector<8x128xf32>
    %121 = arith.mulf %120, %119 : vector<8x128xf32>
    %122 = arith.maximumf %119, %121 : vector<8x128xf32>
    %123 = arith.truncf %122 : vector<8x128xf32> to vector<8x128xbf16>
    %c0_97 = arith.constant 0 : index
    %c2_98 = arith.constant 2 : index
    %c0_99 = arith.constant 0 : index
    %c0_100 = arith.constant 0 : index
    %124 = vector.load %arg4[%c0_97, %c2_98, %c0_99, %c0_100] : memref<3x4x128x256xbf16, #tpu.memory_space<vmem>>, vector<1x1x128x256xbf16>
    %125 = vector.shape_cast %124 : vector<1x1x128x256xbf16> to vector<128x256xbf16>
    %cst_101 = arith.constant dense<0.000000e+00> : vector<8x256xf32>
    %126 = tpu.matmul %123, %125, %cst_101 {dimension_numbers = #tpu.dot_dimension_numbers<[1], [0], [0], [1], [0, 0, 1, 1], [], []>} : vector<8x128xbf16>, vector<128x256xbf16>, vector<8x256xf32> -> vector<8x256xf32>
    %c0_102 = arith.constant 0 : index
    %c2_103 = arith.constant 2 : index
    %c0_104 = arith.constant 0 : index
    %c0_105 = arith.constant 0 : index
    %127 = vector.load %arg5[%c0_102, %c2_103, %c0_104, %c0_105] : memref<3x4x1x256xf32, #tpu.memory_space<vmem>>, vector<1x1x1x256xf32>
    %128 = vector.shape_cast %127 : vector<1x1x1x256xf32> to vector<1x256xf32>
    %129 = vector.broadcast %128 : vector<1x256xf32> to vector<8x256xf32>
    %130 = arith.addf %126, %129 : vector<8x256xf32>
    %131 = vector.extract_strided_slice %130 {offsets = [0, 0], sizes = [8, 128], strides = [1, 1]} : vector<8x256xf32> to vector<8x128xf32>
    %cst_106 = arith.constant 2.000000e-01 : f32
    %132 = vector.broadcast %cst_106 : f32 to vector<8x128xf32>
    %133 = arith.mulf %132, %131 : vector<8x128xf32>
    %134 = arith.maximumf %131, %133 : vector<8x128xf32>
    %135 = arith.truncf %134 : vector<8x128xf32> to vector<8x128xbf16>
    %136 = vector.extract_strided_slice %130 {offsets = [0, 128], sizes = [8, 128], strides = [1, 1]} : vector<8x256xf32> to vector<8x128xf32>
    %c0_107 = arith.constant 0 : index
    %c5 = arith.constant 5 : index
    %c0_108 = arith.constant 0 : index
    %c0_109 = arith.constant 0 : index
    %137 = vector.load %arg6[%c0_107, %c5, %c0_108, %c0_109] : memref<3x10x128x128xbf16, #tpu.memory_space<vmem>>, vector<1x1x128x128xbf16>
    %138 = vector.shape_cast %137 : vector<1x1x128x128xbf16> to vector<128x128xbf16>
    %cst_110 = arith.constant dense<0.000000e+00> : vector<8x128xf32>
    %139 = tpu.matmul %135, %138, %cst_110 {dimension_numbers = #tpu.dot_dimension_numbers<[1], [0], [0], [1], [0, 0, 1, 1], [], []>} : vector<8x128xbf16>, vector<128x128xbf16>, vector<8x128xf32> -> vector<8x128xf32>
    %c0_111 = arith.constant 0 : index
    %c5_112 = arith.constant 5 : index
    %c0_113 = arith.constant 0 : index
    %c0_114 = arith.constant 0 : index
    %140 = vector.load %arg7[%c0_111, %c5_112, %c0_113, %c0_114] : memref<3x10x1x128xf32, #tpu.memory_space<vmem>>, vector<1x1x1x128xf32>
    %141 = vector.shape_cast %140 : vector<1x1x1x128xf32> to vector<1x128xf32>
    %142 = vector.broadcast %141 : vector<1x128xf32> to vector<8x128xf32>
    %143 = arith.addf %139, %142 : vector<8x128xf32>
    %144 = arith.addf %143, %136 : vector<8x128xf32>
    %cst_115 = arith.constant 2.000000e-01 : f32
    %145 = vector.broadcast %cst_115 : f32 to vector<8x128xf32>
    %146 = arith.mulf %145, %144 : vector<8x128xf32>
    %147 = arith.maximumf %144, %146 : vector<8x128xf32>
    %148 = arith.truncf %147 : vector<8x128xf32> to vector<8x128xbf16>
    %c0_116 = arith.constant 0 : index
    %c3_117 = arith.constant 3 : index
    %c0_118 = arith.constant 0 : index
    %c0_119 = arith.constant 0 : index
    %149 = vector.load %arg2[%c0_116, %c3_117, %c0_118, %c0_119] : memref<3x6x128x128xbf16, #tpu.memory_space<vmem>>, vector<1x1x128x128xbf16>
    %150 = vector.shape_cast %149 : vector<1x1x128x128xbf16> to vector<128x128xbf16>
    %cst_120 = arith.constant dense<0.000000e+00> : vector<8x128xf32>
    %151 = tpu.matmul %148, %150, %cst_120 {dimension_numbers = #tpu.dot_dimension_numbers<[1], [0], [0], [1], [0, 0, 1, 1], [], []>} : vector<8x128xbf16>, vector<128x128xbf16>, vector<8x128xf32> -> vector<8x128xf32>
    %c0_121 = arith.constant 0 : index
    %c3_122 = arith.constant 3 : index
    %c0_123 = arith.constant 0 : index
    %c0_124 = arith.constant 0 : index
    %152 = vector.load %arg3[%c0_121, %c3_122, %c0_123, %c0_124] : memref<3x6x1x128xf32, #tpu.memory_space<vmem>>, vector<1x1x1x128xf32>
    %153 = vector.shape_cast %152 : vector<1x1x1x128xf32> to vector<1x128xf32>
    %154 = vector.broadcast %153 : vector<1x128xf32> to vector<8x128xf32>
    %155 = arith.addf %151, %154 : vector<8x128xf32>
    %cst_125 = arith.constant 2.000000e-01 : f32
    %156 = vector.broadcast %cst_125 : f32 to vector<8x128xf32>
    %157 = arith.mulf %156, %155 : vector<8x128xf32>
    %158 = arith.maximumf %155, %157 : vector<8x128xf32>
    %159 = arith.truncf %158 : vector<8x128xf32> to vector<8x128xbf16>
    %160 = arith.extf %148 : vector<8x128xbf16> to vector<8x128xf32>
    %c0_126 = arith.constant 0 : index
    %c6 = arith.constant 6 : index
    %c0_127 = arith.constant 0 : index
    %c0_128 = arith.constant 0 : index
    %161 = vector.load %arg6[%c0_126, %c6, %c0_127, %c0_128] : memref<3x10x128x128xbf16, #tpu.memory_space<vmem>>, vector<1x1x128x128xbf16>
    %162 = vector.shape_cast %161 : vector<1x1x128x128xbf16> to vector<128x128xbf16>
    %cst_129 = arith.constant dense<0.000000e+00> : vector<8x128xf32>
    %163 = tpu.matmul %159, %162, %cst_129 {dimension_numbers = #tpu.dot_dimension_numbers<[1], [0], [0], [1], [0, 0, 1, 1], [], []>} : vector<8x128xbf16>, vector<128x128xbf16>, vector<8x128xf32> -> vector<8x128xf32>
    %c0_130 = arith.constant 0 : index
    %c6_131 = arith.constant 6 : index
    %c0_132 = arith.constant 0 : index
    %c0_133 = arith.constant 0 : index
    %164 = vector.load %arg7[%c0_130, %c6_131, %c0_132, %c0_133] : memref<3x10x1x128xf32, #tpu.memory_space<vmem>>, vector<1x1x1x128xf32>
    %165 = vector.shape_cast %164 : vector<1x1x1x128xf32> to vector<1x128xf32>
    %166 = vector.broadcast %165 : vector<1x128xf32> to vector<8x128xf32>
    %167 = arith.addf %163, %166 : vector<8x128xf32>
    %168 = arith.addf %167, %160 : vector<8x128xf32>
    %cst_134 = arith.constant 2.000000e-01 : f32
    %169 = vector.broadcast %cst_134 : f32 to vector<8x128xf32>
    %170 = arith.mulf %169, %168 : vector<8x128xf32>
    %171 = arith.maximumf %168, %170 : vector<8x128xf32>
    %172 = arith.truncf %171 : vector<8x128xf32> to vector<8x128xbf16>
    %c0_135 = arith.constant 0 : index
    %c4_136 = arith.constant 4 : index
    %c0_137 = arith.constant 0 : index
    %c0_138 = arith.constant 0 : index
    %173 = vector.load %arg2[%c0_135, %c4_136, %c0_137, %c0_138] : memref<3x6x128x128xbf16, #tpu.memory_space<vmem>>, vector<1x1x128x128xbf16>
    %174 = vector.shape_cast %173 : vector<1x1x128x128xbf16> to vector<128x128xbf16>
    %cst_139 = arith.constant dense<0.000000e+00> : vector<8x128xf32>
    %175 = tpu.matmul %172, %174, %cst_139 {dimension_numbers = #tpu.dot_dimension_numbers<[1], [0], [0], [1], [0, 0, 1, 1], [], []>} : vector<8x128xbf16>, vector<128x128xbf16>, vector<8x128xf32> -> vector<8x128xf32>
    %c0_140 = arith.constant 0 : index
    %c4_141 = arith.constant 4 : index
    %c0_142 = arith.constant 0 : index
    %c0_143 = arith.constant 0 : index
    %176 = vector.load %arg3[%c0_140, %c4_141, %c0_142, %c0_143] : memref<3x6x1x128xf32, #tpu.memory_space<vmem>>, vector<1x1x1x128xf32>
    %177 = vector.shape_cast %176 : vector<1x1x1x128xf32> to vector<1x128xf32>
    %178 = vector.broadcast %177 : vector<1x128xf32> to vector<8x128xf32>
    %179 = arith.addf %175, %178 : vector<8x128xf32>
    %cst_144 = arith.constant 2.000000e-01 : f32
    %180 = vector.broadcast %cst_144 : f32 to vector<8x128xf32>
    %181 = arith.mulf %180, %179 : vector<8x128xf32>
    %182 = arith.maximumf %179, %181 : vector<8x128xf32>
    %183 = arith.truncf %182 : vector<8x128xf32> to vector<8x128xbf16>
    %184 = arith.extf %172 : vector<8x128xbf16> to vector<8x128xf32>
    %c0_145 = arith.constant 0 : index
    %c7 = arith.constant 7 : index
    %c0_146 = arith.constant 0 : index
    %c0_147 = arith.constant 0 : index
    %185 = vector.load %arg6[%c0_145, %c7, %c0_146, %c0_147] : memref<3x10x128x128xbf16, #tpu.memory_space<vmem>>, vector<1x1x128x128xbf16>
    %186 = vector.shape_cast %185 : vector<1x1x128x128xbf16> to vector<128x128xbf16>
    %cst_148 = arith.constant dense<0.000000e+00> : vector<8x128xf32>
    %187 = tpu.matmul %183, %186, %cst_148 {dimension_numbers = #tpu.dot_dimension_numbers<[1], [0], [0], [1], [0, 0, 1, 1], [], []>} : vector<8x128xbf16>, vector<128x128xbf16>, vector<8x128xf32> -> vector<8x128xf32>
    %c0_149 = arith.constant 0 : index
    %c7_150 = arith.constant 7 : index
    %c0_151 = arith.constant 0 : index
    %c0_152 = arith.constant 0 : index
    %188 = vector.load %arg7[%c0_149, %c7_150, %c0_151, %c0_152] : memref<3x10x1x128xf32, #tpu.memory_space<vmem>>, vector<1x1x1x128xf32>
    %189 = vector.shape_cast %188 : vector<1x1x1x128xf32> to vector<1x128xf32>
    %190 = vector.broadcast %189 : vector<1x128xf32> to vector<8x128xf32>
    %191 = arith.addf %187, %190 : vector<8x128xf32>
    %192 = arith.addf %191, %184 : vector<8x128xf32>
    %cst_153 = arith.constant 2.000000e-01 : f32
    %193 = vector.broadcast %cst_153 : f32 to vector<8x128xf32>
    %194 = arith.mulf %193, %192 : vector<8x128xf32>
    %195 = arith.maximumf %192, %194 : vector<8x128xf32>
    %196 = arith.truncf %195 : vector<8x128xf32> to vector<8x128xbf16>
    %c0_154 = arith.constant 0 : index
    %c5_155 = arith.constant 5 : index
    %c0_156 = arith.constant 0 : index
    %c0_157 = arith.constant 0 : index
    %197 = vector.load %arg2[%c0_154, %c5_155, %c0_156, %c0_157] : memref<3x6x128x128xbf16, #tpu.memory_space<vmem>>, vector<1x1x128x128xbf16>
    %198 = vector.shape_cast %197 : vector<1x1x128x128xbf16> to vector<128x128xbf16>
    %cst_158 = arith.constant dense<0.000000e+00> : vector<8x128xf32>
    %199 = tpu.matmul %196, %198, %cst_158 {dimension_numbers = #tpu.dot_dimension_numbers<[1], [0], [0], [1], [0, 0, 1, 1], [], []>} : vector<8x128xbf16>, vector<128x128xbf16>, vector<8x128xf32> -> vector<8x128xf32>
    %c0_159 = arith.constant 0 : index
    %c5_160 = arith.constant 5 : index
    %c0_161 = arith.constant 0 : index
    %c0_162 = arith.constant 0 : index
    %200 = vector.load %arg3[%c0_159, %c5_160, %c0_161, %c0_162] : memref<3x6x1x128xf32, #tpu.memory_space<vmem>>, vector<1x1x1x128xf32>
    %201 = vector.shape_cast %200 : vector<1x1x1x128xf32> to vector<1x128xf32>
    %202 = vector.broadcast %201 : vector<1x128xf32> to vector<8x128xf32>
    %203 = arith.addf %199, %202 : vector<8x128xf32>
    %cst_163 = arith.constant 2.000000e-01 : f32
    %204 = vector.broadcast %cst_163 : f32 to vector<8x128xf32>
    %205 = arith.mulf %204, %203 : vector<8x128xf32>
    %206 = arith.maximumf %203, %205 : vector<8x128xf32>
    %207 = arith.truncf %206 : vector<8x128xf32> to vector<8x128xbf16>
    %208 = arith.extf %196 : vector<8x128xbf16> to vector<8x128xf32>
    %c0_164 = arith.constant 0 : index
    %c8 = arith.constant 8 : index
    %c0_165 = arith.constant 0 : index
    %c0_166 = arith.constant 0 : index
    %209 = vector.load %arg6[%c0_164, %c8, %c0_165, %c0_166] : memref<3x10x128x128xbf16, #tpu.memory_space<vmem>>, vector<1x1x128x128xbf16>
    %210 = vector.shape_cast %209 : vector<1x1x128x128xbf16> to vector<128x128xbf16>
    %cst_167 = arith.constant dense<0.000000e+00> : vector<8x128xf32>
    %211 = tpu.matmul %207, %210, %cst_167 {dimension_numbers = #tpu.dot_dimension_numbers<[1], [0], [0], [1], [0, 0, 1, 1], [], []>} : vector<8x128xbf16>, vector<128x128xbf16>, vector<8x128xf32> -> vector<8x128xf32>
    %c0_168 = arith.constant 0 : index
    %c8_169 = arith.constant 8 : index
    %c0_170 = arith.constant 0 : index
    %c0_171 = arith.constant 0 : index
    %212 = vector.load %arg7[%c0_168, %c8_169, %c0_170, %c0_171] : memref<3x10x1x128xf32, #tpu.memory_space<vmem>>, vector<1x1x1x128xf32>
    %213 = vector.shape_cast %212 : vector<1x1x1x128xf32> to vector<1x128xf32>
    %214 = vector.broadcast %213 : vector<1x128xf32> to vector<8x128xf32>
    %215 = arith.addf %211, %214 : vector<8x128xf32>
    %216 = arith.addf %215, %208 : vector<8x128xf32>
    %cst_172 = arith.constant 2.000000e-01 : f32
    %217 = vector.broadcast %cst_172 : f32 to vector<8x128xf32>
    %218 = arith.mulf %217, %216 : vector<8x128xf32>
    %219 = arith.maximumf %216, %218 : vector<8x128xf32>
    %220 = arith.truncf %219 : vector<8x128xf32> to vector<8x128xbf16>
    %c0_173 = arith.constant 0 : index
    %c3_174 = arith.constant 3 : index
    %c0_175 = arith.constant 0 : index
    %c0_176 = arith.constant 0 : index
    %221 = vector.load %arg4[%c0_173, %c3_174, %c0_175, %c0_176] : memref<3x4x128x256xbf16, #tpu.memory_space<vmem>>, vector<1x1x128x256xbf16>
    %222 = vector.shape_cast %221 : vector<1x1x128x256xbf16> to vector<128x256xbf16>
    %cst_177 = arith.constant dense<0.000000e+00> : vector<8x256xf32>
    %223 = tpu.matmul %220, %222, %cst_177 {dimension_numbers = #tpu.dot_dimension_numbers<[1], [0], [0], [1], [0, 0, 1, 1], [], []>} : vector<8x128xbf16>, vector<128x256xbf16>, vector<8x256xf32> -> vector<8x256xf32>
    %c0_178 = arith.constant 0 : index
    %c3_179 = arith.constant 3 : index
    %c0_180 = arith.constant 0 : index
    %c0_181 = arith.constant 0 : index
    %224 = vector.load %arg5[%c0_178, %c3_179, %c0_180, %c0_181] : memref<3x4x1x256xf32, #tpu.memory_space<vmem>>, vector<1x1x1x256xf32>
    %225 = vector.shape_cast %224 : vector<1x1x1x256xf32> to vector<1x256xf32>
    %226 = vector.broadcast %225 : vector<1x256xf32> to vector<8x256xf32>
    %227 = arith.addf %223, %226 : vector<8x256xf32>
    %228 = vector.extract_strided_slice %227 {offsets = [0, 0], sizes = [8, 128], strides = [1, 1]} : vector<8x256xf32> to vector<8x128xf32>
    %cst_182 = arith.constant 2.000000e-01 : f32
    %229 = vector.broadcast %cst_182 : f32 to vector<8x128xf32>
    %230 = arith.mulf %229, %228 : vector<8x128xf32>
    %231 = arith.maximumf %228, %230 : vector<8x128xf32>
    %232 = arith.truncf %231 : vector<8x128xf32> to vector<8x128xbf16>
    %233 = vector.extract_strided_slice %227 {offsets = [0, 128], sizes = [8, 128], strides = [1, 1]} : vector<8x256xf32> to vector<8x128xf32>
    %c0_183 = arith.constant 0 : index
    %c9 = arith.constant 9 : index
    %c0_184 = arith.constant 0 : index
    %c0_185 = arith.constant 0 : index
    %234 = vector.load %arg6[%c0_183, %c9, %c0_184, %c0_185] : memref<3x10x128x128xbf16, #tpu.memory_space<vmem>>, vector<1x1x128x128xbf16>
    %235 = vector.shape_cast %234 : vector<1x1x128x128xbf16> to vector<128x128xbf16>
    %cst_186 = arith.constant dense<0.000000e+00> : vector<8x128xf32>
    %236 = tpu.matmul %232, %235, %cst_186 {dimension_numbers = #tpu.dot_dimension_numbers<[1], [0], [0], [1], [0, 0, 1, 1], [], []>} : vector<8x128xbf16>, vector<128x128xbf16>, vector<8x128xf32> -> vector<8x128xf32>
    %c0_187 = arith.constant 0 : index
    %c9_188 = arith.constant 9 : index
    %c0_189 = arith.constant 0 : index
    %c0_190 = arith.constant 0 : index
    %237 = vector.load %arg7[%c0_187, %c9_188, %c0_189, %c0_190] : memref<3x10x1x128xf32, #tpu.memory_space<vmem>>, vector<1x1x1x128xf32>
    %238 = vector.shape_cast %237 : vector<1x1x1x128xf32> to vector<1x128xf32>
    %239 = vector.broadcast %238 : vector<1x128xf32> to vector<8x128xf32>
    %240 = arith.addf %236, %239 : vector<8x128xf32>
    %241 = arith.addf %240, %233 : vector<8x128xf32>
    %cst_191 = arith.constant 2.000000e-01 : f32
    %242 = vector.broadcast %cst_191 : f32 to vector<8x128xf32>
    %243 = arith.mulf %242, %241 : vector<8x128xf32>
    %244 = arith.maximumf %241, %243 : vector<8x128xf32>
    %245 = arith.addf %1, %244 : vector<8x128xf32>
    %c1_192 = arith.constant 1 : index
    %c0_193 = arith.constant 0 : index
    %c0_194 = arith.constant 0 : index
    %c0_195 = arith.constant 0 : index
    %246 = vector.load %arg4[%c1_192, %c0_193, %c0_194, %c0_195] : memref<3x4x128x256xbf16, #tpu.memory_space<vmem>>, vector<1x1x128x256xbf16>
    %247 = vector.shape_cast %246 : vector<1x1x128x256xbf16> to vector<128x256xbf16>
    %cst_196 = arith.constant dense<0.000000e+00> : vector<8x256xf32>
    %248 = tpu.matmul %0, %247, %cst_196 {dimension_numbers = #tpu.dot_dimension_numbers<[1], [0], [0], [1], [0, 0, 1, 1], [], []>} : vector<8x128xbf16>, vector<128x256xbf16>, vector<8x256xf32> -> vector<8x256xf32>
    %c1_197 = arith.constant 1 : index
    %c0_198 = arith.constant 0 : index
    %c0_199 = arith.constant 0 : index
    %c0_200 = arith.constant 0 : index
    %249 = vector.load %arg5[%c1_197, %c0_198, %c0_199, %c0_200] : memref<3x4x1x256xf32, #tpu.memory_space<vmem>>, vector<1x1x1x256xf32>
    %250 = vector.shape_cast %249 : vector<1x1x1x256xf32> to vector<1x256xf32>
    %251 = vector.broadcast %250 : vector<1x256xf32> to vector<8x256xf32>
    %252 = arith.addf %248, %251 : vector<8x256xf32>
    %253 = vector.extract_strided_slice %252 {offsets = [0, 0], sizes = [8, 128], strides = [1, 1]} : vector<8x256xf32> to vector<8x128xf32>
    %cst_201 = arith.constant 2.000000e-01 : f32
    %254 = vector.broadcast %cst_201 : f32 to vector<8x128xf32>
    %255 = arith.mulf %254, %253 : vector<8x128xf32>
    %256 = arith.maximumf %253, %255 : vector<8x128xf32>
    %257 = arith.truncf %256 : vector<8x128xf32> to vector<8x128xbf16>
    %258 = vector.extract_strided_slice %252 {offsets = [0, 128], sizes = [8, 128], strides = [1, 1]} : vector<8x256xf32> to vector<8x128xf32>
    %c1_202 = arith.constant 1 : index
    %c0_203 = arith.constant 0 : index
    %c0_204 = arith.constant 0 : index
    %c0_205 = arith.constant 0 : index
    %259 = vector.load %arg6[%c1_202, %c0_203, %c0_204, %c0_205] : memref<3x10x128x128xbf16, #tpu.memory_space<vmem>>, vector<1x1x128x128xbf16>
    %260 = vector.shape_cast %259 : vector<1x1x128x128xbf16> to vector<128x128xbf16>
    %cst_206 = arith.constant dense<0.000000e+00> : vector<8x128xf32>
    %261 = tpu.matmul %257, %260, %cst_206 {dimension_numbers = #tpu.dot_dimension_numbers<[1], [0], [0], [1], [0, 0, 1, 1], [], []>} : vector<8x128xbf16>, vector<128x128xbf16>, vector<8x128xf32> -> vector<8x128xf32>
    %c1_207 = arith.constant 1 : index
    %c0_208 = arith.constant 0 : index
    %c0_209 = arith.constant 0 : index
    %c0_210 = arith.constant 0 : index
    %262 = vector.load %arg7[%c1_207, %c0_208, %c0_209, %c0_210] : memref<3x10x1x128xf32, #tpu.memory_space<vmem>>, vector<1x1x1x128xf32>
    %263 = vector.shape_cast %262 : vector<1x1x1x128xf32> to vector<1x128xf32>
    %264 = vector.broadcast %263 : vector<1x128xf32> to vector<8x128xf32>
    %265 = arith.addf %261, %264 : vector<8x128xf32>
    %266 = arith.addf %265, %258 : vector<8x128xf32>
    %cst_211 = arith.constant 2.000000e-01 : f32
    %267 = vector.broadcast %cst_211 : f32 to vector<8x128xf32>
    %268 = arith.mulf %267, %266 : vector<8x128xf32>
    %269 = arith.maximumf %266, %268 : vector<8x128xf32>
    %270 = arith.truncf %269 : vector<8x128xf32> to vector<8x128xbf16>
    %c1_212 = arith.constant 1 : index
    %c0_213 = arith.constant 0 : index
    %c0_214 = arith.constant 0 : index
    %c0_215 = arith.constant 0 : index
    %271 = vector.load %arg2[%c1_212, %c0_213, %c0_214, %c0_215] : memref<3x6x128x128xbf16, #tpu.memory_space<vmem>>, vector<1x1x128x128xbf16>
    %272 = vector.shape_cast %271 : vector<1x1x128x128xbf16> to vector<128x128xbf16>
    %cst_216 = arith.constant dense<0.000000e+00> : vector<8x128xf32>
    %273 = tpu.matmul %270, %272, %cst_216 {dimension_numbers = #tpu.dot_dimension_numbers<[1], [0], [0], [1], [0, 0, 1, 1], [], []>} : vector<8x128xbf16>, vector<128x128xbf16>, vector<8x128xf32> -> vector<8x128xf32>
    %c1_217 = arith.constant 1 : index
    %c0_218 = arith.constant 0 : index
    %c0_219 = arith.constant 0 : index
    %c0_220 = arith.constant 0 : index
    %274 = vector.load %arg3[%c1_217, %c0_218, %c0_219, %c0_220] : memref<3x6x1x128xf32, #tpu.memory_space<vmem>>, vector<1x1x1x128xf32>
    %275 = vector.shape_cast %274 : vector<1x1x1x128xf32> to vector<1x128xf32>
    %276 = vector.broadcast %275 : vector<1x128xf32> to vector<8x128xf32>
    %277 = arith.addf %273, %276 : vector<8x128xf32>
    %cst_221 = arith.constant 2.000000e-01 : f32
    %278 = vector.broadcast %cst_221 : f32 to vector<8x128xf32>
    %279 = arith.mulf %278, %277 : vector<8x128xf32>
    %280 = arith.maximumf %277, %279 : vector<8x128xf32>
    %281 = arith.truncf %280 : vector<8x128xf32> to vector<8x128xbf16>
    %282 = arith.extf %270 : vector<8x128xbf16> to vector<8x128xf32>
    %c1_222 = arith.constant 1 : index
    %c1_223 = arith.constant 1 : index
    %c0_224 = arith.constant 0 : index
    %c0_225 = arith.constant 0 : index
    %283 = vector.load %arg6[%c1_222, %c1_223, %c0_224, %c0_225] : memref<3x10x128x128xbf16, #tpu.memory_space<vmem>>, vector<1x1x128x128xbf16>
    %284 = vector.shape_cast %283 : vector<1x1x128x128xbf16> to vector<128x128xbf16>
    %cst_226 = arith.constant dense<0.000000e+00> : vector<8x128xf32>
    %285 = tpu.matmul %281, %284, %cst_226 {dimension_numbers = #tpu.dot_dimension_numbers<[1], [0], [0], [1], [0, 0, 1, 1], [], []>} : vector<8x128xbf16>, vector<128x128xbf16>, vector<8x128xf32> -> vector<8x128xf32>
    %c1_227 = arith.constant 1 : index
    %c1_228 = arith.constant 1 : index
    %c0_229 = arith.constant 0 : index
    %c0_230 = arith.constant 0 : index
    %286 = vector.load %arg7[%c1_227, %c1_228, %c0_229, %c0_230] : memref<3x10x1x128xf32, #tpu.memory_space<vmem>>, vector<1x1x1x128xf32>
    %287 = vector.shape_cast %286 : vector<1x1x1x128xf32> to vector<1x128xf32>
    %288 = vector.broadcast %287 : vector<1x128xf32> to vector<8x128xf32>
    %289 = arith.addf %285, %288 : vector<8x128xf32>
    %290 = arith.addf %289, %282 : vector<8x128xf32>
    %cst_231 = arith.constant 2.000000e-01 : f32
    %291 = vector.broadcast %cst_231 : f32 to vector<8x128xf32>
    %292 = arith.mulf %291, %290 : vector<8x128xf32>
    %293 = arith.maximumf %290, %292 : vector<8x128xf32>
    %294 = arith.truncf %293 : vector<8x128xf32> to vector<8x128xbf16>
    %c1_232 = arith.constant 1 : index
    %c1_233 = arith.constant 1 : index
    %c0_234 = arith.constant 0 : index
    %c0_235 = arith.constant 0 : index
    %295 = vector.load %arg2[%c1_232, %c1_233, %c0_234, %c0_235] : memref<3x6x128x128xbf16, #tpu.memory_space<vmem>>, vector<1x1x128x128xbf16>
    %296 = vector.shape_cast %295 : vector<1x1x128x128xbf16> to vector<128x128xbf16>
    %cst_236 = arith.constant dense<0.000000e+00> : vector<8x128xf32>
    %297 = tpu.matmul %294, %296, %cst_236 {dimension_numbers = #tpu.dot_dimension_numbers<[1], [0], [0], [1], [0, 0, 1, 1], [], []>} : vector<8x128xbf16>, vector<128x128xbf16>, vector<8x128xf32> -> vector<8x128xf32>
    %c1_237 = arith.constant 1 : index
    %c1_238 = arith.constant 1 : index
    %c0_239 = arith.constant 0 : index
    %c0_240 = arith.constant 0 : index
    %298 = vector.load %arg3[%c1_237, %c1_238, %c0_239, %c0_240] : memref<3x6x1x128xf32, #tpu.memory_space<vmem>>, vector<1x1x1x128xf32>
    %299 = vector.shape_cast %298 : vector<1x1x1x128xf32> to vector<1x128xf32>
    %300 = vector.broadcast %299 : vector<1x128xf32> to vector<8x128xf32>
    %301 = arith.addf %297, %300 : vector<8x128xf32>
    %cst_241 = arith.constant 2.000000e-01 : f32
    %302 = vector.broadcast %cst_241 : f32 to vector<8x128xf32>
    %303 = arith.mulf %302, %301 : vector<8x128xf32>
    %304 = arith.maximumf %301, %303 : vector<8x128xf32>
    %305 = arith.truncf %304 : vector<8x128xf32> to vector<8x128xbf16>
    %306 = arith.extf %294 : vector<8x128xbf16> to vector<8x128xf32>
    %c1_242 = arith.constant 1 : index
    %c2_243 = arith.constant 2 : index
    %c0_244 = arith.constant 0 : index
    %c0_245 = arith.constant 0 : index
    %307 = vector.load %arg6[%c1_242, %c2_243, %c0_244, %c0_245] : memref<3x10x128x128xbf16, #tpu.memory_space<vmem>>, vector<1x1x128x128xbf16>
    %308 = vector.shape_cast %307 : vector<1x1x128x128xbf16> to vector<128x128xbf16>
    %cst_246 = arith.constant dense<0.000000e+00> : vector<8x128xf32>
    %309 = tpu.matmul %305, %308, %cst_246 {dimension_numbers = #tpu.dot_dimension_numbers<[1], [0], [0], [1], [0, 0, 1, 1], [], []>} : vector<8x128xbf16>, vector<128x128xbf16>, vector<8x128xf32> -> vector<8x128xf32>
    %c1_247 = arith.constant 1 : index
    %c2_248 = arith.constant 2 : index
    %c0_249 = arith.constant 0 : index
    %c0_250 = arith.constant 0 : index
    %310 = vector.load %arg7[%c1_247, %c2_248, %c0_249, %c0_250] : memref<3x10x1x128xf32, #tpu.memory_space<vmem>>, vector<1x1x1x128xf32>
    %311 = vector.shape_cast %310 : vector<1x1x1x128xf32> to vector<1x128xf32>
    %312 = vector.broadcast %311 : vector<1x128xf32> to vector<8x128xf32>
    %313 = arith.addf %309, %312 : vector<8x128xf32>
    %314 = arith.addf %313, %306 : vector<8x128xf32>
    %cst_251 = arith.constant 2.000000e-01 : f32
    %315 = vector.broadcast %cst_251 : f32 to vector<8x128xf32>
    %316 = arith.mulf %315, %314 : vector<8x128xf32>
    %317 = arith.maximumf %314, %316 : vector<8x128xf32>
    %318 = arith.truncf %317 : vector<8x128xf32> to vector<8x128xbf16>
    %c1_252 = arith.constant 1 : index
    %c2_253 = arith.constant 2 : index
    %c0_254 = arith.constant 0 : index
    %c0_255 = arith.constant 0 : index
    %319 = vector.load %arg2[%c1_252, %c2_253, %c0_254, %c0_255] : memref<3x6x128x128xbf16, #tpu.memory_space<vmem>>, vector<1x1x128x128xbf16>
    %320 = vector.shape_cast %319 : vector<1x1x128x128xbf16> to vector<128x128xbf16>
    %cst_256 = arith.constant dense<0.000000e+00> : vector<8x128xf32>
    %321 = tpu.matmul %318, %320, %cst_256 {dimension_numbers = #tpu.dot_dimension_numbers<[1], [0], [0], [1], [0, 0, 1, 1], [], []>} : vector<8x128xbf16>, vector<128x128xbf16>, vector<8x128xf32> -> vector<8x128xf32>
    %c1_257 = arith.constant 1 : index
    %c2_258 = arith.constant 2 : index
    %c0_259 = arith.constant 0 : index
    %c0_260 = arith.constant 0 : index
    %322 = vector.load %arg3[%c1_257, %c2_258, %c0_259, %c0_260] : memref<3x6x1x128xf32, #tpu.memory_space<vmem>>, vector<1x1x1x128xf32>
    %323 = vector.shape_cast %322 : vector<1x1x1x128xf32> to vector<1x128xf32>
    %324 = vector.broadcast %323 : vector<1x128xf32> to vector<8x128xf32>
    %325 = arith.addf %321, %324 : vector<8x128xf32>
    %cst_261 = arith.constant 2.000000e-01 : f32
    %326 = vector.broadcast %cst_261 : f32 to vector<8x128xf32>
    %327 = arith.mulf %326, %325 : vector<8x128xf32>
    %328 = arith.maximumf %325, %327 : vector<8x128xf32>
    %329 = arith.truncf %328 : vector<8x128xf32> to vector<8x128xbf16>
    %330 = arith.extf %318 : vector<8x128xbf16> to vector<8x128xf32>
    %c1_262 = arith.constant 1 : index
    %c3_263 = arith.constant 3 : index
    %c0_264 = arith.constant 0 : index
    %c0_265 = arith.constant 0 : index
    %331 = vector.load %arg6[%c1_262, %c3_263, %c0_264, %c0_265] : memref<3x10x128x128xbf16, #tpu.memory_space<vmem>>, vector<1x1x128x128xbf16>
    %332 = vector.shape_cast %331 : vector<1x1x128x128xbf16> to vector<128x128xbf16>
    %cst_266 = arith.constant dense<0.000000e+00> : vector<8x128xf32>
    %333 = tpu.matmul %329, %332, %cst_266 {dimension_numbers = #tpu.dot_dimension_numbers<[1], [0], [0], [1], [0, 0, 1, 1], [], []>} : vector<8x128xbf16>, vector<128x128xbf16>, vector<8x128xf32> -> vector<8x128xf32>
    %c1_267 = arith.constant 1 : index
    %c3_268 = arith.constant 3 : index
    %c0_269 = arith.constant 0 : index
    %c0_270 = arith.constant 0 : index
    %334 = vector.load %arg7[%c1_267, %c3_268, %c0_269, %c0_270] : memref<3x10x1x128xf32, #tpu.memory_space<vmem>>, vector<1x1x1x128xf32>
    %335 = vector.shape_cast %334 : vector<1x1x1x128xf32> to vector<1x128xf32>
    %336 = vector.broadcast %335 : vector<1x128xf32> to vector<8x128xf32>
    %337 = arith.addf %333, %336 : vector<8x128xf32>
    %338 = arith.addf %337, %330 : vector<8x128xf32>
    %cst_271 = arith.constant 2.000000e-01 : f32
    %339 = vector.broadcast %cst_271 : f32 to vector<8x128xf32>
    %340 = arith.mulf %339, %338 : vector<8x128xf32>
    %341 = arith.maximumf %338, %340 : vector<8x128xf32>
    %342 = arith.truncf %341 : vector<8x128xf32> to vector<8x128xbf16>
    %c1_272 = arith.constant 1 : index
    %c1_273 = arith.constant 1 : index
    %c0_274 = arith.constant 0 : index
    %c0_275 = arith.constant 0 : index
    %343 = vector.load %arg4[%c1_272, %c1_273, %c0_274, %c0_275] : memref<3x4x128x256xbf16, #tpu.memory_space<vmem>>, vector<1x1x128x256xbf16>
    %344 = vector.shape_cast %343 : vector<1x1x128x256xbf16> to vector<128x256xbf16>
    %cst_276 = arith.constant dense<0.000000e+00> : vector<8x256xf32>
    %345 = tpu.matmul %342, %344, %cst_276 {dimension_numbers = #tpu.dot_dimension_numbers<[1], [0], [0], [1], [0, 0, 1, 1], [], []>} : vector<8x128xbf16>, vector<128x256xbf16>, vector<8x256xf32> -> vector<8x256xf32>
    %c1_277 = arith.constant 1 : index
    %c1_278 = arith.constant 1 : index
    %c0_279 = arith.constant 0 : index
    %c0_280 = arith.constant 0 : index
    %346 = vector.load %arg5[%c1_277, %c1_278, %c0_279, %c0_280] : memref<3x4x1x256xf32, #tpu.memory_space<vmem>>, vector<1x1x1x256xf32>
    %347 = vector.shape_cast %346 : vector<1x1x1x256xf32> to vector<1x256xf32>
    %348 = vector.broadcast %347 : vector<1x256xf32> to vector<8x256xf32>
    %349 = arith.addf %345, %348 : vector<8x256xf32>
    %350 = vector.extract_strided_slice %349 {offsets = [0, 0], sizes = [8, 128], strides = [1, 1]} : vector<8x256xf32> to vector<8x128xf32>
    %cst_281 = arith.constant 2.000000e-01 : f32
    %351 = vector.broadcast %cst_281 : f32 to vector<8x128xf32>
    %352 = arith.mulf %351, %350 : vector<8x128xf32>
    %353 = arith.maximumf %350, %352 : vector<8x128xf32>
    %354 = arith.truncf %353 : vector<8x128xf32> to vector<8x128xbf16>
    %355 = vector.extract_strided_slice %349 {offsets = [0, 128], sizes = [8, 128], strides = [1, 1]} : vector<8x256xf32> to vector<8x128xf32>
    %c1_282 = arith.constant 1 : index
    %c4_283 = arith.constant 4 : index
    %c0_284 = arith.constant 0 : index
    %c0_285 = arith.constant 0 : index
    %356 = vector.load %arg6[%c1_282, %c4_283, %c0_284, %c0_285] : memref<3x10x128x128xbf16, #tpu.memory_space<vmem>>, vector<1x1x128x128xbf16>
    %357 = vector.shape_cast %356 : vector<1x1x128x128xbf16> to vector<128x128xbf16>
    %cst_286 = arith.constant dense<0.000000e+00> : vector<8x128xf32>
    %358 = tpu.matmul %354, %357, %cst_286 {dimension_numbers = #tpu.dot_dimension_numbers<[1], [0], [0], [1], [0, 0, 1, 1], [], []>} : vector<8x128xbf16>, vector<128x128xbf16>, vector<8x128xf32> -> vector<8x128xf32>
    %c1_287 = arith.constant 1 : index
    %c4_288 = arith.constant 4 : index
    %c0_289 = arith.constant 0 : index
    %c0_290 = arith.constant 0 : index
    %359 = vector.load %arg7[%c1_287, %c4_288, %c0_289, %c0_290] : memref<3x10x1x128xf32, #tpu.memory_space<vmem>>, vector<1x1x1x128xf32>
    %360 = vector.shape_cast %359 : vector<1x1x1x128xf32> to vector<1x128xf32>
    %361 = vector.broadcast %360 : vector<1x128xf32> to vector<8x128xf32>
    %362 = arith.addf %358, %361 : vector<8x128xf32>
    %363 = arith.addf %362, %355 : vector<8x128xf32>
    %cst_291 = arith.constant 2.000000e-01 : f32
    %364 = vector.broadcast %cst_291 : f32 to vector<8x128xf32>
    %365 = arith.mulf %364, %363 : vector<8x128xf32>
    %366 = arith.maximumf %363, %365 : vector<8x128xf32>
    %367 = arith.truncf %366 : vector<8x128xf32> to vector<8x128xbf16>
    %c1_292 = arith.constant 1 : index
    %c2_293 = arith.constant 2 : index
    %c0_294 = arith.constant 0 : index
    %c0_295 = arith.constant 0 : index
    %368 = vector.load %arg4[%c1_292, %c2_293, %c0_294, %c0_295] : memref<3x4x128x256xbf16, #tpu.memory_space<vmem>>, vector<1x1x128x256xbf16>
    %369 = vector.shape_cast %368 : vector<1x1x128x256xbf16> to vector<128x256xbf16>
    %cst_296 = arith.constant dense<0.000000e+00> : vector<8x256xf32>
    %370 = tpu.matmul %367, %369, %cst_296 {dimension_numbers = #tpu.dot_dimension_numbers<[1], [0], [0], [1], [0, 0, 1, 1], [], []>} : vector<8x128xbf16>, vector<128x256xbf16>, vector<8x256xf32> -> vector<8x256xf32>
    %c1_297 = arith.constant 1 : index
    %c2_298 = arith.constant 2 : index
    %c0_299 = arith.constant 0 : index
    %c0_300 = arith.constant 0 : index
    %371 = vector.load %arg5[%c1_297, %c2_298, %c0_299, %c0_300] : memref<3x4x1x256xf32, #tpu.memory_space<vmem>>, vector<1x1x1x256xf32>
    %372 = vector.shape_cast %371 : vector<1x1x1x256xf32> to vector<1x256xf32>
    %373 = vector.broadcast %372 : vector<1x256xf32> to vector<8x256xf32>
    %374 = arith.addf %370, %373 : vector<8x256xf32>
    %375 = vector.extract_strided_slice %374 {offsets = [0, 0], sizes = [8, 128], strides = [1, 1]} : vector<8x256xf32> to vector<8x128xf32>
    %cst_301 = arith.constant 2.000000e-01 : f32
    %376 = vector.broadcast %cst_301 : f32 to vector<8x128xf32>
    %377 = arith.mulf %376, %375 : vector<8x128xf32>
    %378 = arith.maximumf %375, %377 : vector<8x128xf32>
    %379 = arith.truncf %378 : vector<8x128xf32> to vector<8x128xbf16>
    %380 = vector.extract_strided_slice %374 {offsets = [0, 128], sizes = [8, 128], strides = [1, 1]} : vector<8x256xf32> to vector<8x128xf32>
    %c1_302 = arith.constant 1 : index
    %c5_303 = arith.constant 5 : index
    %c0_304 = arith.constant 0 : index
    %c0_305 = arith.constant 0 : index
    %381 = vector.load %arg6[%c1_302, %c5_303, %c0_304, %c0_305] : memref<3x10x128x128xbf16, #tpu.memory_space<vmem>>, vector<1x1x128x128xbf16>
    %382 = vector.shape_cast %381 : vector<1x1x128x128xbf16> to vector<128x128xbf16>
    %cst_306 = arith.constant dense<0.000000e+00> : vector<8x128xf32>
    %383 = tpu.matmul %379, %382, %cst_306 {dimension_numbers = #tpu.dot_dimension_numbers<[1], [0], [0], [1], [0, 0, 1, 1], [], []>} : vector<8x128xbf16>, vector<128x128xbf16>, vector<8x128xf32> -> vector<8x128xf32>
    %c1_307 = arith.constant 1 : index
    %c5_308 = arith.constant 5 : index
    %c0_309 = arith.constant 0 : index
    %c0_310 = arith.constant 0 : index
    %384 = vector.load %arg7[%c1_307, %c5_308, %c0_309, %c0_310] : memref<3x10x1x128xf32, #tpu.memory_space<vmem>>, vector<1x1x1x128xf32>
    %385 = vector.shape_cast %384 : vector<1x1x1x128xf32> to vector<1x128xf32>
    %386 = vector.broadcast %385 : vector<1x128xf32> to vector<8x128xf32>
    %387 = arith.addf %383, %386 : vector<8x128xf32>
    %388 = arith.addf %387, %380 : vector<8x128xf32>
    %cst_311 = arith.constant 2.000000e-01 : f32
    %389 = vector.broadcast %cst_311 : f32 to vector<8x128xf32>
    %390 = arith.mulf %389, %388 : vector<8x128xf32>
    %391 = arith.maximumf %388, %390 : vector<8x128xf32>
    %392 = arith.truncf %391 : vector<8x128xf32> to vector<8x128xbf16>
    %c1_312 = arith.constant 1 : index
    %c3_313 = arith.constant 3 : index
    %c0_314 = arith.constant 0 : index
    %c0_315 = arith.constant 0 : index
    %393 = vector.load %arg2[%c1_312, %c3_313, %c0_314, %c0_315] : memref<3x6x128x128xbf16, #tpu.memory_space<vmem>>, vector<1x1x128x128xbf16>
    %394 = vector.shape_cast %393 : vector<1x1x128x128xbf16> to vector<128x128xbf16>
    %cst_316 = arith.constant dense<0.000000e+00> : vector<8x128xf32>
    %395 = tpu.matmul %392, %394, %cst_316 {dimension_numbers = #tpu.dot_dimension_numbers<[1], [0], [0], [1], [0, 0, 1, 1], [], []>} : vector<8x128xbf16>, vector<128x128xbf16>, vector<8x128xf32> -> vector<8x128xf32>
    %c1_317 = arith.constant 1 : index
    %c3_318 = arith.constant 3 : index
    %c0_319 = arith.constant 0 : index
    %c0_320 = arith.constant 0 : index
    %396 = vector.load %arg3[%c1_317, %c3_318, %c0_319, %c0_320] : memref<3x6x1x128xf32, #tpu.memory_space<vmem>>, vector<1x1x1x128xf32>
    %397 = vector.shape_cast %396 : vector<1x1x1x128xf32> to vector<1x128xf32>
    %398 = vector.broadcast %397 : vector<1x128xf32> to vector<8x128xf32>
    %399 = arith.addf %395, %398 : vector<8x128xf32>
    %cst_321 = arith.constant 2.000000e-01 : f32
    %400 = vector.broadcast %cst_321 : f32 to vector<8x128xf32>
    %401 = arith.mulf %400, %399 : vector<8x128xf32>
    %402 = arith.maximumf %399, %401 : vector<8x128xf32>
    %403 = arith.truncf %402 : vector<8x128xf32> to vector<8x128xbf16>
    %404 = arith.extf %392 : vector<8x128xbf16> to vector<8x128xf32>
    %c1_322 = arith.constant 1 : index
    %c6_323 = arith.constant 6 : index
    %c0_324 = arith.constant 0 : index
    %c0_325 = arith.constant 0 : index
    %405 = vector.load %arg6[%c1_322, %c6_323, %c0_324, %c0_325] : memref<3x10x128x128xbf16, #tpu.memory_space<vmem>>, vector<1x1x128x128xbf16>
    %406 = vector.shape_cast %405 : vector<1x1x128x128xbf16> to vector<128x128xbf16>
    %cst_326 = arith.constant dense<0.000000e+00> : vector<8x128xf32>
    %407 = tpu.matmul %403, %406, %cst_326 {dimension_numbers = #tpu.dot_dimension_numbers<[1], [0], [0], [1], [0, 0, 1, 1], [], []>} : vector<8x128xbf16>, vector<128x128xbf16>, vector<8x128xf32> -> vector<8x128xf32>
    %c1_327 = arith.constant 1 : index
    %c6_328 = arith.constant 6 : index
    %c0_329 = arith.constant 0 : index
    %c0_330 = arith.constant 0 : index
    %408 = vector.load %arg7[%c1_327, %c6_328, %c0_329, %c0_330] : memref<3x10x1x128xf32, #tpu.memory_space<vmem>>, vector<1x1x1x128xf32>
    %409 = vector.shape_cast %408 : vector<1x1x1x128xf32> to vector<1x128xf32>
    %410 = vector.broadcast %409 : vector<1x128xf32> to vector<8x128xf32>
    %411 = arith.addf %407, %410 : vector<8x128xf32>
    %412 = arith.addf %411, %404 : vector<8x128xf32>
    %cst_331 = arith.constant 2.000000e-01 : f32
    %413 = vector.broadcast %cst_331 : f32 to vector<8x128xf32>
    %414 = arith.mulf %413, %412 : vector<8x128xf32>
    %415 = arith.maximumf %412, %414 : vector<8x128xf32>
    %416 = arith.truncf %415 : vector<8x128xf32> to vector<8x128xbf16>
    %c1_332 = arith.constant 1 : index
    %c4_333 = arith.constant 4 : index
    %c0_334 = arith.constant 0 : index
    %c0_335 = arith.constant 0 : index
    %417 = vector.load %arg2[%c1_332, %c4_333, %c0_334, %c0_335] : memref<3x6x128x128xbf16, #tpu.memory_space<vmem>>, vector<1x1x128x128xbf16>
    %418 = vector.shape_cast %417 : vector<1x1x128x128xbf16> to vector<128x128xbf16>
    %cst_336 = arith.constant dense<0.000000e+00> : vector<8x128xf32>
    %419 = tpu.matmul %416, %418, %cst_336 {dimension_numbers = #tpu.dot_dimension_numbers<[1], [0], [0], [1], [0, 0, 1, 1], [], []>} : vector<8x128xbf16>, vector<128x128xbf16>, vector<8x128xf32> -> vector<8x128xf32>
    %c1_337 = arith.constant 1 : index
    %c4_338 = arith.constant 4 : index
    %c0_339 = arith.constant 0 : index
    %c0_340 = arith.constant 0 : index
    %420 = vector.load %arg3[%c1_337, %c4_338, %c0_339, %c0_340] : memref<3x6x1x128xf32, #tpu.memory_space<vmem>>, vector<1x1x1x128xf32>
    %421 = vector.shape_cast %420 : vector<1x1x1x128xf32> to vector<1x128xf32>
    %422 = vector.broadcast %421 : vector<1x128xf32> to vector<8x128xf32>
    %423 = arith.addf %419, %422 : vector<8x128xf32>
    %cst_341 = arith.constant 2.000000e-01 : f32
    %424 = vector.broadcast %cst_341 : f32 to vector<8x128xf32>
    %425 = arith.mulf %424, %423 : vector<8x128xf32>
    %426 = arith.maximumf %423, %425 : vector<8x128xf32>
    %427 = arith.truncf %426 : vector<8x128xf32> to vector<8x128xbf16>
    %428 = arith.extf %416 : vector<8x128xbf16> to vector<8x128xf32>
    %c1_342 = arith.constant 1 : index
    %c7_343 = arith.constant 7 : index
    %c0_344 = arith.constant 0 : index
    %c0_345 = arith.constant 0 : index
    %429 = vector.load %arg6[%c1_342, %c7_343, %c0_344, %c0_345] : memref<3x10x128x128xbf16, #tpu.memory_space<vmem>>, vector<1x1x128x128xbf16>
    %430 = vector.shape_cast %429 : vector<1x1x128x128xbf16> to vector<128x128xbf16>
    %cst_346 = arith.constant dense<0.000000e+00> : vector<8x128xf32>
    %431 = tpu.matmul %427, %430, %cst_346 {dimension_numbers = #tpu.dot_dimension_numbers<[1], [0], [0], [1], [0, 0, 1, 1], [], []>} : vector<8x128xbf16>, vector<128x128xbf16>, vector<8x128xf32> -> vector<8x128xf32>
    %c1_347 = arith.constant 1 : index
    %c7_348 = arith.constant 7 : index
    %c0_349 = arith.constant 0 : index
    %c0_350 = arith.constant 0 : index
    %432 = vector.load %arg7[%c1_347, %c7_348, %c0_349, %c0_350] : memref<3x10x1x128xf32, #tpu.memory_space<vmem>>, vector<1x1x1x128xf32>
    %433 = vector.shape_cast %432 : vector<1x1x1x128xf32> to vector<1x128xf32>
    %434 = vector.broadcast %433 : vector<1x128xf32> to vector<8x128xf32>
    %435 = arith.addf %431, %434 : vector<8x128xf32>
    %436 = arith.addf %435, %428 : vector<8x128xf32>
    %cst_351 = arith.constant 2.000000e-01 : f32
    %437 = vector.broadcast %cst_351 : f32 to vector<8x128xf32>
    %438 = arith.mulf %437, %436 : vector<8x128xf32>
    %439 = arith.maximumf %436, %438 : vector<8x128xf32>
    %440 = arith.truncf %439 : vector<8x128xf32> to vector<8x128xbf16>
    %c1_352 = arith.constant 1 : index
    %c5_353 = arith.constant 5 : index
    %c0_354 = arith.constant 0 : index
    %c0_355 = arith.constant 0 : index
    %441 = vector.load %arg2[%c1_352, %c5_353, %c0_354, %c0_355] : memref<3x6x128x128xbf16, #tpu.memory_space<vmem>>, vector<1x1x128x128xbf16>
    %442 = vector.shape_cast %441 : vector<1x1x128x128xbf16> to vector<128x128xbf16>
    %cst_356 = arith.constant dense<0.000000e+00> : vector<8x128xf32>
    %443 = tpu.matmul %440, %442, %cst_356 {dimension_numbers = #tpu.dot_dimension_numbers<[1], [0], [0], [1], [0, 0, 1, 1], [], []>} : vector<8x128xbf16>, vector<128x128xbf16>, vector<8x128xf32> -> vector<8x128xf32>
    %c1_357 = arith.constant 1 : index
    %c5_358 = arith.constant 5 : index
    %c0_359 = arith.constant 0 : index
    %c0_360 = arith.constant 0 : index
    %444 = vector.load %arg3[%c1_357, %c5_358, %c0_359, %c0_360] : memref<3x6x1x128xf32, #tpu.memory_space<vmem>>, vector<1x1x1x128xf32>
    %445 = vector.shape_cast %444 : vector<1x1x1x128xf32> to vector<1x128xf32>
    %446 = vector.broadcast %445 : vector<1x128xf32> to vector<8x128xf32>
    %447 = arith.addf %443, %446 : vector<8x128xf32>
    %cst_361 = arith.constant 2.000000e-01 : f32
    %448 = vector.broadcast %cst_361 : f32 to vector<8x128xf32>
    %449 = arith.mulf %448, %447 : vector<8x128xf32>
    %450 = arith.maximumf %447, %449 : vector<8x128xf32>
    %451 = arith.truncf %450 : vector<8x128xf32> to vector<8x128xbf16>
    %452 = arith.extf %440 : vector<8x128xbf16> to vector<8x128xf32>
    %c1_362 = arith.constant 1 : index
    %c8_363 = arith.constant 8 : index
    %c0_364 = arith.constant 0 : index
    %c0_365 = arith.constant 0 : index
    %453 = vector.load %arg6[%c1_362, %c8_363, %c0_364, %c0_365] : memref<3x10x128x128xbf16, #tpu.memory_space<vmem>>, vector<1x1x128x128xbf16>
    %454 = vector.shape_cast %453 : vector<1x1x128x128xbf16> to vector<128x128xbf16>
    %cst_366 = arith.constant dense<0.000000e+00> : vector<8x128xf32>
    %455 = tpu.matmul %451, %454, %cst_366 {dimension_numbers = #tpu.dot_dimension_numbers<[1], [0], [0], [1], [0, 0, 1, 1], [], []>} : vector<8x128xbf16>, vector<128x128xbf16>, vector<8x128xf32> -> vector<8x128xf32>
    %c1_367 = arith.constant 1 : index
    %c8_368 = arith.constant 8 : index
    %c0_369 = arith.constant 0 : index
    %c0_370 = arith.constant 0 : index
    %456 = vector.load %arg7[%c1_367, %c8_368, %c0_369, %c0_370] : memref<3x10x1x128xf32, #tpu.memory_space<vmem>>, vector<1x1x1x128xf32>
    %457 = vector.shape_cast %456 : vector<1x1x1x128xf32> to vector<1x128xf32>
    %458 = vector.broadcast %457 : vector<1x128xf32> to vector<8x128xf32>
    %459 = arith.addf %455, %458 : vector<8x128xf32>
    %460 = arith.addf %459, %452 : vector<8x128xf32>
    %cst_371 = arith.constant 2.000000e-01 : f32
    %461 = vector.broadcast %cst_371 : f32 to vector<8x128xf32>
    %462 = arith.mulf %461, %460 : vector<8x128xf32>
    %463 = arith.maximumf %460, %462 : vector<8x128xf32>
    %464 = arith.truncf %463 : vector<8x128xf32> to vector<8x128xbf16>
    %c1_372 = arith.constant 1 : index
    %c3_373 = arith.constant 3 : index
    %c0_374 = arith.constant 0 : index
    %c0_375 = arith.constant 0 : index
    %465 = vector.load %arg4[%c1_372, %c3_373, %c0_374, %c0_375] : memref<3x4x128x256xbf16, #tpu.memory_space<vmem>>, vector<1x1x128x256xbf16>
    %466 = vector.shape_cast %465 : vector<1x1x128x256xbf16> to vector<128x256xbf16>
    %cst_376 = arith.constant dense<0.000000e+00> : vector<8x256xf32>
    %467 = tpu.matmul %464, %466, %cst_376 {dimension_numbers = #tpu.dot_dimension_numbers<[1], [0], [0], [1], [0, 0, 1, 1], [], []>} : vector<8x128xbf16>, vector<128x256xbf16>, vector<8x256xf32> -> vector<8x256xf32>
    %c1_377 = arith.constant 1 : index
    %c3_378 = arith.constant 3 : index
    %c0_379 = arith.constant 0 : index
    %c0_380 = arith.constant 0 : index
    %468 = vector.load %arg5[%c1_377, %c3_378, %c0_379, %c0_380] : memref<3x4x1x256xf32, #tpu.memory_space<vmem>>, vector<1x1x1x256xf32>
    %469 = vector.shape_cast %468 : vector<1x1x1x256xf32> to vector<1x256xf32>
    %470 = vector.broadcast %469 : vector<1x256xf32> to vector<8x256xf32>
    %471 = arith.addf %467, %470 : vector<8x256xf32>
    %472 = vector.extract_strided_slice %471 {offsets = [0, 0], sizes = [8, 128], strides = [1, 1]} : vector<8x256xf32> to vector<8x128xf32>
    %cst_381 = arith.constant 2.000000e-01 : f32
    %473 = vector.broadcast %cst_381 : f32 to vector<8x128xf32>
    %474 = arith.mulf %473, %472 : vector<8x128xf32>
    %475 = arith.maximumf %472, %474 : vector<8x128xf32>
    %476 = arith.truncf %475 : vector<8x128xf32> to vector<8x128xbf16>
    %477 = vector.extract_strided_slice %471 {offsets = [0, 128], sizes = [8, 128], strides = [1, 1]} : vector<8x256xf32> to vector<8x128xf32>
    %c1_382 = arith.constant 1 : index
    %c9_383 = arith.constant 9 : index
    %c0_384 = arith.constant 0 : index
    %c0_385 = arith.constant 0 : index
    %478 = vector.load %arg6[%c1_382, %c9_383, %c0_384, %c0_385] : memref<3x10x128x128xbf16, #tpu.memory_space<vmem>>, vector<1x1x128x128xbf16>
    %479 = vector.shape_cast %478 : vector<1x1x128x128xbf16> to vector<128x128xbf16>
    %cst_386 = arith.constant dense<0.000000e+00> : vector<8x128xf32>
    %480 = tpu.matmul %476, %479, %cst_386 {dimension_numbers = #tpu.dot_dimension_numbers<[1], [0], [0], [1], [0, 0, 1, 1], [], []>} : vector<8x128xbf16>, vector<128x128xbf16>, vector<8x128xf32> -> vector<8x128xf32>
    %c1_387 = arith.constant 1 : index
    %c9_388 = arith.constant 9 : index
    %c0_389 = arith.constant 0 : index
    %c0_390 = arith.constant 0 : index
    %481 = vector.load %arg7[%c1_387, %c9_388, %c0_389, %c0_390] : memref<3x10x1x128xf32, #tpu.memory_space<vmem>>, vector<1x1x1x128xf32>
    %482 = vector.shape_cast %481 : vector<1x1x1x128xf32> to vector<1x128xf32>
    %483 = vector.broadcast %482 : vector<1x128xf32> to vector<8x128xf32>
    %484 = arith.addf %480, %483 : vector<8x128xf32>
    %485 = arith.addf %484, %477 : vector<8x128xf32>
    %cst_391 = arith.constant 2.000000e-01 : f32
    %486 = vector.broadcast %cst_391 : f32 to vector<8x128xf32>
    %487 = arith.mulf %486, %485 : vector<8x128xf32>
    %488 = arith.maximumf %485, %487 : vector<8x128xf32>
    %489 = arith.addf %245, %488 : vector<8x128xf32>
    %c2_392 = arith.constant 2 : index
    %c0_393 = arith.constant 0 : index
    %c0_394 = arith.constant 0 : index
    %c0_395 = arith.constant 0 : index
    %490 = vector.load %arg4[%c2_392, %c0_393, %c0_394, %c0_395] : memref<3x4x128x256xbf16, #tpu.memory_space<vmem>>, vector<1x1x128x256xbf16>
    %491 = vector.shape_cast %490 : vector<1x1x128x256xbf16> to vector<128x256xbf16>
    %cst_396 = arith.constant dense<0.000000e+00> : vector<8x256xf32>
    %492 = tpu.matmul %0, %491, %cst_396 {dimension_numbers = #tpu.dot_dimension_numbers<[1], [0], [0], [1], [0, 0, 1, 1], [], []>} : vector<8x128xbf16>, vector<128x256xbf16>, vector<8x256xf32> -> vector<8x256xf32>
    %c2_397 = arith.constant 2 : index
    %c0_398 = arith.constant 0 : index
    %c0_399 = arith.constant 0 : index
    %c0_400 = arith.constant 0 : index
    %493 = vector.load %arg5[%c2_397, %c0_398, %c0_399, %c0_400] : memref<3x4x1x256xf32, #tpu.memory_space<vmem>>, vector<1x1x1x256xf32>
    %494 = vector.shape_cast %493 : vector<1x1x1x256xf32> to vector<1x256xf32>
    %495 = vector.broadcast %494 : vector<1x256xf32> to vector<8x256xf32>
    %496 = arith.addf %492, %495 : vector<8x256xf32>
    %497 = vector.extract_strided_slice %496 {offsets = [0, 0], sizes = [8, 128], strides = [1, 1]} : vector<8x256xf32> to vector<8x128xf32>
    %cst_401 = arith.constant 2.000000e-01 : f32
    %498 = vector.broadcast %cst_401 : f32 to vector<8x128xf32>
    %499 = arith.mulf %498, %497 : vector<8x128xf32>
    %500 = arith.maximumf %497, %499 : vector<8x128xf32>
    %501 = arith.truncf %500 : vector<8x128xf32> to vector<8x128xbf16>
    %502 = vector.extract_strided_slice %496 {offsets = [0, 128], sizes = [8, 128], strides = [1, 1]} : vector<8x256xf32> to vector<8x128xf32>
    %c2_402 = arith.constant 2 : index
    %c0_403 = arith.constant 0 : index
    %c0_404 = arith.constant 0 : index
    %c0_405 = arith.constant 0 : index
    %503 = vector.load %arg6[%c2_402, %c0_403, %c0_404, %c0_405] : memref<3x10x128x128xbf16, #tpu.memory_space<vmem>>, vector<1x1x128x128xbf16>
    %504 = vector.shape_cast %503 : vector<1x1x128x128xbf16> to vector<128x128xbf16>
    %cst_406 = arith.constant dense<0.000000e+00> : vector<8x128xf32>
    %505 = tpu.matmul %501, %504, %cst_406 {dimension_numbers = #tpu.dot_dimension_numbers<[1], [0], [0], [1], [0, 0, 1, 1], [], []>} : vector<8x128xbf16>, vector<128x128xbf16>, vector<8x128xf32> -> vector<8x128xf32>
    %c2_407 = arith.constant 2 : index
    %c0_408 = arith.constant 0 : index
    %c0_409 = arith.constant 0 : index
    %c0_410 = arith.constant 0 : index
    %506 = vector.load %arg7[%c2_407, %c0_408, %c0_409, %c0_410] : memref<3x10x1x128xf32, #tpu.memory_space<vmem>>, vector<1x1x1x128xf32>
    %507 = vector.shape_cast %506 : vector<1x1x1x128xf32> to vector<1x128xf32>
    %508 = vector.broadcast %507 : vector<1x128xf32> to vector<8x128xf32>
    %509 = arith.addf %505, %508 : vector<8x128xf32>
    %510 = arith.addf %509, %502 : vector<8x128xf32>
    %cst_411 = arith.constant 2.000000e-01 : f32
    %511 = vector.broadcast %cst_411 : f32 to vector<8x128xf32>
    %512 = arith.mulf %511, %510 : vector<8x128xf32>
    %513 = arith.maximumf %510, %512 : vector<8x128xf32>
    %514 = arith.truncf %513 : vector<8x128xf32> to vector<8x128xbf16>
    %c2_412 = arith.constant 2 : index
    %c0_413 = arith.constant 0 : index
    %c0_414 = arith.constant 0 : index
    %c0_415 = arith.constant 0 : index
    %515 = vector.load %arg2[%c2_412, %c0_413, %c0_414, %c0_415] : memref<3x6x128x128xbf16, #tpu.memory_space<vmem>>, vector<1x1x128x128xbf16>
    %516 = vector.shape_cast %515 : vector<1x1x128x128xbf16> to vector<128x128xbf16>
    %cst_416 = arith.constant dense<0.000000e+00> : vector<8x128xf32>
    %517 = tpu.matmul %514, %516, %cst_416 {dimension_numbers = #tpu.dot_dimension_numbers<[1], [0], [0], [1], [0, 0, 1, 1], [], []>} : vector<8x128xbf16>, vector<128x128xbf16>, vector<8x128xf32> -> vector<8x128xf32>
    %c2_417 = arith.constant 2 : index
    %c0_418 = arith.constant 0 : index
    %c0_419 = arith.constant 0 : index
    %c0_420 = arith.constant 0 : index
    %518 = vector.load %arg3[%c2_417, %c0_418, %c0_419, %c0_420] : memref<3x6x1x128xf32, #tpu.memory_space<vmem>>, vector<1x1x1x128xf32>
    %519 = vector.shape_cast %518 : vector<1x1x1x128xf32> to vector<1x128xf32>
    %520 = vector.broadcast %519 : vector<1x128xf32> to vector<8x128xf32>
    %521 = arith.addf %517, %520 : vector<8x128xf32>
    %cst_421 = arith.constant 2.000000e-01 : f32
    %522 = vector.broadcast %cst_421 : f32 to vector<8x128xf32>
    %523 = arith.mulf %522, %521 : vector<8x128xf32>
    %524 = arith.maximumf %521, %523 : vector<8x128xf32>
    %525 = arith.truncf %524 : vector<8x128xf32> to vector<8x128xbf16>
    %526 = arith.extf %514 : vector<8x128xbf16> to vector<8x128xf32>
    %c2_422 = arith.constant 2 : index
    %c1_423 = arith.constant 1 : index
    %c0_424 = arith.constant 0 : index
    %c0_425 = arith.constant 0 : index
    %527 = vector.load %arg6[%c2_422, %c1_423, %c0_424, %c0_425] : memref<3x10x128x128xbf16, #tpu.memory_space<vmem>>, vector<1x1x128x128xbf16>
    %528 = vector.shape_cast %527 : vector<1x1x128x128xbf16> to vector<128x128xbf16>
    %cst_426 = arith.constant dense<0.000000e+00> : vector<8x128xf32>
    %529 = tpu.matmul %525, %528, %cst_426 {dimension_numbers = #tpu.dot_dimension_numbers<[1], [0], [0], [1], [0, 0, 1, 1], [], []>} : vector<8x128xbf16>, vector<128x128xbf16>, vector<8x128xf32> -> vector<8x128xf32>
    %c2_427 = arith.constant 2 : index
    %c1_428 = arith.constant 1 : index
    %c0_429 = arith.constant 0 : index
    %c0_430 = arith.constant 0 : index
    %530 = vector.load %arg7[%c2_427, %c1_428, %c0_429, %c0_430] : memref<3x10x1x128xf32, #tpu.memory_space<vmem>>, vector<1x1x1x128xf32>
    %531 = vector.shape_cast %530 : vector<1x1x1x128xf32> to vector<1x128xf32>
    %532 = vector.broadcast %531 : vector<1x128xf32> to vector<8x128xf32>
    %533 = arith.addf %529, %532 : vector<8x128xf32>
    %534 = arith.addf %533, %526 : vector<8x128xf32>
    %cst_431 = arith.constant 2.000000e-01 : f32
    %535 = vector.broadcast %cst_431 : f32 to vector<8x128xf32>
    %536 = arith.mulf %535, %534 : vector<8x128xf32>
    %537 = arith.maximumf %534, %536 : vector<8x128xf32>
    %538 = arith.truncf %537 : vector<8x128xf32> to vector<8x128xbf16>
    %c2_432 = arith.constant 2 : index
    %c1_433 = arith.constant 1 : index
    %c0_434 = arith.constant 0 : index
    %c0_435 = arith.constant 0 : index
    %539 = vector.load %arg2[%c2_432, %c1_433, %c0_434, %c0_435] : memref<3x6x128x128xbf16, #tpu.memory_space<vmem>>, vector<1x1x128x128xbf16>
    %540 = vector.shape_cast %539 : vector<1x1x128x128xbf16> to vector<128x128xbf16>
    %cst_436 = arith.constant dense<0.000000e+00> : vector<8x128xf32>
    %541 = tpu.matmul %538, %540, %cst_436 {dimension_numbers = #tpu.dot_dimension_numbers<[1], [0], [0], [1], [0, 0, 1, 1], [], []>} : vector<8x128xbf16>, vector<128x128xbf16>, vector<8x128xf32> -> vector<8x128xf32>
    %c2_437 = arith.constant 2 : index
    %c1_438 = arith.constant 1 : index
    %c0_439 = arith.constant 0 : index
    %c0_440 = arith.constant 0 : index
    %542 = vector.load %arg3[%c2_437, %c1_438, %c0_439, %c0_440] : memref<3x6x1x128xf32, #tpu.memory_space<vmem>>, vector<1x1x1x128xf32>
    %543 = vector.shape_cast %542 : vector<1x1x1x128xf32> to vector<1x128xf32>
    %544 = vector.broadcast %543 : vector<1x128xf32> to vector<8x128xf32>
    %545 = arith.addf %541, %544 : vector<8x128xf32>
    %cst_441 = arith.constant 2.000000e-01 : f32
    %546 = vector.broadcast %cst_441 : f32 to vector<8x128xf32>
    %547 = arith.mulf %546, %545 : vector<8x128xf32>
    %548 = arith.maximumf %545, %547 : vector<8x128xf32>
    %549 = arith.truncf %548 : vector<8x128xf32> to vector<8x128xbf16>
    %550 = arith.extf %538 : vector<8x128xbf16> to vector<8x128xf32>
    %c2_442 = arith.constant 2 : index
    %c2_443 = arith.constant 2 : index
    %c0_444 = arith.constant 0 : index
    %c0_445 = arith.constant 0 : index
    %551 = vector.load %arg6[%c2_442, %c2_443, %c0_444, %c0_445] : memref<3x10x128x128xbf16, #tpu.memory_space<vmem>>, vector<1x1x128x128xbf16>
    %552 = vector.shape_cast %551 : vector<1x1x128x128xbf16> to vector<128x128xbf16>
    %cst_446 = arith.constant dense<0.000000e+00> : vector<8x128xf32>
    %553 = tpu.matmul %549, %552, %cst_446 {dimension_numbers = #tpu.dot_dimension_numbers<[1], [0], [0], [1], [0, 0, 1, 1], [], []>} : vector<8x128xbf16>, vector<128x128xbf16>, vector<8x128xf32> -> vector<8x128xf32>
    %c2_447 = arith.constant 2 : index
    %c2_448 = arith.constant 2 : index
    %c0_449 = arith.constant 0 : index
    %c0_450 = arith.constant 0 : index
    %554 = vector.load %arg7[%c2_447, %c2_448, %c0_449, %c0_450] : memref<3x10x1x128xf32, #tpu.memory_space<vmem>>, vector<1x1x1x128xf32>
    %555 = vector.shape_cast %554 : vector<1x1x1x128xf32> to vector<1x128xf32>
    %556 = vector.broadcast %555 : vector<1x128xf32> to vector<8x128xf32>
    %557 = arith.addf %553, %556 : vector<8x128xf32>
    %558 = arith.addf %557, %550 : vector<8x128xf32>
    %cst_451 = arith.constant 2.000000e-01 : f32
    %559 = vector.broadcast %cst_451 : f32 to vector<8x128xf32>
    %560 = arith.mulf %559, %558 : vector<8x128xf32>
    %561 = arith.maximumf %558, %560 : vector<8x128xf32>
    %562 = arith.truncf %561 : vector<8x128xf32> to vector<8x128xbf16>
    %c2_452 = arith.constant 2 : index
    %c2_453 = arith.constant 2 : index
    %c0_454 = arith.constant 0 : index
    %c0_455 = arith.constant 0 : index
    %563 = vector.load %arg2[%c2_452, %c2_453, %c0_454, %c0_455] : memref<3x6x128x128xbf16, #tpu.memory_space<vmem>>, vector<1x1x128x128xbf16>
    %564 = vector.shape_cast %563 : vector<1x1x128x128xbf16> to vector<128x128xbf16>
    %cst_456 = arith.constant dense<0.000000e+00> : vector<8x128xf32>
    %565 = tpu.matmul %562, %564, %cst_456 {dimension_numbers = #tpu.dot_dimension_numbers<[1], [0], [0], [1], [0, 0, 1, 1], [], []>} : vector<8x128xbf16>, vector<128x128xbf16>, vector<8x128xf32> -> vector<8x128xf32>
    %c2_457 = arith.constant 2 : index
    %c2_458 = arith.constant 2 : index
    %c0_459 = arith.constant 0 : index
    %c0_460 = arith.constant 0 : index
    %566 = vector.load %arg3[%c2_457, %c2_458, %c0_459, %c0_460] : memref<3x6x1x128xf32, #tpu.memory_space<vmem>>, vector<1x1x1x128xf32>
    %567 = vector.shape_cast %566 : vector<1x1x1x128xf32> to vector<1x128xf32>
    %568 = vector.broadcast %567 : vector<1x128xf32> to vector<8x128xf32>
    %569 = arith.addf %565, %568 : vector<8x128xf32>
    %cst_461 = arith.constant 2.000000e-01 : f32
    %570 = vector.broadcast %cst_461 : f32 to vector<8x128xf32>
    %571 = arith.mulf %570, %569 : vector<8x128xf32>
    %572 = arith.maximumf %569, %571 : vector<8x128xf32>
    %573 = arith.truncf %572 : vector<8x128xf32> to vector<8x128xbf16>
    %574 = arith.extf %562 : vector<8x128xbf16> to vector<8x128xf32>
    %c2_462 = arith.constant 2 : index
    %c3_463 = arith.constant 3 : index
    %c0_464 = arith.constant 0 : index
    %c0_465 = arith.constant 0 : index
    %575 = vector.load %arg6[%c2_462, %c3_463, %c0_464, %c0_465] : memref<3x10x128x128xbf16, #tpu.memory_space<vmem>>, vector<1x1x128x128xbf16>
    %576 = vector.shape_cast %575 : vector<1x1x128x128xbf16> to vector<128x128xbf16>
    %cst_466 = arith.constant dense<0.000000e+00> : vector<8x128xf32>
    %577 = tpu.matmul %573, %576, %cst_466 {dimension_numbers = #tpu.dot_dimension_numbers<[1], [0], [0], [1], [0, 0, 1, 1], [], []>} : vector<8x128xbf16>, vector<128x128xbf16>, vector<8x128xf32> -> vector<8x128xf32>
    %c2_467 = arith.constant 2 : index
    %c3_468 = arith.constant 3 : index
    %c0_469 = arith.constant 0 : index
    %c0_470 = arith.constant 0 : index
    %578 = vector.load %arg7[%c2_467, %c3_468, %c0_469, %c0_470] : memref<3x10x1x128xf32, #tpu.memory_space<vmem>>, vector<1x1x1x128xf32>
    %579 = vector.shape_cast %578 : vector<1x1x1x128xf32> to vector<1x128xf32>
    %580 = vector.broadcast %579 : vector<1x128xf32> to vector<8x128xf32>
    %581 = arith.addf %577, %580 : vector<8x128xf32>
    %582 = arith.addf %581, %574 : vector<8x128xf32>
    %cst_471 = arith.constant 2.000000e-01 : f32
    %583 = vector.broadcast %cst_471 : f32 to vector<8x128xf32>
    %584 = arith.mulf %583, %582 : vector<8x128xf32>
    %585 = arith.maximumf %582, %584 : vector<8x128xf32>
    %586 = arith.truncf %585 : vector<8x128xf32> to vector<8x128xbf16>
    %c2_472 = arith.constant 2 : index
    %c1_473 = arith.constant 1 : index
    %c0_474 = arith.constant 0 : index
    %c0_475 = arith.constant 0 : index
    %587 = vector.load %arg4[%c2_472, %c1_473, %c0_474, %c0_475] : memref<3x4x128x256xbf16, #tpu.memory_space<vmem>>, vector<1x1x128x256xbf16>
    %588 = vector.shape_cast %587 : vector<1x1x128x256xbf16> to vector<128x256xbf16>
    %cst_476 = arith.constant dense<0.000000e+00> : vector<8x256xf32>
    %589 = tpu.matmul %586, %588, %cst_476 {dimension_numbers = #tpu.dot_dimension_numbers<[1], [0], [0], [1], [0, 0, 1, 1], [], []>} : vector<8x128xbf16>, vector<128x256xbf16>, vector<8x256xf32> -> vector<8x256xf32>
    %c2_477 = arith.constant 2 : index
    %c1_478 = arith.constant 1 : index
    %c0_479 = arith.constant 0 : index
    %c0_480 = arith.constant 0 : index
    %590 = vector.load %arg5[%c2_477, %c1_478, %c0_479, %c0_480] : memref<3x4x1x256xf32, #tpu.memory_space<vmem>>, vector<1x1x1x256xf32>
    %591 = vector.shape_cast %590 : vector<1x1x1x256xf32> to vector<1x256xf32>
    %592 = vector.broadcast %591 : vector<1x256xf32> to vector<8x256xf32>
    %593 = arith.addf %589, %592 : vector<8x256xf32>
    %594 = vector.extract_strided_slice %593 {offsets = [0, 0], sizes = [8, 128], strides = [1, 1]} : vector<8x256xf32> to vector<8x128xf32>
    %cst_481 = arith.constant 2.000000e-01 : f32
    %595 = vector.broadcast %cst_481 : f32 to vector<8x128xf32>
    %596 = arith.mulf %595, %594 : vector<8x128xf32>
    %597 = arith.maximumf %594, %596 : vector<8x128xf32>
    %598 = arith.truncf %597 : vector<8x128xf32> to vector<8x128xbf16>
    %599 = vector.extract_strided_slice %593 {offsets = [0, 128], sizes = [8, 128], strides = [1, 1]} : vector<8x256xf32> to vector<8x128xf32>
    %c2_482 = arith.constant 2 : index
    %c4_483 = arith.constant 4 : index
    %c0_484 = arith.constant 0 : index
    %c0_485 = arith.constant 0 : index
    %600 = vector.load %arg6[%c2_482, %c4_483, %c0_484, %c0_485] : memref<3x10x128x128xbf16, #tpu.memory_space<vmem>>, vector<1x1x128x128xbf16>
    %601 = vector.shape_cast %600 : vector<1x1x128x128xbf16> to vector<128x128xbf16>
    %cst_486 = arith.constant dense<0.000000e+00> : vector<8x128xf32>
    %602 = tpu.matmul %598, %601, %cst_486 {dimension_numbers = #tpu.dot_dimension_numbers<[1], [0], [0], [1], [0, 0, 1, 1], [], []>} : vector<8x128xbf16>, vector<128x128xbf16>, vector<8x128xf32> -> vector<8x128xf32>
    %c2_487 = arith.constant 2 : index
    %c4_488 = arith.constant 4 : index
    %c0_489 = arith.constant 0 : index
    %c0_490 = arith.constant 0 : index
    %603 = vector.load %arg7[%c2_487, %c4_488, %c0_489, %c0_490] : memref<3x10x1x128xf32, #tpu.memory_space<vmem>>, vector<1x1x1x128xf32>
    %604 = vector.shape_cast %603 : vector<1x1x1x128xf32> to vector<1x128xf32>
    %605 = vector.broadcast %604 : vector<1x128xf32> to vector<8x128xf32>
    %606 = arith.addf %602, %605 : vector<8x128xf32>
    %607 = arith.addf %606, %599 : vector<8x128xf32>
    %cst_491 = arith.constant 2.000000e-01 : f32
    %608 = vector.broadcast %cst_491 : f32 to vector<8x128xf32>
    %609 = arith.mulf %608, %607 : vector<8x128xf32>
    %610 = arith.maximumf %607, %609 : vector<8x128xf32>
    %611 = arith.truncf %610 : vector<8x128xf32> to vector<8x128xbf16>
    %c2_492 = arith.constant 2 : index
    %c2_493 = arith.constant 2 : index
    %c0_494 = arith.constant 0 : index
    %c0_495 = arith.constant 0 : index
    %612 = vector.load %arg4[%c2_492, %c2_493, %c0_494, %c0_495] : memref<3x4x128x256xbf16, #tpu.memory_space<vmem>>, vector<1x1x128x256xbf16>
    %613 = vector.shape_cast %612 : vector<1x1x128x256xbf16> to vector<128x256xbf16>
    %cst_496 = arith.constant dense<0.000000e+00> : vector<8x256xf32>
    %614 = tpu.matmul %611, %613, %cst_496 {dimension_numbers = #tpu.dot_dimension_numbers<[1], [0], [0], [1], [0, 0, 1, 1], [], []>} : vector<8x128xbf16>, vector<128x256xbf16>, vector<8x256xf32> -> vector<8x256xf32>
    %c2_497 = arith.constant 2 : index
    %c2_498 = arith.constant 2 : index
    %c0_499 = arith.constant 0 : index
    %c0_500 = arith.constant 0 : index
    %615 = vector.load %arg5[%c2_497, %c2_498, %c0_499, %c0_500] : memref<3x4x1x256xf32, #tpu.memory_space<vmem>>, vector<1x1x1x256xf32>
    %616 = vector.shape_cast %615 : vector<1x1x1x256xf32> to vector<1x256xf32>
    %617 = vector.broadcast %616 : vector<1x256xf32> to vector<8x256xf32>
    %618 = arith.addf %614, %617 : vector<8x256xf32>
    %619 = vector.extract_strided_slice %618 {offsets = [0, 0], sizes = [8, 128], strides = [1, 1]} : vector<8x256xf32> to vector<8x128xf32>
    %cst_501 = arith.constant 2.000000e-01 : f32
    %620 = vector.broadcast %cst_501 : f32 to vector<8x128xf32>
    %621 = arith.mulf %620, %619 : vector<8x128xf32>
    %622 = arith.maximumf %619, %621 : vector<8x128xf32>
    %623 = arith.truncf %622 : vector<8x128xf32> to vector<8x128xbf16>
    %624 = vector.extract_strided_slice %618 {offsets = [0, 128], sizes = [8, 128], strides = [1, 1]} : vector<8x256xf32> to vector<8x128xf32>
    %c2_502 = arith.constant 2 : index
    %c5_503 = arith.constant 5 : index
    %c0_504 = arith.constant 0 : index
    %c0_505 = arith.constant 0 : index
    %625 = vector.load %arg6[%c2_502, %c5_503, %c0_504, %c0_505] : memref<3x10x128x128xbf16, #tpu.memory_space<vmem>>, vector<1x1x128x128xbf16>
    %626 = vector.shape_cast %625 : vector<1x1x128x128xbf16> to vector<128x128xbf16>
    %cst_506 = arith.constant dense<0.000000e+00> : vector<8x128xf32>
    %627 = tpu.matmul %623, %626, %cst_506 {dimension_numbers = #tpu.dot_dimension_numbers<[1], [0], [0], [1], [0, 0, 1, 1], [], []>} : vector<8x128xbf16>, vector<128x128xbf16>, vector<8x128xf32> -> vector<8x128xf32>
    %c2_507 = arith.constant 2 : index
    %c5_508 = arith.constant 5 : index
    %c0_509 = arith.constant 0 : index
    %c0_510 = arith.constant 0 : index
    %628 = vector.load %arg7[%c2_507, %c5_508, %c0_509, %c0_510] : memref<3x10x1x128xf32, #tpu.memory_space<vmem>>, vector<1x1x1x128xf32>
    %629 = vector.shape_cast %628 : vector<1x1x1x128xf32> to vector<1x128xf32>
    %630 = vector.broadcast %629 : vector<1x128xf32> to vector<8x128xf32>
    %631 = arith.addf %627, %630 : vector<8x128xf32>
    %632 = arith.addf %631, %624 : vector<8x128xf32>
    %cst_511 = arith.constant 2.000000e-01 : f32
    %633 = vector.broadcast %cst_511 : f32 to vector<8x128xf32>
    %634 = arith.mulf %633, %632 : vector<8x128xf32>
    %635 = arith.maximumf %632, %634 : vector<8x128xf32>
    %636 = arith.truncf %635 : vector<8x128xf32> to vector<8x128xbf16>
    %c2_512 = arith.constant 2 : index
    %c3_513 = arith.constant 3 : index
    %c0_514 = arith.constant 0 : index
    %c0_515 = arith.constant 0 : index
    %637 = vector.load %arg2[%c2_512, %c3_513, %c0_514, %c0_515] : memref<3x6x128x128xbf16, #tpu.memory_space<vmem>>, vector<1x1x128x128xbf16>
    %638 = vector.shape_cast %637 : vector<1x1x128x128xbf16> to vector<128x128xbf16>
    %cst_516 = arith.constant dense<0.000000e+00> : vector<8x128xf32>
    %639 = tpu.matmul %636, %638, %cst_516 {dimension_numbers = #tpu.dot_dimension_numbers<[1], [0], [0], [1], [0, 0, 1, 1], [], []>} : vector<8x128xbf16>, vector<128x128xbf16>, vector<8x128xf32> -> vector<8x128xf32>
    %c2_517 = arith.constant 2 : index
    %c3_518 = arith.constant 3 : index
    %c0_519 = arith.constant 0 : index
    %c0_520 = arith.constant 0 : index
    %640 = vector.load %arg3[%c2_517, %c3_518, %c0_519, %c0_520] : memref<3x6x1x128xf32, #tpu.memory_space<vmem>>, vector<1x1x1x128xf32>
    %641 = vector.shape_cast %640 : vector<1x1x1x128xf32> to vector<1x128xf32>
    %642 = vector.broadcast %641 : vector<1x128xf32> to vector<8x128xf32>
    %643 = arith.addf %639, %642 : vector<8x128xf32>
    %cst_521 = arith.constant 2.000000e-01 : f32
    %644 = vector.broadcast %cst_521 : f32 to vector<8x128xf32>
    %645 = arith.mulf %644, %643 : vector<8x128xf32>
    %646 = arith.maximumf %643, %645 : vector<8x128xf32>
    %647 = arith.truncf %646 : vector<8x128xf32> to vector<8x128xbf16>
    %648 = arith.extf %636 : vector<8x128xbf16> to vector<8x128xf32>
    %c2_522 = arith.constant 2 : index
    %c6_523 = arith.constant 6 : index
    %c0_524 = arith.constant 0 : index
    %c0_525 = arith.constant 0 : index
    %649 = vector.load %arg6[%c2_522, %c6_523, %c0_524, %c0_525] : memref<3x10x128x128xbf16, #tpu.memory_space<vmem>>, vector<1x1x128x128xbf16>
    %650 = vector.shape_cast %649 : vector<1x1x128x128xbf16> to vector<128x128xbf16>
    %cst_526 = arith.constant dense<0.000000e+00> : vector<8x128xf32>
    %651 = tpu.matmul %647, %650, %cst_526 {dimension_numbers = #tpu.dot_dimension_numbers<[1], [0], [0], [1], [0, 0, 1, 1], [], []>} : vector<8x128xbf16>, vector<128x128xbf16>, vector<8x128xf32> -> vector<8x128xf32>
    %c2_527 = arith.constant 2 : index
    %c6_528 = arith.constant 6 : index
    %c0_529 = arith.constant 0 : index
    %c0_530 = arith.constant 0 : index
    %652 = vector.load %arg7[%c2_527, %c6_528, %c0_529, %c0_530] : memref<3x10x1x128xf32, #tpu.memory_space<vmem>>, vector<1x1x1x128xf32>
    %653 = vector.shape_cast %652 : vector<1x1x1x128xf32> to vector<1x128xf32>
    %654 = vector.broadcast %653 : vector<1x128xf32> to vector<8x128xf32>
    %655 = arith.addf %651, %654 : vector<8x128xf32>
    %656 = arith.addf %655, %648 : vector<8x128xf32>
    %cst_531 = arith.constant 2.000000e-01 : f32
    %657 = vector.broadcast %cst_531 : f32 to vector<8x128xf32>
    %658 = arith.mulf %657, %656 : vector<8x128xf32>
    %659 = arith.maximumf %656, %658 : vector<8x128xf32>
    %660 = arith.truncf %659 : vector<8x128xf32> to vector<8x128xbf16>
    %c2_532 = arith.constant 2 : index
    %c4_533 = arith.constant 4 : index
    %c0_534 = arith.constant 0 : index
    %c0_535 = arith.constant 0 : index
    %661 = vector.load %arg2[%c2_532, %c4_533, %c0_534, %c0_535] : memref<3x6x128x128xbf16, #tpu.memory_space<vmem>>, vector<1x1x128x128xbf16>
    %662 = vector.shape_cast %661 : vector<1x1x128x128xbf16> to vector<128x128xbf16>
    %cst_536 = arith.constant dense<0.000000e+00> : vector<8x128xf32>
    %663 = tpu.matmul %660, %662, %cst_536 {dimension_numbers = #tpu.dot_dimension_numbers<[1], [0], [0], [1], [0, 0, 1, 1], [], []>} : vector<8x128xbf16>, vector<128x128xbf16>, vector<8x128xf32> -> vector<8x128xf32>
    %c2_537 = arith.constant 2 : index
    %c4_538 = arith.constant 4 : index
    %c0_539 = arith.constant 0 : index
    %c0_540 = arith.constant 0 : index
    %664 = vector.load %arg3[%c2_537, %c4_538, %c0_539, %c0_540] : memref<3x6x1x128xf32, #tpu.memory_space<vmem>>, vector<1x1x1x128xf32>
    %665 = vector.shape_cast %664 : vector<1x1x1x128xf32> to vector<1x128xf32>
    %666 = vector.broadcast %665 : vector<1x128xf32> to vector<8x128xf32>
    %667 = arith.addf %663, %666 : vector<8x128xf32>
    %cst_541 = arith.constant 2.000000e-01 : f32
    %668 = vector.broadcast %cst_541 : f32 to vector<8x128xf32>
    %669 = arith.mulf %668, %667 : vector<8x128xf32>
    %670 = arith.maximumf %667, %669 : vector<8x128xf32>
    %671 = arith.truncf %670 : vector<8x128xf32> to vector<8x128xbf16>
    %672 = arith.extf %660 : vector<8x128xbf16> to vector<8x128xf32>
    %c2_542 = arith.constant 2 : index
    %c7_543 = arith.constant 7 : index
    %c0_544 = arith.constant 0 : index
    %c0_545 = arith.constant 0 : index
    %673 = vector.load %arg6[%c2_542, %c7_543, %c0_544, %c0_545] : memref<3x10x128x128xbf16, #tpu.memory_space<vmem>>, vector<1x1x128x128xbf16>
    %674 = vector.shape_cast %673 : vector<1x1x128x128xbf16> to vector<128x128xbf16>
    %cst_546 = arith.constant dense<0.000000e+00> : vector<8x128xf32>
    %675 = tpu.matmul %671, %674, %cst_546 {dimension_numbers = #tpu.dot_dimension_numbers<[1], [0], [0], [1], [0, 0, 1, 1], [], []>} : vector<8x128xbf16>, vector<128x128xbf16>, vector<8x128xf32> -> vector<8x128xf32>
    %c2_547 = arith.constant 2 : index
    %c7_548 = arith.constant 7 : index
    %c0_549 = arith.constant 0 : index
    %c0_550 = arith.constant 0 : index
    %676 = vector.load %arg7[%c2_547, %c7_548, %c0_549, %c0_550] : memref<3x10x1x128xf32, #tpu.memory_space<vmem>>, vector<1x1x1x128xf32>
    %677 = vector.shape_cast %676 : vector<1x1x1x128xf32> to vector<1x128xf32>
    %678 = vector.broadcast %677 : vector<1x128xf32> to vector<8x128xf32>
    %679 = arith.addf %675, %678 : vector<8x128xf32>
    %680 = arith.addf %679, %672 : vector<8x128xf32>
    %cst_551 = arith.constant 2.000000e-01 : f32
    %681 = vector.broadcast %cst_551 : f32 to vector<8x128xf32>
    %682 = arith.mulf %681, %680 : vector<8x128xf32>
    %683 = arith.maximumf %680, %682 : vector<8x128xf32>
    %684 = arith.truncf %683 : vector<8x128xf32> to vector<8x128xbf16>
    %c2_552 = arith.constant 2 : index
    %c5_553 = arith.constant 5 : index
    %c0_554 = arith.constant 0 : index
    %c0_555 = arith.constant 0 : index
    %685 = vector.load %arg2[%c2_552, %c5_553, %c0_554, %c0_555] : memref<3x6x128x128xbf16, #tpu.memory_space<vmem>>, vector<1x1x128x128xbf16>
    %686 = vector.shape_cast %685 : vector<1x1x128x128xbf16> to vector<128x128xbf16>
    %cst_556 = arith.constant dense<0.000000e+00> : vector<8x128xf32>
    %687 = tpu.matmul %684, %686, %cst_556 {dimension_numbers = #tpu.dot_dimension_numbers<[1], [0], [0], [1], [0, 0, 1, 1], [], []>} : vector<8x128xbf16>, vector<128x128xbf16>, vector<8x128xf32> -> vector<8x128xf32>
    %c2_557 = arith.constant 2 : index
    %c5_558 = arith.constant 5 : index
    %c0_559 = arith.constant 0 : index
    %c0_560 = arith.constant 0 : index
    %688 = vector.load %arg3[%c2_557, %c5_558, %c0_559, %c0_560] : memref<3x6x1x128xf32, #tpu.memory_space<vmem>>, vector<1x1x1x128xf32>
    %689 = vector.shape_cast %688 : vector<1x1x1x128xf32> to vector<1x128xf32>
    %690 = vector.broadcast %689 : vector<1x128xf32> to vector<8x128xf32>
    %691 = arith.addf %687, %690 : vector<8x128xf32>
    %cst_561 = arith.constant 2.000000e-01 : f32
    %692 = vector.broadcast %cst_561 : f32 to vector<8x128xf32>
    %693 = arith.mulf %692, %691 : vector<8x128xf32>
    %694 = arith.maximumf %691, %693 : vector<8x128xf32>
    %695 = arith.truncf %694 : vector<8x128xf32> to vector<8x128xbf16>
    %696 = arith.extf %684 : vector<8x128xbf16> to vector<8x128xf32>
    %c2_562 = arith.constant 2 : index
    %c8_563 = arith.constant 8 : index
    %c0_564 = arith.constant 0 : index
    %c0_565 = arith.constant 0 : index
    %697 = vector.load %arg6[%c2_562, %c8_563, %c0_564, %c0_565] : memref<3x10x128x128xbf16, #tpu.memory_space<vmem>>, vector<1x1x128x128xbf16>
    %698 = vector.shape_cast %697 : vector<1x1x128x128xbf16> to vector<128x128xbf16>
    %cst_566 = arith.constant dense<0.000000e+00> : vector<8x128xf32>
    %699 = tpu.matmul %695, %698, %cst_566 {dimension_numbers = #tpu.dot_dimension_numbers<[1], [0], [0], [1], [0, 0, 1, 1], [], []>} : vector<8x128xbf16>, vector<128x128xbf16>, vector<8x128xf32> -> vector<8x128xf32>
    %c2_567 = arith.constant 2 : index
    %c8_568 = arith.constant 8 : index
    %c0_569 = arith.constant 0 : index
    %c0_570 = arith.constant 0 : index
    %700 = vector.load %arg7[%c2_567, %c8_568, %c0_569, %c0_570] : memref<3x10x1x128xf32, #tpu.memory_space<vmem>>, vector<1x1x1x128xf32>
    %701 = vector.shape_cast %700 : vector<1x1x1x128xf32> to vector<1x128xf32>
    %702 = vector.broadcast %701 : vector<1x128xf32> to vector<8x128xf32>
    %703 = arith.addf %699, %702 : vector<8x128xf32>
    %704 = arith.addf %703, %696 : vector<8x128xf32>
    %cst_571 = arith.constant 2.000000e-01 : f32
    %705 = vector.broadcast %cst_571 : f32 to vector<8x128xf32>
    %706 = arith.mulf %705, %704 : vector<8x128xf32>
    %707 = arith.maximumf %704, %706 : vector<8x128xf32>
    %708 = arith.truncf %707 : vector<8x128xf32> to vector<8x128xbf16>
    %c2_572 = arith.constant 2 : index
    %c3_573 = arith.constant 3 : index
    %c0_574 = arith.constant 0 : index
    %c0_575 = arith.constant 0 : index
    %709 = vector.load %arg4[%c2_572, %c3_573, %c0_574, %c0_575] : memref<3x4x128x256xbf16, #tpu.memory_space<vmem>>, vector<1x1x128x256xbf16>
    %710 = vector.shape_cast %709 : vector<1x1x128x256xbf16> to vector<128x256xbf16>
    %cst_576 = arith.constant dense<0.000000e+00> : vector<8x256xf32>
    %711 = tpu.matmul %708, %710, %cst_576 {dimension_numbers = #tpu.dot_dimension_numbers<[1], [0], [0], [1], [0, 0, 1, 1], [], []>} : vector<8x128xbf16>, vector<128x256xbf16>, vector<8x256xf32> -> vector<8x256xf32>
    %c2_577 = arith.constant 2 : index
    %c3_578 = arith.constant 3 : index
    %c0_579 = arith.constant 0 : index
    %c0_580 = arith.constant 0 : index
    %712 = vector.load %arg5[%c2_577, %c3_578, %c0_579, %c0_580] : memref<3x4x1x256xf32, #tpu.memory_space<vmem>>, vector<1x1x1x256xf32>
    %713 = vector.shape_cast %712 : vector<1x1x1x256xf32> to vector<1x256xf32>
    %714 = vector.broadcast %713 : vector<1x256xf32> to vector<8x256xf32>
    %715 = arith.addf %711, %714 : vector<8x256xf32>
    %716 = vector.extract_strided_slice %715 {offsets = [0, 0], sizes = [8, 128], strides = [1, 1]} : vector<8x256xf32> to vector<8x128xf32>
    %cst_581 = arith.constant 2.000000e-01 : f32
    %717 = vector.broadcast %cst_581 : f32 to vector<8x128xf32>
    %718 = arith.mulf %717, %716 : vector<8x128xf32>
    %719 = arith.maximumf %716, %718 : vector<8x128xf32>
    %720 = arith.truncf %719 : vector<8x128xf32> to vector<8x128xbf16>
    %721 = vector.extract_strided_slice %715 {offsets = [0, 128], sizes = [8, 128], strides = [1, 1]} : vector<8x256xf32> to vector<8x128xf32>
    %c2_582 = arith.constant 2 : index
    %c9_583 = arith.constant 9 : index
    %c0_584 = arith.constant 0 : index
    %c0_585 = arith.constant 0 : index
    %722 = vector.load %arg6[%c2_582, %c9_583, %c0_584, %c0_585] : memref<3x10x128x128xbf16, #tpu.memory_space<vmem>>, vector<1x1x128x128xbf16>
    %723 = vector.shape_cast %722 : vector<1x1x128x128xbf16> to vector<128x128xbf16>
    %cst_586 = arith.constant dense<0.000000e+00> : vector<8x128xf32>
    %724 = tpu.matmul %720, %723, %cst_586 {dimension_numbers = #tpu.dot_dimension_numbers<[1], [0], [0], [1], [0, 0, 1, 1], [], []>} : vector<8x128xbf16>, vector<128x128xbf16>, vector<8x128xf32> -> vector<8x128xf32>
    %c2_587 = arith.constant 2 : index
    %c9_588 = arith.constant 9 : index
    %c0_589 = arith.constant 0 : index
    %c0_590 = arith.constant 0 : index
    %725 = vector.load %arg7[%c2_587, %c9_588, %c0_589, %c0_590] : memref<3x10x1x128xf32, #tpu.memory_space<vmem>>, vector<1x1x1x128xf32>
    %726 = vector.shape_cast %725 : vector<1x1x1x128xf32> to vector<1x128xf32>
    %727 = vector.broadcast %726 : vector<1x128xf32> to vector<8x128xf32>
    %728 = arith.addf %724, %727 : vector<8x128xf32>
    %729 = arith.addf %728, %721 : vector<8x128xf32>
    %cst_591 = arith.constant 2.000000e-01 : f32
    %730 = vector.broadcast %cst_591 : f32 to vector<8x128xf32>
    %731 = arith.mulf %730, %729 : vector<8x128xf32>
    %732 = arith.maximumf %729, %731 : vector<8x128xf32>
    %733 = arith.addf %489, %732 : vector<8x128xf32>
    %c0_592 = arith.constant 0 : index
    %c0_593 = arith.constant 0 : index
    %734 = vector.load %arg8[%c0_592, %c0_593] : memref<8x128xf32, #tpu.memory_space<vmem>>, vector<8x128xf32>
    tpu.vector_store %arg8[%c0_592, %c0_593], %733 {strides = array<i32>} : memref<8x128xf32, #tpu.memory_space<vmem>>, vector<8x128xf32>,
    return
  }
  func.func @transform_0(%arg0: i32) -> (i32, i32) {
    %c0_i32 = arith.constant 0 : i32
    %c0_i32_0 = arith.constant 0 : i32
    return %arg0, %c0_i32 : i32, i32
  }
  func.func @transform_1(%arg0: i32) -> (i32, i32, i32, i32) {
    %c0_i32 = arith.constant 0 : i32
    %c0_i32_0 = arith.constant 0 : i32
    %c0_i32_1 = arith.constant 0 : i32
    %c0_i32_2 = arith.constant 0 : i32
    %c0_i32_3 = arith.constant 0 : i32
    return %c0_i32, %c0_i32_0, %c0_i32_1, %c0_i32_2 : i32, i32, i32, i32
  }
  func.func @transform_2(%arg0: i32) -> (i32, i32, i32, i32) {
    %c0_i32 = arith.constant 0 : i32
    %c0_i32_0 = arith.constant 0 : i32
    %c0_i32_1 = arith.constant 0 : i32
    %c0_i32_2 = arith.constant 0 : i32
    %c0_i32_3 = arith.constant 0 : i32
    return %c0_i32, %c0_i32_0, %c0_i32_1, %c0_i32_2 : i32, i32, i32, i32
  }
  func.func @transform_3(%arg0: i32) -> (i32, i32, i32, i32) {
    %c0_i32 = arith.constant 0 : i32
    %c0_i32_0 = arith.constant 0 : i32
    %c0_i32_1 = arith.constant 0 : i32
    %c0_i32_2 = arith.constant 0 : i32
    %c0_i32_3 = arith.constant 0 : i32
    return %c0_i32, %c0_i32_0, %c0_i32_1, %c0_i32_2 : i32, i32, i32, i32
  }
  func.func @transform_4(%arg0: i32) -> (i32, i32, i32, i32) {
    %c0_i32 = arith.constant 0 : i32
    %c0_i32_0 = arith.constant 0 : i32
    %c0_i32_1 = arith.constant 0 : i32
    %c0_i32_2 = arith.constant 0 : i32
    %c0_i32_3 = arith.constant 0 : i32
    return %c0_i32, %c0_i32_0, %c0_i32_1, %c0_i32_2 : i32, i32, i32, i32
  }
  func.func @transform_5(%arg0: i32) -> (i32, i32, i32, i32) {
    %c0_i32 = arith.constant 0 : i32
    %c0_i32_0 = arith.constant 0 : i32
    %c0_i32_1 = arith.constant 0 : i32
    %c0_i32_2 = arith.constant 0 : i32
    %c0_i32_3 = arith.constant 0 : i32
    return %c0_i32, %c0_i32_0, %c0_i32_1, %c0_i32_2 : i32, i32, i32, i32
  }
  func.func @transform_6(%arg0: i32) -> (i32, i32, i32, i32) {
    %c0_i32 = arith.constant 0 : i32
    %c0_i32_0 = arith.constant 0 : i32
    %c0_i32_1 = arith.constant 0 : i32
    %c0_i32_2 = arith.constant 0 : i32
    %c0_i32_3 = arith.constant 0 : i32
    return %c0_i32, %c0_i32_0, %c0_i32_1, %c0_i32_2 : i32, i32, i32, i32
  }
  func.func @transform_7(%arg0: i32) -> (i32, i32) {
    %c0_i32 = arith.constant 0 : i32
    %c0_i32_0 = arith.constant 0 : i32
    return %arg0, %c0_i32 : i32, i32
  }
}

</mosaic_0001>

<bundles_post_ra>
// kernel: aecoder_res_naive_forward.1
= control target key start
LH: loop header
LB: loop body
LE: loop exit
PB: predicated region body
PF: predicated region fallthrough
CT: control target
= control target key end

     0   :  { %12 = vsyncpa [#allocation3], 0  ;;  %s9187_s0 = inlined_call_operand.vmem [shape: bf16[8,128], index: 0, kind: input, shape index: {}]   ;;  %s9188_s1 = inlined_call_operand.hbm [shape: bf16[3,6,128,128], index: 1, kind: input, shape index: {}]   ;;  %s9189_s2 = inlined_call_operand.vmem [shape: f32[3,6,1,128], index: 2, kind: input, shape index: {}]   ;;  %s9190_s3 = inlined_call_operand.hbm [shape: bf16[3,4,128,256], index: 3, kind: input, shape index: {}]   ;;  %s9191_s4 = inlined_call_operand.hbm [shape: f32[3,4,1,256], index: 4, kind: input, shape index: {}]   ;;  %s9192_s5 = inlined_call_operand.hbm [shape: bf16[3,10,128,128], index: 5, kind: input, shape index: {}]   ;;  %s9193_s6 = inlined_call_operand.hbm [shape: f32[3,10,1,128], index: 6, kind: input, shape index: {}]   ;;  %s9194_s7 = inlined_call_operand.hbm [shape: f32[8,128], index: 7, kind: output, shape index: {}]  }
   0x1   :  { %13 = vsyncpa [#allocation6], 0 }
   0x2   :  { %14 = vsyncpa [#allocation9], 0  ;;  %s37_s26 = sshll.u32 %s9190_s3, 4  ;;  %s38_s26 = int_to_ptr.hbm [resolvable:$true] %s37_s26 }
   0x3   :  { %15 = vsyncpa [#allocation4], 0  ;;  %s9005_s27 = smov [#allocation5]   ;;  %s9006_s29 = smov 128  }
   0x4   :  { %s39_s28 = sshll.u32 %s9005_s27, 4  ;;  %s9007_s30 = smov 8   ;;  %s40_s28 = int_to_ptr.vmem [resolvable:$true] %s39_s28 }
   0x5   :  { %45 = dma.hbm_to_vmem [thread:$0]  %s38_s26, 24576, %s40_s28, [#allocation6], %s9006_s29, %s9006_s29, %s9007_s30  }
   0x6   :  { %s63_s10 = sshll.u32 %s9192_s5, 4  ;;  %s9008_s11 = smov [#allocation8]   ;;  %s64_s10 = int_to_ptr.hbm [resolvable:$true] %s63_s10 }
   0x7   :  { %s65_s12 = sshll.u32 %s9008_s11, 4  ;;  %s22_s15 = sshll.u32 %s9188_s1, 4  ;;  %s66_s12 = int_to_ptr.vmem [resolvable:$true] %s65_s12  ;;  %s23_s15 = int_to_ptr.hbm [resolvable:$true] %s22_s15 }
   0x8   :  { %s9009_s3 = smov 64   ;;  %s9010_s16 = smov 4  }
   0x9   :  { %71 = dma.hbm_to_vmem [thread:$0]  %s64_s10, 30720, %s66_s12, [#allocation9], %s9009_s3, %s9009_s3, %s9010_s16  }
   0xa   :  { %s50_s19 = sshll.u32 %s9191_s4, 4  ;;  %s9011_s20 = smov [#allocation2]   ;;  %s51_s19 = int_to_ptr.hbm [resolvable:$true] %s50_s19 }
   0xb   :  { %s24_s21 = sshll.u32 %s9011_s20, 4  ;;  %s9012_s5 = smov [#allocation7]   ;;  %s25_s21 = int_to_ptr.vmem [resolvable:$true] %s24_s21 }
   0xc   :  { %30 = dma.hbm_to_vmem [thread:$0]  %s23_s15, 18432, %s25_s21, [#allocation3], %s9009_s3, %s9009_s3, %s9010_s16  }
   0xd   :  { %s52_s22 = sshll.u32 %s9012_s5, 4  ;;  %s9013_s23 = smov 32   ;;  %s53_s22 = int_to_ptr.vmem [resolvable:$true] %s52_s22 }
   0xe   :  { %s9014_s24 = smov 2   ;;  %s76_s26 = sshll.u32 %s9193_s6, 4  ;;  %s77_s26 = int_to_ptr.hbm [resolvable:$true] %s76_s26 }
   0xf   :  { %58 = dma.hbm_to_vmem [thread:$0]  %s51_s19, 384, %s53_s22, [#allocation6], %s9013_s23, %s9013_s23, %s9014_s24  }
  0x10   :  { %s9015_s27 = smov [#allocation10]   ;;  %s9016_s4 = smov 16  }
  0x11   :  { %s78_s28 = sshll.u32 %s9015_s27, 4  ;;  %s9017_s29 = smov 1   ;;  %s79_s28 = int_to_ptr.vmem [resolvable:$true] %s78_s28 }
  0x12   :  { %84 = dma.hbm_to_vmem [thread:$0]  %s77_s26, 480, %s79_s28, [#allocation9], %s9016_s4, %s9016_s4, %s9017_s29  }
  0x13   :  { %8997 = dma.done.wait [#allocation3], 18432  }
  0x14   :  { %8998 = vsyncadd [#allocation3], 4294948864 }
  0x15   :  { %8999 = dma.done.wait [#allocation6], 24960  }
  0x16   :  { %9000 = vsyncadd [#allocation6], 4294942336 }
  0x17   :  { %9001 = dma.done.wait [#allocation9], 31200  }
  0x18   :  { %9002 = vsyncadd [#allocation9], 4294936096  ;;  %v5950_v0 = vld [vmem:[#allocation5 + $0x70] sm:$0xf]  ;;  %v8228_v1 = vld [vmem:[#allocation5 + $0x74] sm:$0xf0] }
  0x19   :  { %v5942_v2 = vld [vmem:[#allocation5 + $0x60] sm:$0xf]  ;;  %v5951_v3 = vor.u32 %v8228_v1, %v5950_v0  ;;  %v8226_v4 = vld [vmem:[#allocation5 + $0x64] sm:$0xf0]  ;;  %v5934_v6 = vld [vmem:[#allocation5 + $0x50] sm:$0xf] }
  0x1a   :  { %v5943_v5 = vor.u32 %v8226_v4, %v5942_v2  ;;  %v8224_v7 = vld [vmem:[#allocation5 + $0x54] sm:$0xf0]  ;;  %v8227_v8 = vld [vmem:[#allocation5 + $0x74] sm:$0xf]  ;;  %v5952_v9 = vld [vmem:[#allocation5 + $0x78] sm:$0xf0] }
  0x1b   :  { %208 = vmatpush.bf16.msra.mxu0 %v5951_v3  ;;  %v8236_v10 = vld [vmem:[#allocation8 + $0x38] sm:$0xff]  ;;  %v8225_v11 = vld [vmem:[#allocation5 + $0x64] sm:$0xf]  ;;  %v5935_v12 = vor.u32 %v8224_v7, %v5934_v6  ;;  %v5955_v13 = vor.u32 %v8227_v8, %v5952_v9  ;;  %v5944_v14 = vld [vmem:[#allocation5 + $0x68] sm:$0xf0]  ;;  %s5880_s21 = sshll.u32 %s9194_s7, 4  ;;  %s5881_s21 = int_to_ptr.hbm [resolvable:$true] %s5880_s21 }
  0x1c   :  { %v5926_v15 = vld [vmem:[#allocation5 + $0x40] sm:$0xf]  ;;  %v8222_v16 = vld [vmem:[#allocation5 + $0x44] sm:$0xf0]  ;;  %305 = vmatpush.bf16.msra.mxu2 %v8236_v10  ;;  %v5947_v18 = vor.u32 %v8225_v11, %v5944_v14  ;;  %v8223_v19 = vld [vmem:[#allocation5 + $0x54] sm:$0xf] }
  0x1d   :  { %v8235_v17 = vld [vmem:[#allocation8 + $0x30] sm:$0xff]  ;;  %221 = vmatpush.bf16.msra.mxu1 %v5955_v13  ;;  %v5936_v20 = vld [vmem:[#allocation5 + $0x58] sm:$0xf0]  ;;  %v5927_v21 = vor.u32 %v8222_v16, %v5926_v15  ;;  %v5918_v22 = vld [vmem:[#allocation5 + $0x30] sm:$0xf] }
  0x1e   :  { %v8220_v23 = vld [vmem:[#allocation5 + $0x34] sm:$0xf0]  ;;  %v8234_v24 = vld [vmem:[#allocation8 + $0x28] sm:$0xff]  ;;  %v5928_v26 = vld [vmem:[#allocation5 + $0x48] sm:$0xf0]  ;;  %v5939_v27 = vor.u32 %v8223_v19, %v5936_v20 }
  0x1f   :  { %209 = vmatpush.bf16.msra.mxu0 %v5943_v5  ;;  %v8221_v25 = vld [vmem:[#allocation5 + $0x44] sm:$0xf]  ;;  %v5910_v28 = vld [vmem:[#allocation5 + $0x20] sm:$0xf]  ;;  %v8218_v29 = vld [vmem:[#allocation5 + $0x24] sm:$0xf0]  ;;  %v5919_v31 = vor.u32 %v8220_v23, %v5918_v22 }
  0x20   :  { %306 = vmatpush.bf16.msra.mxu2 %v8235_v17  ;;  %v8233_v30 = vld [vmem:[#allocation8 + $0x20] sm:$0xff]  ;;  %v8219_v32 = vld [vmem:[#allocation5 + $0x34] sm:$0xf]  ;;  %v5931_v34 = vor.u32 %v8221_v25, %v5928_v26  ;;  %v5902_v35 = vld [vmem:[#allocation5 + $0x10] sm:$0xf]  ;;  %v5911_v38 = vor.u32 %v8218_v29, %v5910_v28 }
  0x21   :  { %222 = vmatpush.bf16.msra.mxu1 %v5947_v18  ;;  %v5920_v33 = vld [vmem:[#allocation5 + $0x38] sm:$0xf0]  ;;  %v8216_v36 = vld [vmem:[#allocation5 + $0x14] sm:$0xf0]  ;;  %v8232_v37 = vld [vmem:[#allocation8 + $0x18] sm:$0xff] }
  0x22   :  { %v8217_v39 = vld [vmem:[#allocation5 + $0x24] sm:$0xf]  ;;  %v5912_v40 = vld [vmem:[#allocation5 + $0x28] sm:$0xf0]  ;;  %v5923_v41 = vor.u32 %v8219_v32, %v5920_v33  ;;  %v5894_v42 = vld [vmem:[#allocation5] sm:$0xf]  ;;  %v5903_v45 = vor.u32 %v8216_v36, %v5902_v35 }
  0x23   :  { %210 = vmatpush.bf16.msra.mxu0 %v5935_v12  ;;  %v8214_v43 = vld [vmem:[#allocation5 + $0x4] sm:$0xf0]  ;;  %v5915_v46 = vor.u32 %v8217_v39, %v5912_v40  ;;  %v105_v48 = vld [vmem:[%s9187_s0] sm:$0xf]  ;;  %v8215_v49 = vld [vmem:[#allocation5 + $0x14] sm:$0xf] }
  0x24   :  { %307 = vmatpush.bf16.msra.mxu2 %v8234_v24  ;;  %v8231_v44 = vld [vmem:[#allocation8 + $0x10] sm:$0xff]  ;;  %v5895_v47 = vor.u32 %v8214_v43, %v5894_v42  ;;  %v5904_v50 = vld [vmem:[#allocation5 + $0x18] sm:$0xf0]  ;;  %v8230_v52 = vld [vmem:[#allocation8 + $0x8] sm:$0xff] }
  0x25   :  { %223 = vmatpush.bf16.msra.mxu1 %v5939_v27  ;;  %v5907_v51 = vor.u32 %v8215_v49, %v5904_v50  ;;  %v8213_v53 = vld [vmem:[#allocation5 + $0x4] sm:$0xf]  ;;  %v5896_v54 = vld [vmem:[#allocation5 + $0x8] sm:$0xf0]  ;;  %v8229_v56 = vld [vmem:[#allocation8] sm:$0xff] }
  0x26   :  { %v5899_v55 = vor.u32 %v8213_v53, %v5896_v54  ;;  %v8244_v57 = vld [vmem:[#allocation2 + $0x38] sm:$0xff]  ;;  %v8243_v58 = vld [vmem:[#allocation2 + $0x30] sm:$0xff]  ;;  %v8242_v59 = vld [vmem:[#allocation2 + $0x28] sm:$0xff] }
  0x27   :  { %211 = vmatpush.bf16.msra.mxu0 %v5927_v21  ;;  %390 = vmatpush.bf16.msra.mxu3 %v8244_v57  ;;  %v122_v60 = vld [vmem:[#allocation7] sm:$0x3]  ;;  %v8240_v5 = vld [vmem:[#allocation2 + $0x18] sm:$0xff]  ;;  %v8239_v7 = vld [vmem:[#allocation2 + $0x10] sm:$0xff] }
  0x28   :  { %308 = vmatpush.bf16.msra.mxu2 %v8233_v30  ;;  %v124_v61 = vperm.slane %v122_v60, 0  ;;  %v8241_v4 = vld [vmem:[#allocation2 + $0x20] sm:$0xff]  ;;  %v8238_v9 = vld [vmem:[#allocation2 + $0x8] sm:$0xff]  ;;  %v8252_v11 = vld [vmem:[#allocation8 + $0x78] sm:$0xff]  ;;  %v125_v16 = vperm.slane %v122_v60, 1 }
  0x29   :  { %224 = vmatpush.bf16.msra.mxu1 %v5931_v34  ;;  %v8237_v10 = vld [vmem:[#allocation2] sm:$0xff]  ;;  %v8251_v12 = vld [vmem:[#allocation8 + $0x70] sm:$0xff]  ;;  %v8249_v14 = vld [vmem:[#allocation8 + $0x60] sm:$0xff] }
  0x2a   :  { %v8250_v13 = vld [vmem:[#allocation8 + $0x68] sm:$0xff]  ;;  %v8248_v15 = vld [vmem:[#allocation8 + $0x58] sm:$0xff]  ;;  %v8803_v17 = vld [vmem:[#allocation10] ss:$0 sm:$0xff] }
  0x2b   :  { %212 = vmatpush.bf16.msra.mxu0 %v5919_v31  ;;  %391 = vmatpush.bf16.msra.mxu3 %v8243_v58  ;;  %v8247_v18 = vld [vmem:[#allocation8 + $0x50] sm:$0xff]  ;;  %v8246_v27 = vld [vmem:[#allocation8 + $0x48] sm:$0xff]  ;;  %v8245_v28 = vld [vmem:[#allocation8 + $0x40] sm:$0xff] }
  0x2c   :  { %309 = vmatpush.bf16.msra.mxu2 %v8232_v37  ;;  %v8260_v29 = vld [vmem:[#allocation2 + $0x78] sm:$0xff]  ;;  %v8259_v30 = vld [vmem:[#allocation2 + $0x70] sm:$0xff]  ;;  %v8258_v31 = vld [vmem:[#allocation2 + $0x68] sm:$0xff] }
  0x2d   :  { %225 = vmatpush.bf16.msra.mxu1 %v5923_v41  ;;  %v8257_v32 = vld [vmem:[#allocation2 + $0x60] sm:$0xff]  ;;  %v8256_v33 = vld [vmem:[#allocation2 + $0x58] sm:$0xff]  ;;  %v8255_v41 = vld [vmem:[#allocation2 + $0x50] sm:$0xff] }
  0x2e   :  { %v8804_v34 = vld [vmem:[%s9189_s2] ss:$0 sm:$0xff]  ;;  %v8254_v42 = vld [vmem:[#allocation2 + $0x48] sm:$0xff]  ;;  %v8805_v49 = vld [vmem:[#allocation10 + $0x1] ss:$0 sm:$0xff] }
  0x2f   :  { %213 = vmatpush.bf16.msra.mxu0 %v5911_v38  ;;  %392 = vmatpush.bf16.msra.mxu3 %v8242_v59  ;;  %v8253_v43 = vld [vmem:[#allocation2 + $0x40] sm:$0xff]  ;;  %v8263_v50 = vld [vmem:[#allocation8 + $0x90] sm:$0xff]  ;;  %v8261_v60 = vld [vmem:[#allocation8 + $0x80] sm:$0xff] }
  0x30   :  { %310 = vmatpush.bf16.msra.mxu2 %v8231_v44  ;;  %v8268_v44 = vld [vmem:[#allocation8 + $0xb8] sm:$0xff]  ;;  %v8262_v59 = vld [vmem:[#allocation8 + $0x88] sm:$0xff] }
  0x31   :  { %226 = vmatpush.bf16.msra.mxu1 %v5915_v46  ;;  %v8266_v46 = vld [vmem:[#allocation8 + $0xa8] sm:$0xff] }
  0x33   :  { %214 = vmatpush.bf16.msra.mxu0 %v5903_v45  ;;  %393 = vmatpush.bf16.msra.mxu3 %v8241_v4  ;;  %v8267_v45 = vld [vmem:[#allocation8 + $0xb0] sm:$0xff] }
  0x34   :  { %311 = vmatpush.bf16.msra.mxu2 %v8230_v52 }
  0x35   :  { %227 = vmatpush.bf16.msra.mxu1 %v5907_v51 }
  0x37   :  { %215 = vmatpush.bf16.msra.mxu0 %v5895_v47  ;;  %394 = vmatpush.bf16.msra.mxu3 %v8240_v5  ;;  %v8265_v47 = vld [vmem:[#allocation8 + $0xa0] sm:$0xff] }
  0x38   :  { %312 = vmatpush.bf16.msra.mxu2 %v8229_v56 }
  0x39   :  { %228 = vmatpush.bf16.msra.mxu1 %v5899_v55 }
  0x3a   :  { %216 = vmatmul.bf16.vlgmr.msra.gmra.mxu0 %v105_v48 }
  0x3b   :  { %395 = vmatpush.bf16.msra.mxu3 %v8239_v7  ;;  %477 = vmatpush.bf16.msrb.mxu0 %v8252_v11  ;;  %v8269_v11 = vld [vmem:[#allocation2 + $0x80] sm:$0xff] }
  0x3c   :  { %229 = vmatmul.bf16.vlgmr.msra.gmra.mxu1 %v105_v48  ;;  %651 = vmatpush.bf16.msrb.mxu2 %v8268_v44  ;;  %v8264_v48 = vld [vmem:[#allocation8 + $0x98] sm:$0xff]  ;;  %v6226_v44 = vld [vmem:[#allocation5 + $0xd8] sm:$0xf0] }
  0x3d   :  { %564 = vmatpush.bf16.msrb.mxu1 %v8260_v29  ;;  %v6240_v29 = vld [vmem:[#allocation5 + $0xf0] sm:$0xf] }
  0x3f   :  { %396 = vmatpush.bf16.msra.mxu3 %v8238_v9  ;;  %478 = vmatpush.bf16.msrb.mxu0 %v8251_v12  ;;  %v8271_v9 = vld [vmem:[#allocation2 + $0x90] sm:$0xff] }
  0x40   :  { %652 = vmatpush.bf16.msrb.mxu2 %v8267_v45  ;;  %v8284_v12 = vld [vmem:[#allocation8 + $0xf8] sm:$0xff] }
  0x41   :  { %565 = vmatpush.bf16.msrb.mxu1 %v8259_v30  ;;  %v8300_v30 = vld [vmem:[#allocation5 + $0xf4] sm:$0xf0] }
  0x43   :  { %397 = vmatpush.bf16.msra.mxu3 %v8237_v10  ;;  %479 = vmatpush.bf16.msrb.mxu0 %v8250_v13  ;;  %v8270_v10 = vld [vmem:[#allocation2 + $0x88] sm:$0xff] }
  0x44   :  { %653 = vmatpush.bf16.msrb.mxu2 %v8266_v46  ;;  %v8283_v13 = vld [vmem:[#allocation8 + $0xf0] sm:$0xff] }
  0x45   :  { %566 = vmatpush.bf16.msrb.mxu1 %v8258_v31  ;;  %v8299_v31 = vld [vmem:[#allocation5 + $0xf4] sm:$0xf] }
  0x47   :  { %480 = vmatpush.bf16.msrb.mxu0 %v8249_v14  ;;  %v8282_v14 = vld [vmem:[#allocation8 + $0xe8] sm:$0xff] }
  0x48   :  { %654 = vmatpush.bf16.msrb.mxu2 %v8265_v47  ;;  %v6216_v47 = vld [vmem:[#allocation5 + $0xc0] sm:$0xf] }
  0x49   :  { %567 = vmatpush.bf16.msrb.mxu1 %v8257_v32  ;;  %v6241_v32 = vor.u32 %v8300_v30, %v6240_v29 }
  0x4b   :  { %481 = vmatpush.bf16.msrb.mxu0 %v8248_v15  ;;  %v8281_v15 = vld [vmem:[#allocation8 + $0xe0] sm:$0xff] }
  0x4c   :  { %655 = vmatpush.bf16.msrb.mxu2 %v8264_v48  ;;  %v8294_v48 = vld [vmem:[#allocation5 + $0xc4] sm:$0xf0] }
  0x4d   :  { %568 = vmatpush.bf16.msrb.mxu1 %v8256_v33  ;;  %v6242_v33 = vld [vmem:[#allocation5 + $0xf8] sm:$0xf0] }
  0x4f   :  { %482 = vmatpush.bf16.msrb.mxu0 %v8247_v18  ;;  %v8279_v18 = vld [vmem:[#allocation8 + $0xd0] sm:$0xff] }
  0x50   :  { %656 = vmatpush.bf16.msrb.mxu2 %v8263_v50  ;;  %v6218_v50 = vld [vmem:[#allocation5 + $0xc8] sm:$0xf0] }
  0x51   :  { %569 = vmatpush.bf16.msrb.mxu1 %v8255_v41  ;;  %v6224_v41 = vld [vmem:[#allocation5 + $0xd0] sm:$0xf] }
  0x53   :  { %483 = vmatpush.bf16.msrb.mxu0 %v8246_v27  ;;  %v8278_v27 = vld [vmem:[#allocation8 + $0xc8] sm:$0xff] }
  0x54   :  { %657 = vmatpush.bf16.msrb.mxu2 %v8262_v59  ;;  %v8808_v59 = vld [vmem:[%s9189_s2 + $0x2] ss:$0 sm:$0xff] }
  0x55   :  { %570 = vmatpush.bf16.msrb.mxu1 %v8254_v42  ;;  %v8296_v42 = vld [vmem:[#allocation5 + $0xd4] sm:$0xf0] }
  0x56   :  { %v6225_v45 = vor.u32 %v8296_v42, %v6224_v41  ;;  %v6338_v42 = vld [vmem:[#allocation5 + $0x178] sm:$0xf0] }
  0x57   :  { %484 = vmatpush.bf16.msrb.mxu0 %v8245_v28  ;;  %v8277_v28 = vld [vmem:[#allocation8 + $0xc0] sm:$0xff] }
  0x58   :  { %658 = vmatpush.bf16.msrb.mxu2 %v8261_v60 }
  0x59   :  { %571 = vmatpush.bf16.msrb.mxu1 %v8253_v43  ;;  %v8295_v43 = vld [vmem:[#allocation5 + $0xd4] sm:$0xf] }
  0x5a   :  { %v6229_v46 = vor.u32 %v8295_v43, %v6226_v44  ;;  %v6328_v43 = vld [vmem:[#allocation5 + $0x160] sm:$0xf] }
  0x5b   :  { %825 = vmatpush.bf16.msra.mxu0 %v8284_v12  ;;  %v6194_v12 = vld [vmem:[#allocation5 + $0x98] sm:$0xf0] }
  0x5d   :  { %946 = vmatpush.bf16.msra.mxu1 %v6241_v32 }
  0x5f   :  { %826 = vmatpush.bf16.msra.mxu0 %v8283_v13 }
  0x63   :  { %827 = vmatpush.bf16.msra.mxu0 %v8282_v14  ;;  %v6184_v14 = vld [vmem:[#allocation5 + $0x80] sm:$0xf] }
  0x67   :  { %828 = vmatpush.bf16.msra.mxu0 %v8281_v15  ;;  %v8286_v15 = vld [vmem:[#allocation5 + $0x84] sm:$0xf0] }
  0xb7   :  { %v217_v62 = vpop.f32.mrf.mxu0 }
  0xb8   :  { %v218_v63 = vadd.f32 %v217_v62, %v124_v61  ;;  %v8276_v61 = vld [vmem:[#allocation2 + $0xb8] sm:$0xff]  ;;  %v8275_v62 = vld [vmem:[#allocation2 + $0xb0] sm:$0xff] }
  0xb9   :  { %v230_v6 = vpop.f32.mrf.mxu1  ;;  %738 = vmatpush.bf16.msrb.mxu3 %v8276_v61 }
  0xba   :  { %v234_v0 = vmul.f32 0.2, %v218_v63  ;;  %v231_v19 = vadd.f32 %v230_v6, %v125_v16  ;;  %v8280_v16 = vld [vmem:[#allocation8 + $0xd8] sm:$0xff] }
  0xbb   :  { %829 = vmatpush.bf16.msra.mxu0 %v8280_v16  ;;  %v8285_v16 = vld [vmem:[#allocation5 + $0x84] sm:$0xf] }
  0xbc   :  { %v235_v1 = vmax.f32 %v218_v63, %v234_v0  ;;  %v8274_v63 = vld [vmem:[#allocation2 + $0xa8] sm:$0xff]  ;;  %v8273_v0 = vld [vmem:[#allocation2 + $0xa0] sm:$0xff] }
  0xbd   :  { %739 = vmatpush.bf16.msrb.mxu3 %v8275_v62 }
  0xbe   :  { %v236_v2 = vpack.c.bf16 %v235_v1, %v235_v1  ;;  %v8272_v1 = vld [vmem:[#allocation2 + $0x98] sm:$0xff] }
  0xbf   :  { %v219_v3 = vpop.f32.mrf.mxu0  ;;  %830 = vmatpush.bf16.msra.mxu0 %v8279_v18  ;;  %v6186_v18 = vld [vmem:[#allocation5 + $0x88] sm:$0xf0] }
  0xc0   :  { %313 = vmatmul.bf16.vlgmr.msra.gmra.mxu2 %v236_v2  ;;  %v8806_v2 = vld [vmem:[%s9189_s2 + $0x1] ss:$0 sm:$0xff] }
  0xc1   :  { %v232_v8 = vpop.f32.mrf.mxu1  ;;  %740 = vmatpush.bf16.msrb.mxu3 %v8274_v63 }
  0xc3   :  { %831 = vmatpush.bf16.msra.mxu0 %v8278_v27  ;;  %v8303_v27 = vld [vmem:[#allocation8 + $0x110] sm:$0xff] }
  0xc5   :  { %741 = vmatpush.bf16.msrb.mxu3 %v8273_v0 }
  0xc7   :  { %832 = vmatpush.bf16.msra.mxu0 %v8277_v28 }
  0xc9   :  { %742 = vmatpush.bf16.msrb.mxu3 %v8272_v1 }
  0xcd   :  { %743 = vmatpush.bf16.msrb.mxu3 %v8271_v9  ;;  %v8288_v9 = vld [vmem:[#allocation5 + $0x94] sm:$0xf0] }
  0xd1   :  { %744 = vmatpush.bf16.msrb.mxu3 %v8270_v10  ;;  %v8287_v10 = vld [vmem:[#allocation5 + $0x94] sm:$0xf] }
  0xd2   :  { %v6197_v13 = vor.u32 %v8287_v10, %v6194_v12 }
  0xd5   :  { %745 = vmatpush.bf16.msrb.mxu3 %v8269_v11 }
 0x143   :  { %v314_v20 = vpop.f32.mrf.mxu2 }
 0x144   :  { %v315_v21 = vadd.f32 %v8803_v17, %v314_v20  ;;  %v8807_v17 = vld [vmem:[#allocation10 + $0x2] ss:$0 sm:$0xff] }
 0x146   :  { %v318_v22 = vadd.f32 %v315_v21, %v231_v19 }
 0x148   :  { %v319_v23 = vmul.f32 0.2, %v318_v22 }
 0x14a   :  { %v320_v24 = vmax.f32 %v318_v22, %v319_v23 }
 0x14b   :  { %v316_v25 = vpop.f32.mrf.mxu2 }
 0x14c   :  { %v321_v26 = vpack.c.bf16 %v320_v24, %v320_v24 }
 0x14e   :  { %398 = vmatmul.bf16.vlgmr.msra.gmra.mxu3 %v321_v26  ;;  %v406_v52 = vunpack.c.l.bf16 %v321_v26 }
 0x1d1   :  { %v399_v35 = vpop.f32.mrf.mxu3 }
 0x1d2   :  { %v400_v36 = vadd.f32 %v8804_v34, %v399_v35  ;;  %v6232_v34 = vld [vmem:[#allocation5 + $0xe0] sm:$0xf]  ;;  %v8298_v35 = vld [vmem:[#allocation5 + $0xe4] sm:$0xf0] }
 0x1d4   :  { %v403_v37 = vmul.f32 0.2, %v400_v36 }
 0x1d6   :  { %v404_v38 = vmax.f32 %v400_v36, %v403_v37  ;;  %v6245_v36 = vor.u32 %v8299_v31, %v6242_v33  ;;  %v8297_v37 = vld [vmem:[#allocation5 + $0xe4] sm:$0xf] }
 0x1d8   :  { %v405_v39 = vpack.c.bf16 %v404_v38, %v404_v38  ;;  %v6234_v38 = vld [vmem:[#allocation5 + $0xe8] sm:$0xf0]  ;;  %959 = vmatpush.bf16.msra.mxu2 %v6245_v36  ;;  %v8302_v36 = vld [vmem:[#allocation8 + $0x108] sm:$0xff] }
 0x1d9   :  { %v401_v40 = vpop.f32.mrf.mxu3 }
 0x1da   :  { %485 = vmatmul.bf16.vlgmr.msrb.gmra.mxu0 %v405_v39  ;;  %v6233_v39 = vor.u32 %v8298_v35, %v6232_v34  ;;  %v6237_v40 = vor.u32 %v8297_v37, %v6234_v38  ;;  %v8301_v37 = vld [vmem:[#allocation8 + $0x100] sm:$0xff]  ;;  %v6336_v38 = vld [vmem:[#allocation5 + $0x170] sm:$0xf] }
 0x1dc   :  { %947 = vmatpush.bf16.msra.mxu1 %v6233_v39  ;;  %960 = vmatpush.bf16.msra.mxu2 %v6237_v40  ;;  %v8324_v39 = vld [vmem:[#allocation5 + $0x174] sm:$0xf0]  ;;  %v8323_v40 = vld [vmem:[#allocation5 + $0x174] sm:$0xf] }
 0x1dd   :  { %v6337_v41 = vor.u32 %v8324_v39, %v6336_v38  ;;  %v6341_v44 = vor.u32 %v8323_v40, %v6338_v42  ;;  %v8810_v38 = vld [vmem:[#allocation10 + $0x4] ss:$0 sm:$0xff]  ;;  %v8327_v39 = vld [vmem:[#allocation8 + $0x150] sm:$0xff] }
 0x1df   :  { %1166 = vmatpush.bf16.msrb.mxu0 %v6337_v41 }
 0x1e0   :  { %948 = vmatpush.bf16.msra.mxu1 %v6225_v45  ;;  %961 = vmatpush.bf16.msra.mxu2 %v6229_v46  ;;  %v8321_v45 = vld [vmem:[#allocation5 + $0x164] sm:$0xf]  ;;  %v6330_v46 = vld [vmem:[#allocation5 + $0x168] sm:$0xf0] }
 0x257   :  { %v486_v51 = vpop.f32.mrf.mxu0 }
 0x258   :  { %v487_v53 = vadd.f32 %v8805_v49, %v486_v51  ;;  %v8293_v49 = vld [vmem:[#allocation5 + $0xc4] sm:$0xf]  ;;  %v6217_v51 = vor.u32 %v8294_v48, %v6216_v47  ;;  %v6333_v48 = vor.u32 %v8321_v45, %v6330_v46 }
 0x25a   :  { %v490_v54 = vadd.f32 %v487_v53, %v406_v52  ;;  %v6221_v52 = vor.u32 %v8293_v49, %v6218_v50  ;;  %v6208_v53 = vld [vmem:[#allocation5 + $0xb0] sm:$0xf]  ;;  %949 = vmatpush.bf16.msra.mxu1 %v6217_v51  ;;  %v8320_v50 = vld [vmem:[#allocation5 + $0x154] sm:$0xf0]  ;;  %v8319_v51 = vld [vmem:[#allocation5 + $0x154] sm:$0xf] }
 0x25b   :  { %v6320_v49 = vld [vmem:[#allocation5 + $0x150] sm:$0xf] }
 0x25c   :  { %v491_v55 = vmul.f32 0.2, %v490_v54  ;;  %962 = vmatpush.bf16.msra.mxu2 %v6221_v52  ;;  %v6322_v52 = vld [vmem:[#allocation5 + $0x158] sm:$0xf0] }
 0x25e   :  { %v492_v56 = vmax.f32 %v490_v54, %v491_v55  ;;  %v8292_v54 = vld [vmem:[#allocation5 + $0xb4] sm:$0xf0]  ;;  %v8291_v55 = vld [vmem:[#allocation5 + $0xb4] sm:$0xf] }
 0x25f   :  { %v488_v57 = vpop.f32.mrf.mxu0 }
 0x260   :  { %v493_v58 = vpack.c.bf16 %v492_v56, %v492_v56  ;;  %v6210_v56 = vld [vmem:[#allocation5 + $0xb8] sm:$0xf0]  ;;  %v6209_v57 = vor.u32 %v8292_v54, %v6208_v53  ;;  %v6321_v53 = vor.u32 %v8320_v50, %v6320_v49  ;;  %v6325_v54 = vor.u32 %v8319_v51, %v6322_v52  ;;  %v8339_v50 = vld [vmem:[#allocation2 + $0xf0] sm:$0xff]  ;;  %v8338_v51 = vld [vmem:[#allocation2 + $0xe8] sm:$0xff] }
 0x261   :  { %v8340_v49 = vld [vmem:[#allocation2 + $0xf8] sm:$0xff]  ;;  %v8337_v52 = vld [vmem:[#allocation2 + $0xe0] sm:$0xff] }
 0x262   :  { %572 = vmatmul.bf16.vlgmr.msrb.gmra.mxu1 %v493_v58  ;;  %v580_v20 = vunpack.c.l.bf16 %v493_v58  ;;  %v6213_v58 = vor.u32 %v8291_v55, %v6210_v56  ;;  %v6312_v55 = vld [vmem:[#allocation5 + $0x140] sm:$0xf]  ;;  %v8318_v56 = vld [vmem:[#allocation5 + $0x144] sm:$0xf0] }
 0x263   :  { %950 = vmatpush.bf16.msra.mxu1 %v6209_v57  ;;  %v8317_v57 = vld [vmem:[#allocation5 + $0x144] sm:$0xf] }
 0x264   :  { %963 = vmatpush.bf16.msra.mxu2 %v6213_v58  ;;  %v6314_v58 = vld [vmem:[#allocation5 + $0x148] sm:$0xf0] }
 0x2df   :  { %v573_v3 = vpop.f32.mrf.mxu1 }
 0x2e0   :  { %v574_v4 = vadd.f32 %v8806_v2, %v573_v3  ;;  %v6200_v2 = vld [vmem:[#allocation5 + $0xa0] sm:$0xf]  ;;  %v8290_v3 = vld [vmem:[#allocation5 + $0xa4] sm:$0xf0] }
 0x2e2   :  { %v577_v5 = vmul.f32 0.2, %v574_v4 }
 0x2e4   :  { %v578_v6 = vmax.f32 %v574_v4, %v577_v5  ;;  %v8289_v4 = vld [vmem:[#allocation5 + $0xa4] sm:$0xf]  ;;  %v6201_v5 = vor.u32 %v8290_v3, %v6200_v2 }
 0x2e6   :  { %v579_v7 = vpack.c.bf16 %v578_v6, %v578_v6  ;;  %v6202_v6 = vld [vmem:[#allocation5 + $0xa8] sm:$0xf0]  ;;  %951 = vmatpush.bf16.msra.mxu1 %v6201_v5 }
 0x2e7   :  { %v575_v8 = vpop.f32.mrf.mxu1 }
 0x2e8   :  { %659 = vmatmul.bf16.vlgmr.msrb.gmra.mxu2 %v579_v7  ;;  %v6205_v7 = vor.u32 %v8289_v4, %v6202_v6  ;;  %v6192_v8 = vld [vmem:[#allocation5 + $0x90] sm:$0xf] }
 0x2e9   :  { %v6193_v11 = vor.u32 %v8288_v9, %v6192_v8 }
 0x2ea   :  { %964 = vmatpush.bf16.msra.mxu2 %v6205_v7 }
 0x2eb   :  { %952 = vmatpush.bf16.msra.mxu1 %v6193_v11 }
 0x2ee   :  { %965 = vmatpush.bf16.msra.mxu2 %v6197_v13  ;;  %v6296_v13 = vld [vmem:[#allocation5 + $0x120] sm:$0xf] }
 0x36b   :  { %v660_v19 = vpop.f32.mrf.mxu2 }
 0x36c   :  { %v661_v21 = vadd.f32 %v8807_v17, %v660_v19  ;;  %v6185_v17 = vor.u32 %v8286_v15, %v6184_v14  ;;  %v6189_v19 = vor.u32 %v8285_v16, %v6186_v18  ;;  %v8314_v14 = vld [vmem:[#allocation5 + $0x124] sm:$0xf0]  ;;  %v8313_v15 = vld [vmem:[#allocation5 + $0x124] sm:$0xf] }
 0x36d   :  { %v6297_v16 = vor.u32 %v8314_v14, %v6296_v13 }
 0x36e   :  { %v664_v22 = vadd.f32 %v661_v21, %v580_v20  ;;  %953 = vmatpush.bf16.msra.mxu1 %v6185_v17  ;;  %966 = vmatpush.bf16.msra.mxu2 %v6189_v19  ;;  %v8308_v20 = vld [vmem:[#allocation8 + $0x138] sm:$0xff]  ;;  %v8307_v21 = vld [vmem:[#allocation8 + $0x130] sm:$0xff] }
 0x36f   :  { %1045 = vmatpush.bf16.msra.mxu3 %v8308_v20  ;;  %v6298_v17 = vld [vmem:[#allocation5 + $0x128] sm:$0xf0]  ;;  %v6288_v19 = vld [vmem:[#allocation5 + $0x110] sm:$0xf]  ;;  %v8312_v20 = vld [vmem:[#allocation5 + $0x114] sm:$0xf0] }
 0x370   :  { %v665_v23 = vmul.f32 0.2, %v664_v22  ;;  %v6301_v18 = vor.u32 %v8313_v15, %v6298_v17 }
 0x372   :  { %v666_v24 = vmax.f32 %v664_v22, %v665_v23  ;;  %v8306_v22 = vld [vmem:[#allocation8 + $0x128] sm:$0xff]  ;;  %v8305_v23 = vld [vmem:[#allocation8 + $0x120] sm:$0xff]  ;;  %1179 = vmatpush.bf16.msrb.mxu1 %v6341_v44 }
 0x373   :  { %v662_v25 = vpop.f32.mrf.mxu2  ;;  %1046 = vmatpush.bf16.msra.mxu3 %v8307_v21  ;;  %v8311_v21 = vld [vmem:[#allocation5 + $0x114] sm:$0xf] }
 0x374   :  { %v9083_v26 = vpack.c.bf16 %v666_v24, %v666_v24  ;;  %v8304_v24 = vld [vmem:[#allocation8 + $0x118] sm:$0xff]  ;;  %v8809_v25 = vld [vmem:[#allocation10 + $0x3] ss:$0 sm:$0xff] }
 0x376   :  { %746 = vmatmul.bf16.vlgmr.msrb.gmra.mxu3 %v9083_v26  ;;  %v754_v29 = vunpack.c.l.bf16 %v9083_v26  ;;  %v8322_v26 = vld [vmem:[#allocation5 + $0x164] sm:$0xf0]  ;;  %1180 = vmatpush.bf16.msrb.mxu1 %v6333_v48  ;;  %v8325_v48 = vld [vmem:[#allocation8 + $0x140] sm:$0xff] }
 0x377   :  { %1047 = vmatpush.bf16.msra.mxu3 %v8306_v22  ;;  %v6329_v47 = vor.u32 %v8322_v26, %v6328_v43  ;;  %v6289_v22 = vor.u32 %v8312_v20, %v6288_v19  ;;  %v8342_v19 = vld [vmem:[#allocation8 + $0x188] sm:$0xff]  ;;  %v8341_v20 = vld [vmem:[#allocation8 + $0x180] sm:$0xff] }
 0x379   :  { %1167 = vmatpush.bf16.msrb.mxu0 %v6329_v47  ;;  %v8326_v47 = vld [vmem:[#allocation8 + $0x148] sm:$0xff] }
 0x37a   :  { %1181 = vmatpush.bf16.msrb.mxu1 %v6325_v54  ;;  %v1080_v54 = vld [vmem:[#allocation7 + $0x4] sm:$0x3] }
 0x37b   :  { %1048 = vmatpush.bf16.msra.mxu3 %v8305_v23  ;;  %v6290_v23 = vld [vmem:[#allocation5 + $0x118] sm:$0xf0] }
 0x37d   :  { %1168 = vmatpush.bf16.msrb.mxu0 %v6321_v53  ;;  %v8336_v53 = vld [vmem:[#allocation2 + $0xd8] sm:$0xff] }
 0x37f   :  { %1049 = vmatpush.bf16.msra.mxu3 %v8304_v24  ;;  %v6293_v24 = vor.u32 %v8311_v21, %v6290_v23  ;;  %v8356_v21 = vld [vmem:[#allocation2 + $0x138] sm:$0xff]  ;;  %v8354_v23 = vld [vmem:[#allocation2 + $0x128] sm:$0xff] }
 0x383   :  { %1050 = vmatpush.bf16.msra.mxu3 %v8303_v27  ;;  %v8310_v27 = vld [vmem:[#allocation5 + $0x104] sm:$0xf0] }
 0x387   :  { %1051 = vmatpush.bf16.msra.mxu3 %v8302_v36  ;;  %v8328_v36 = vld [vmem:[#allocation8 + $0x158] sm:$0xff] }
 0x38b   :  { %1052 = vmatpush.bf16.msra.mxu3 %v8301_v37 }
 0x38f   :  { %1352 = vmatpush.bf16.msrb.mxu3 %v8340_v49 }
 0x393   :  { %1353 = vmatpush.bf16.msrb.mxu3 %v8339_v50 }
 0x397   :  { %1354 = vmatpush.bf16.msrb.mxu3 %v8338_v51  ;;  %v8358_v51 = vld [vmem:[#allocation8 + $0x1c8] sm:$0xff] }
 0x39b   :  { %1355 = vmatpush.bf16.msrb.mxu3 %v8337_v52  ;;  %v8357_v52 = vld [vmem:[#allocation8 + $0x1c0] sm:$0xff] }
 0x39f   :  { %1356 = vmatpush.bf16.msrb.mxu3 %v8336_v53  ;;  %v8372_v53 = vld [vmem:[#allocation2 + $0x178] sm:$0xff] }
 0x3f9   :  { %v747_v60 = vpop.f32.mrf.mxu3 }
 0x3fa   :  { %v748_v61 = vadd.f32 %v8808_v59, %v747_v60  ;;  %v6313_v59 = vor.u32 %v8318_v56, %v6312_v55  ;;  %v860_v60 = vld [vmem:[#allocation7 + $0x2] sm:$0x3]  ;;  %v1082_v55 = vperm.slane %v1080_v54, 0 }
 0x3fb   :  { %v862_v2 = vperm.slane %v860_v60, 0  ;;  %v863_v37 = vperm.slane %v860_v60, 1 }
 0x3fc   :  { %v751_v62 = vmul.f32 0.2, %v748_v61  ;;  %1169 = vmatpush.bf16.msrb.mxu0 %v6313_v59 }
 0x3fe   :  { %v752_v63 = vmax.f32 %v748_v61, %v751_v62  ;;  %v6317_v61 = vor.u32 %v8317_v57, %v6314_v58  ;;  %v6304_v62 = vld [vmem:[#allocation5 + $0x130] sm:$0xf] }
 0x400   :  { %v753_v0 = vpack.c.bf16 %v752_v63, %v752_v63  ;;  %v8316_v63 = vld [vmem:[#allocation5 + $0x134] sm:$0xf0]  ;;  %1182 = vmatpush.bf16.msrb.mxu1 %v6317_v61 }
 0x401   :  { %v749_v1 = vpop.f32.mrf.mxu3  ;;  %v6305_v3 = vor.u32 %v8316_v63, %v6304_v62 }
 0x402   :  { %833 = vmatmul.bf16.vlgmr.msra.gmra.mxu0 %v753_v0  ;;  %v8315_v0 = vld [vmem:[#allocation5 + $0x134] sm:$0xf]  ;;  %v6306_v1 = vld [vmem:[#allocation5 + $0x138] sm:$0xf0] }
 0x403   :  { %v6309_v4 = vor.u32 %v8315_v0, %v6306_v1  ;;  %1170 = vmatpush.bf16.msrb.mxu0 %v6305_v3  ;;  %v8335_v0 = vld [vmem:[#allocation2 + $0xd0] sm:$0xff]  ;;  %v8334_v1 = vld [vmem:[#allocation2 + $0xc8] sm:$0xff] }
 0x404   :  { %1357 = vmatpush.bf16.msrb.mxu3 %v8335_v0  ;;  %v8348_v3 = vld [vmem:[#allocation8 + $0x1b8] sm:$0xff] }
 0x405   :  { %1183 = vmatpush.bf16.msrb.mxu1 %v6309_v4  ;;  %v8347_v4 = vld [vmem:[#allocation8 + $0x1b0] sm:$0xff] }
 0x407   :  { %1171 = vmatpush.bf16.msrb.mxu0 %v6297_v16 }
 0x408   :  { %1358 = vmatpush.bf16.msrb.mxu3 %v8334_v1  ;;  %v8367_v1 = vld [vmem:[#allocation2 + $0x150] sm:$0xff] }
 0x409   :  { %1184 = vmatpush.bf16.msrb.mxu1 %v6301_v18 }
 0x40b   :  { %1172 = vmatpush.bf16.msrb.mxu0 %v6289_v22  ;;  %v8355_v22 = vld [vmem:[#allocation2 + $0x130] sm:$0xff] }
 0x40d   :  { %1185 = vmatpush.bf16.msrb.mxu1 %v6293_v24  ;;  %v8353_v24 = vld [vmem:[#allocation2 + $0x120] sm:$0xff] }
 0x47f   :  { %v834_v28 = vpop.f32.mrf.mxu0 }
 0x480   :  { %v835_v30 = vadd.f32 %v8809_v25, %v834_v28  ;;  %v6280_v25 = vld [vmem:[#allocation5 + $0x100] sm:$0xf]  ;;  %v8309_v28 = vld [vmem:[#allocation5 + $0x104] sm:$0xf] }
 0x482   :  { %v838_v31 = vadd.f32 %v835_v30, %v754_v29  ;;  %v6281_v29 = vor.u32 %v8310_v27, %v6280_v25  ;;  %v6282_v30 = vld [vmem:[#allocation5 + $0x108] sm:$0xf0]  ;;  %v8352_v25 = vld [vmem:[#allocation2 + $0x118] sm:$0xff]  ;;  %v8812_v27 = vld [vmem:[%s9189_s2 + $0x3] ss:$0 sm:$0xff] }
 0x484   :  { %v839_v32 = vmul.f32 0.2, %v838_v31  ;;  %1173 = vmatpush.bf16.msrb.mxu0 %v6281_v29 }
 0x486   :  { %v840_v33 = vmax.f32 %v838_v31, %v839_v32  ;;  %v6285_v31 = vor.u32 %v8309_v28, %v6282_v30  ;;  %v8332_v32 = vld [vmem:[#allocation8 + $0x178] sm:$0xff] }
 0x487   :  { %v836_v34 = vpop.f32.mrf.mxu0  ;;  %1265 = vmatpush.bf16.msrb.mxu2 %v8332_v32 }
 0x488   :  { %v841_v35 = vpack.c.bf16 %v840_v33, %v840_v33  ;;  %1186 = vmatpush.bf16.msrb.mxu1 %v6285_v31  ;;  %v8331_v33 = vld [vmem:[#allocation8 + $0x170] sm:$0xff]  ;;  %v8330_v34 = vld [vmem:[#allocation8 + $0x168] sm:$0xff]  ;;  %1439 = vmatpush.bf16.msra.mxu0 %v8348_v3 }
 0x489   :  { %v8365_v3 = vld [vmem:[#allocation2 + $0x140] sm:$0xff] }
 0x48a   :  { %954 = vmatmul.bf16.vlgmr.msra.gmra.mxu1 %v841_v35  ;;  %967 = vmatmul.bf16.vlgmr.msra.gmra.mxu2 %v841_v35  ;;  %v8329_v35 = vld [vmem:[#allocation8 + $0x160] sm:$0xff] }
 0x48b   :  { %1266 = vmatpush.bf16.msrb.mxu2 %v8331_v33 }
 0x48c   :  { %1440 = vmatpush.bf16.msra.mxu0 %v8347_v4  ;;  %1526 = vmatpush.bf16.msra.mxu1 %v8356_v21  ;;  %v8380_v4 = vld [vmem:[#allocation8 + $0x238] sm:$0xff] }
 0x48f   :  { %1267 = vmatpush.bf16.msrb.mxu2 %v8330_v34  ;;  %v8351_v34 = vld [vmem:[#allocation2 + $0x110] sm:$0xff] }
 0x490   :  { %1527 = vmatpush.bf16.msra.mxu1 %v8355_v22  ;;  %v6715_v22 = vld [vmem:[#allocation5 + $0x260] sm:$0xf] }
 0x493   :  { %1268 = vmatpush.bf16.msrb.mxu2 %v8329_v35  ;;  %v8350_v35 = vld [vmem:[#allocation2 + $0x108] sm:$0xff] }
 0x494   :  { %1528 = vmatpush.bf16.msra.mxu1 %v8354_v23  ;;  %v8418_v23 = vld [vmem:[#allocation5 + $0x264] sm:$0xf0] }
 0x497   :  { %1269 = vmatpush.bf16.msrb.mxu2 %v8328_v36  ;;  %v8349_v36 = vld [vmem:[#allocation2 + $0x100] sm:$0xff] }
 0x498   :  { %1529 = vmatpush.bf16.msra.mxu1 %v8353_v24 }
 0x49b   :  { %1270 = vmatpush.bf16.msrb.mxu2 %v8327_v39  ;;  %v8362_v39 = vld [vmem:[#allocation8 + $0x1e8] sm:$0xff] }
 0x49c   :  { %1530 = vmatpush.bf16.msra.mxu1 %v8352_v25 }
 0x49f   :  { %1271 = vmatpush.bf16.msrb.mxu2 %v8326_v47 }
 0x4a0   :  { %1531 = vmatpush.bf16.msra.mxu1 %v8351_v34  ;;  %v6691_v34 = vld [vmem:[#allocation5 + $0x230] sm:$0xf] }
 0x4a3   :  { %1272 = vmatpush.bf16.msrb.mxu2 %v8325_v48 }
 0x4a4   :  { %1532 = vmatpush.bf16.msra.mxu1 %v8350_v35  ;;  %v8412_v35 = vld [vmem:[#allocation5 + $0x234] sm:$0xf0] }
 0x4a8   :  { %1533 = vmatpush.bf16.msra.mxu1 %v8349_v36  ;;  %v6692_v36 = vor.u32 %v8412_v35, %v6691_v34  ;;  %v8381_v34 = vld [vmem:[#allocation5 + $0x184] sm:$0xf]  ;;  %v6573_v35 = vld [vmem:[#allocation5 + $0x188] sm:$0xf0] }
 0x507   :  { %v955_v5 = vpop.f32.mrf.mxu1 }
 0x508   :  { %v956_v6 = vadd.f32 %v955_v5, %v862_v2  ;;  %v8333_v2 = vld [vmem:[#allocation2 + $0xc0] sm:$0xff] }
 0x509   :  { %1359 = vmatpush.bf16.msrb.mxu3 %v8333_v2  ;;  %v8346_v5 = vld [vmem:[#allocation8 + $0x1a8] sm:$0xff]  ;;  %v8366_v2 = vld [vmem:[#allocation2 + $0x148] sm:$0xff] }
 0x50a   :  { %v972_v7 = vmul.f32 0.2, %v956_v6  ;;  %1441 = vmatpush.bf16.msra.mxu0 %v8346_v5  ;;  %v8379_v5 = vld [vmem:[#allocation8 + $0x230] sm:$0xff] }
 0x50c   :  { %v973_v8 = vmax.f32 %v956_v6, %v972_v7  ;;  %v8345_v6 = vld [vmem:[#allocation8 + $0x1a0] sm:$0xff]  ;;  %v8344_v7 = vld [vmem:[#allocation8 + $0x198] sm:$0xff] }
 0x50d   :  { %v968_v9 = vpop.f32.mrf.mxu2 }
 0x50e   :  { %v974_v10 = vpack.c.bf16 %v973_v8, %v973_v8  ;;  %v969_v41 = vadd.f32 %v968_v9, %v863_v37  ;;  %1442 = vmatpush.bf16.msra.mxu0 %v8345_v6  ;;  %v1083_v8 = vperm.slane %v1080_v54, 1  ;;  %v8811_v9 = vld [vmem:[#allocation10 + $0x5] ss:$0 sm:$0xff]  ;;  %v8364_v37 = vld [vmem:[#allocation8 + $0x1f8] sm:$0xff]  ;;  %v8378_v6 = vld [vmem:[#allocation8 + $0x228] sm:$0xff] }
 0x50f   :  { %v957_v11 = vpop.f32.mrf.mxu1  ;;  %1613 = vmatpush.bf16.msra.mxu2 %v8364_v37  ;;  %v8371_v54 = vld [vmem:[#allocation2 + $0x170] sm:$0xff]  ;;  %v6683_v37 = vld [vmem:[#allocation5 + $0x220] sm:$0xf] }
 0x510   :  { %1053 = vmatmul.bf16.vlgmr.msra.gmra.mxu3 %v974_v10  ;;  %v8343_v10 = vld [vmem:[#allocation8 + $0x190] sm:$0xff] }
 0x511   :  { %1700 = vmatpush.bf16.msra.mxu3 %v8372_v53  ;;  %v8393_v53 = vld [vmem:[#allocation5 + $0x1e4] sm:$0xf] }
 0x512   :  { %1443 = vmatpush.bf16.msra.mxu0 %v8344_v7  ;;  %v8377_v7 = vld [vmem:[#allocation8 + $0x220] sm:$0xff] }
 0x515   :  { %v970_v12 = vpop.f32.mrf.mxu2  ;;  %1701 = vmatpush.bf16.msra.mxu3 %v8371_v54  ;;  %v6621_v54 = vld [vmem:[#allocation5 + $0x1e8] sm:$0xf0] }
 0x516   :  { %1444 = vmatpush.bf16.msra.mxu0 %v8343_v10  ;;  %v8375_v10 = vld [vmem:[#allocation8 + $0x210] sm:$0xff] }
 0x51a   :  { %1445 = vmatpush.bf16.msra.mxu0 %v8342_v19  ;;  %v8373_v19 = vld [vmem:[#allocation8 + $0x200] sm:$0xff] }
 0x51e   :  { %1446 = vmatpush.bf16.msra.mxu0 %v8341_v20 }
 0x593   :  { %v1054_v40 = vpop.f32.mrf.mxu3 }
 0x594   :  { %v1055_v42 = vadd.f32 %v8810_v38, %v1054_v40  ;;  %v8363_v38 = vld [vmem:[#allocation8 + $0x1f0] sm:$0xff]  ;;  %v8361_v40 = vld [vmem:[#allocation8 + $0x1e0] sm:$0xff] }
 0x595   :  { %1614 = vmatpush.bf16.msra.mxu2 %v8363_v38  ;;  %v8410_v38 = vld [vmem:[#allocation5 + $0x224] sm:$0xf0] }
 0x596   :  { %v1058_v43 = vadd.f32 %v1055_v42, %v969_v41  ;;  %v8360_v41 = vld [vmem:[#allocation8 + $0x1d8] sm:$0xff]  ;;  %v8813_v42 = vld [vmem:[#allocation10 + $0x6] ss:$0 sm:$0xff] }
 0x598   :  { %v1059_v26 = vmul.f32 0.2, %v1058_v43 }
 0x599   :  { %1615 = vmatpush.bf16.msra.mxu2 %v8362_v39  ;;  %v6684_v39 = vor.u32 %v8410_v38, %v6683_v37  ;;  %v6725_v37 = vld [vmem:[#allocation5 + $0x278] sm:$0xf0] }
 0x59a   :  { %v1060_v44 = vmax.f32 %v1058_v43, %v1059_v26  ;;  %v8359_v43 = vld [vmem:[#allocation8 + $0x1d0] sm:$0xff] }
 0x59b   :  { %v1056_v45 = vpop.f32.mrf.mxu3 }
 0x59c   :  { %v1061_v46 = vpack.c.bf16 %v1060_v44, %v1060_v44 }
 0x59d   :  { %1616 = vmatpush.bf16.msra.mxu2 %v8361_v40  ;;  %v6675_v40 = vld [vmem:[#allocation5 + $0x210] sm:$0xf] }
 0x59e   :  { %1174 = vmatmul.bf16.vlgmr.msrb.gmra.mxu0 %v1061_v46  ;;  %1187 = vmatmul.bf16.vlgmr.msrb.gmra.mxu1 %v1061_v46 }
 0x59f   :  { %1787 = vmatpush.bf16.msrb.mxu0 %v8380_v4  ;;  %v8389_v4 = vld [vmem:[#allocation5 + $0x1c4] sm:$0xf] }
 0x5a1   :  { %1617 = vmatpush.bf16.msra.mxu2 %v8360_v41  ;;  %v8408_v41 = vld [vmem:[#allocation5 + $0x214] sm:$0xf0] }
 0x5a3   :  { %1788 = vmatpush.bf16.msrb.mxu0 %v8379_v5  ;;  %v6605_v5 = vld [vmem:[#allocation5 + $0x1c8] sm:$0xf0] }
 0x5a5   :  { %1618 = vmatpush.bf16.msra.mxu2 %v8359_v43  ;;  %v6667_v43 = vld [vmem:[#allocation5 + $0x200] sm:$0xf] }
 0x5a7   :  { %1789 = vmatpush.bf16.msrb.mxu0 %v8378_v6 }
 0x5a9   :  { %1619 = vmatpush.bf16.msra.mxu2 %v8358_v51  ;;  %v8394_v51 = vld [vmem:[#allocation5 + $0x1e4] sm:$0xf0] }
 0x5ab   :  { %1790 = vmatpush.bf16.msrb.mxu0 %v8377_v7 }
 0x5ad   :  { %1620 = vmatpush.bf16.msra.mxu2 %v8357_v52 }
 0x61b   :  { %v1175_v56 = vpop.f32.mrf.mxu0  ;;  %v1188_v57 = vpop.f32.mrf.mxu1 }
 0x61c   :  { %v1176_v58 = vadd.f32 %v1175_v56, %v1082_v55  ;;  %v1189_v12 = vadd.f32 %v1188_v57, %v1083_v8  ;;  %v8370_v55 = vld [vmem:[#allocation2 + $0x168] sm:$0xff]  ;;  %v8369_v56 = vld [vmem:[#allocation2 + $0x160] sm:$0xff]  ;;  %v8368_v57 = vld [vmem:[#allocation2 + $0x158] sm:$0xff] }
 0x61d   :  { %1702 = vmatpush.bf16.msra.mxu3 %v8370_v55  ;;  %v8376_v8 = vld [vmem:[#allocation8 + $0x218] sm:$0xff] }
 0x61e   :  { %v1192_v59 = vmul.f32 0.2, %v1176_v58  ;;  %1791 = vmatpush.bf16.msrb.mxu0 %v8376_v8 }
 0x620   :  { %v1193_v60 = vmax.f32 %v1176_v58, %v1192_v59  ;;  %v8814_v58 = vld [vmem:[%s9189_s2 + $0x4] ss:$0 sm:$0xff] }
 0x621   :  { %1703 = vmatpush.bf16.msra.mxu3 %v8369_v56  ;;  %v8816_v56 = vld [vmem:[%s9189_s2 + $0x5] ss:$0 sm:$0xff] }
 0x622   :  { %v1194_v61 = vpack.c.bf16 %v1193_v60, %v1193_v60  ;;  %1792 = vmatpush.bf16.msrb.mxu0 %v8375_v10  ;;  %v6595_v10 = vld [vmem:[#allocation5 + $0x1b0] sm:$0xf] }
 0x623   :  { %v1177_v62 = vpop.f32.mrf.mxu0  ;;  %v1190_v63 = vpop.f32.mrf.mxu1 }
 0x624   :  { %1273 = vmatmul.bf16.vlgmr.msrb.gmra.mxu2 %v1194_v61 }
 0x625   :  { %1704 = vmatpush.bf16.msra.mxu3 %v8368_v57  ;;  %v6624_v57 = vor.u32 %v8393_v53, %v6621_v54  ;;  %v8425_v53 = vld [vmem:[#allocation8 + $0x2a0] sm:$0xff]  ;;  %v8411_v54 = vld [vmem:[#allocation5 + $0x234] sm:$0xf] }
 0x629   :  { %1705 = vmatpush.bf16.msra.mxu3 %v8367_v1 }
 0x62d   :  { %1706 = vmatpush.bf16.msra.mxu3 %v8366_v2  ;;  %v6603_v2 = vld [vmem:[#allocation5 + $0x1c0] sm:$0xf] }
 0x631   :  { %1707 = vmatpush.bf16.msra.mxu3 %v8365_v3  ;;  %v8390_v3 = vld [vmem:[#allocation5 + $0x1c4] sm:$0xf0] }
 0x632   :  { %v6604_v7 = vor.u32 %v8390_v3, %v6603_v2  ;;  %v8405_v2 = vld [vmem:[#allocation5 + $0x204] sm:$0xf]  ;;  %v6669_v3 = vld [vmem:[#allocation5 + $0x208] sm:$0xf0] }
 0x6a7   :  { %v1274_v11 = vpop.f32.mrf.mxu2 }
 0x6a8   :  { %v1275_v13 = vadd.f32 %v8811_v9, %v1274_v11  ;;  %v8815_v9 = vld [vmem:[#allocation10 + $0x7] ss:$0 sm:$0xff] }
 0x6aa   :  { %v1278_v14 = vadd.f32 %v1275_v13, %v1189_v12 }
 0x6ac   :  { %v1279_v15 = vmul.f32 0.2, %v1278_v14 }
 0x6ae   :  { %v1280_v16 = vmax.f32 %v1278_v14, %v1279_v15  ;;  %v8374_v14 = vld [vmem:[#allocation8 + $0x208] sm:$0xff] }
 0x6af   :  { %v1276_v17 = vpop.f32.mrf.mxu2  ;;  %1793 = vmatpush.bf16.msrb.mxu0 %v8374_v14 }
 0x6b0   :  { %v1281_v18 = vpack.c.bf16 %v1280_v16, %v1280_v16  ;;  %v6723_v16 = vld [vmem:[#allocation5 + $0x270] sm:$0xf]  ;;  %v8420_v17 = vld [vmem:[#allocation5 + $0x274] sm:$0xf0] }
 0x6b1   :  { %v6724_v20 = vor.u32 %v8420_v17, %v6723_v16 }
 0x6b2   :  { %1360 = vmatmul.bf16.vlgmr.msrb.gmra.mxu3 %v1281_v18  ;;  %v1368_v44 = vunpack.c.l.bf16 %v1281_v18 }
 0x6b3   :  { %1794 = vmatpush.bf16.msrb.mxu0 %v8373_v19  ;;  %v8386_v19 = vld [vmem:[#allocation5 + $0x1a4] sm:$0xf0] }
 0x735   :  { %v1361_v28 = vpop.f32.mrf.mxu3 }
 0x736   :  { %v1362_v29 = vadd.f32 %v8812_v27, %v1361_v28  ;;  %v6716_v27 = vor.u32 %v8418_v23, %v6715_v22  ;;  %v6707_v28 = vld [vmem:[#allocation5 + $0x250] sm:$0xf] }
 0x738   :  { %v1365_v30 = vmul.f32 0.2, %v1362_v29 }
 0x73a   :  { %v1366_v31 = vmax.f32 %v1362_v29, %v1365_v30  ;;  %v8416_v29 = vld [vmem:[#allocation5 + $0x254] sm:$0xf0] }
 0x73b   :  { %v6708_v30 = vor.u32 %v8416_v29, %v6707_v28  ;;  %v8383_v28 = vld [vmem:[#allocation5 + $0x194] sm:$0xf]  ;;  %v6581_v29 = vld [vmem:[#allocation5 + $0x198] sm:$0xf0] }
 0x73c   :  { %v1367_v32 = vpack.c.bf16 %v1366_v31, %v1366_v31  ;;  %v6699_v31 = vld [vmem:[#allocation5 + $0x240] sm:$0xf] }
 0x73d   :  { %v1363_v33 = vpop.f32.mrf.mxu3 }
 0x73e   :  { %1447 = vmatmul.bf16.vlgmr.msra.gmra.mxu0 %v1367_v32  ;;  %v8414_v32 = vld [vmem:[#allocation5 + $0x244] sm:$0xf0] }
 0x73f   :  { %2128 = vmatpush.bf16.msra.mxu0 %v6724_v20  ;;  %v6700_v33 = vor.u32 %v8414_v32, %v6699_v31  ;;  %v8385_v20 = vld [vmem:[#allocation5 + $0x1a4] sm:$0xf]  ;;  %v6584_v31 = vor.u32 %v8383_v28, %v6581_v29  ;;  %v6571_v32 = vld [vmem:[#allocation5 + $0x180] sm:$0xf] }
 0x743   :  { %2129 = vmatpush.bf16.msra.mxu0 %v6716_v27  ;;  %v8384_v27 = vld [vmem:[#allocation5 + $0x194] sm:$0xf0] }
 0x747   :  { %2130 = vmatpush.bf16.msra.mxu0 %v6708_v30 }
 0x74b   :  { %2131 = vmatpush.bf16.msra.mxu0 %v6700_v33  ;;  %v8382_v33 = vld [vmem:[#allocation5 + $0x184] sm:$0xf0] }
 0x74c   :  { %v6572_v38 = vor.u32 %v8382_v33, %v6571_v32  ;;  %v8436_v32 = vld [vmem:[#allocation2 + $0x1b8] sm:$0xff]  ;;  %v8435_v33 = vld [vmem:[#allocation2 + $0x1b0] sm:$0xff] }
 0x74f   :  { %2132 = vmatpush.bf16.msra.mxu0 %v6692_v36  ;;  %v8419_v36 = vld [vmem:[#allocation5 + $0x274] sm:$0xf] }
 0x753   :  { %2133 = vmatpush.bf16.msra.mxu0 %v6684_v39  ;;  %v6576_v39 = vor.u32 %v8381_v34, %v6573_v35  ;;  %v8434_v34 = vld [vmem:[#allocation2 + $0x1a8] sm:$0xff]  ;;  %v8433_v35 = vld [vmem:[#allocation2 + $0x1a0] sm:$0xff] }
 0x7bb   :  { %v1448_v26 = vpop.f32.mrf.mxu0 }
 0x7bc   :  { %v1449_v45 = vadd.f32 %v8813_v42, %v1448_v26  ;;  %v6676_v42 = vor.u32 %v8408_v41, %v6675_v40  ;;  %v8406_v26 = vld [vmem:[#allocation5 + $0x204] sm:$0xf0]  ;;  %v6728_v40 = vor.u32 %v8419_v36, %v6725_v37  ;;  %v8428_v41 = vld [vmem:[#allocation8 + $0x2b8] sm:$0xff]  ;;  %v8432_v36 = vld [vmem:[#allocation2 + $0x198] sm:$0xff] }
 0x7bd   :  { %v8431_v37 = vld [vmem:[#allocation2 + $0x190] sm:$0xff] }
 0x7be   :  { %v1452_v46 = vadd.f32 %v1449_v45, %v1368_v44  ;;  %2134 = vmatpush.bf16.msra.mxu0 %v6676_v42  ;;  %v6668_v44 = vor.u32 %v8406_v26, %v6667_v43  ;;  %v6627_v45 = vld [vmem:[#allocation5 + $0x1f0] sm:$0xf]  ;;  %v9105_v42 = vld [vmem:[%s9187_s0] sm:$0xf]  ;;  %v8417_v43 = vld [vmem:[#allocation5 + $0x264] sm:$0xf] }
 0x7bf   :  { %v6717_v26 = vld [vmem:[#allocation5 + $0x268] sm:$0xf0] }
 0x7c0   :  { %v1453_v47 = vmul.f32 0.2, %v1452_v46 }
 0x7c2   :  { %v1454_v48 = vmax.f32 %v1452_v46, %v1453_v47  ;;  %2135 = vmatpush.bf16.msra.mxu0 %v6668_v44  ;;  %v8396_v46 = vld [vmem:[#allocation5 + $0x1f4] sm:$0xf0]  ;;  %v8395_v47 = vld [vmem:[#allocation5 + $0x1f4] sm:$0xf]  ;;  %v6720_v44 = vor.u32 %v8417_v43, %v6717_v26 }
 0x7c3   :  { %v1450_v49 = vpop.f32.mrf.mxu0 }
 0x7c4   :  { %v1455_v50 = vpack.c.bf16 %v1454_v48, %v1454_v48  ;;  %v6628_v48 = vor.u32 %v8396_v46, %v6627_v45  ;;  %v6629_v49 = vld [vmem:[#allocation5 + $0x1f8] sm:$0xf0]  ;;  %v8427_v45 = vld [vmem:[#allocation8 + $0x2b0] sm:$0xff]  ;;  %v8415_v46 = vld [vmem:[#allocation5 + $0x254] sm:$0xf] }
 0x7c5   :  { %v6632_v52 = vor.u32 %v8395_v47, %v6629_v49  ;;  %v6709_v47 = vld [vmem:[#allocation5 + $0x258] sm:$0xf0]  ;;  %v8426_v49 = vld [vmem:[#allocation8 + $0x2a8] sm:$0xff] }
 0x7c6   :  { %1534 = vmatmul.bf16.vlgmr.msra.gmra.mxu1 %v1455_v50  ;;  %v1542_v12 = vunpack.c.l.bf16 %v1455_v50  ;;  %v6619_v50 = vld [vmem:[#allocation5 + $0x1e0] sm:$0xf] }
 0x7c7   :  { %1908 = vmatpush.bf16.msrb.mxu1 %v6628_v48  ;;  %v6620_v55 = vor.u32 %v8394_v51, %v6619_v50  ;;  %1921 = vmatpush.bf16.msrb.mxu2 %v6632_v52  ;;  %v6712_v48 = vor.u32 %v8415_v46, %v6709_v47  ;;  %v8413_v50 = vld [vmem:[#allocation5 + $0x244] sm:$0xf]  ;;  %v6701_v51 = vld [vmem:[#allocation5 + $0x248] sm:$0xf0] }
 0x7c8   :  { %v6704_v52 = vor.u32 %v8413_v50, %v6701_v51  ;;  %v8818_v51 = vld [vmem:[#allocation10 + $0xa] ss:$0 sm:$0xff] }
 0x7cb   :  { %1909 = vmatpush.bf16.msrb.mxu1 %v6620_v55  ;;  %1922 = vmatpush.bf16.msrb.mxu2 %v6624_v57  ;;  %v6693_v55 = vld [vmem:[#allocation5 + $0x238] sm:$0xf0]  ;;  %v8424_v57 = vld [vmem:[#allocation8 + $0x298] sm:$0xff] }
 0x843   :  { %v1535_v59 = vpop.f32.mrf.mxu1 }
 0x844   :  { %v1536_v60 = vadd.f32 %v8814_v58, %v1535_v59  ;;  %v6611_v58 = vld [vmem:[#allocation5 + $0x1d0] sm:$0xf]  ;;  %v8392_v59 = vld [vmem:[#allocation5 + $0x1d4] sm:$0xf0] }
 0x846   :  { %v1539_v61 = vmul.f32 0.2, %v1536_v60 }
 0x848   :  { %v1540_v62 = vmax.f32 %v1536_v60, %v1539_v61  ;;  %v8391_v60 = vld [vmem:[#allocation5 + $0x1d4] sm:$0xf]  ;;  %v6613_v61 = vld [vmem:[#allocation5 + $0x1d8] sm:$0xf0] }
 0x849   :  { %v6616_v1 = vor.u32 %v8391_v60, %v6613_v61  ;;  %v8423_v61 = vld [vmem:[#allocation8 + $0x290] sm:$0xff] }
 0x84a   :  { %v1541_v63 = vpack.c.bf16 %v1540_v62, %v1540_v62 }
 0x84b   :  { %v1537_v0 = vpop.f32.mrf.mxu1  ;;  %1923 = vmatpush.bf16.msrb.mxu2 %v6616_v1  ;;  %v8422_v1 = vld [vmem:[#allocation8 + $0x288] sm:$0xff] }
 0x84c   :  { %1621 = vmatmul.bf16.vlgmr.msra.gmra.mxu2 %v1541_v63  ;;  %v6612_v63 = vor.u32 %v8392_v59, %v6611_v58  ;;  %v8409_v58 = vld [vmem:[#allocation5 + $0x224] sm:$0xf]  ;;  %v6685_v59 = vld [vmem:[#allocation5 + $0x228] sm:$0xf0] }
 0x84d   :  { %v6688_v60 = vor.u32 %v8409_v58, %v6685_v59 }
 0x84e   :  { %1910 = vmatpush.bf16.msrb.mxu1 %v6612_v63  ;;  %v6677_v63 = vld [vmem:[#allocation5 + $0x218] sm:$0xf0] }
 0x852   :  { %1911 = vmatpush.bf16.msrb.mxu1 %v6604_v7  ;;  %v8817_v7 = vld [vmem:[#allocation10 + $0x8] ss:$0 sm:$0xff] }
 0x8cf   :  { %v1622_v11 = vpop.f32.mrf.mxu2 }
 0x8d0   :  { %v1623_v13 = vadd.f32 %v8815_v9, %v1622_v11  ;;  %v6608_v9 = vor.u32 %v8389_v4, %v6605_v5  ;;  %v8388_v11 = vld [vmem:[#allocation5 + $0x1b4] sm:$0xf0]  ;;  %v6672_v4 = vor.u32 %v8405_v2, %v6669_v3  ;;  %v8439_v2 = vld [vmem:[#allocation8 + $0x2d0] sm:$0xff]  ;;  %v8438_v3 = vld [vmem:[#allocation8 + $0x2c8] sm:$0xff] }
 0x8d1   :  { %v6596_v16 = vor.u32 %v8388_v11, %v6595_v10  ;;  %v8421_v5 = vld [vmem:[#allocation8 + $0x280] sm:$0xff] }
 0x8d2   :  { %v1626_v15 = vadd.f32 %v1623_v13, %v1542_v12  ;;  %v8387_v12 = vld [vmem:[#allocation5 + $0x1b4] sm:$0xf]  ;;  %v6597_v13 = vld [vmem:[#allocation5 + $0x1b8] sm:$0xf0]  ;;  %1924 = vmatpush.bf16.msrb.mxu2 %v6608_v9 }
 0x8d3   :  { %v6600_v17 = vor.u32 %v8387_v12, %v6597_v13  ;;  %1912 = vmatpush.bf16.msrb.mxu1 %v6596_v16  ;;  %v8402_v12 = vld [vmem:[#allocation8 + $0x268] sm:$0xff] }
 0x8d4   :  { %v1627_v18 = vmul.f32 0.2, %v1626_v15 }
 0x8d6   :  { %v1628_v21 = vmax.f32 %v1626_v15, %v1627_v18  ;;  %v6587_v18 = vld [vmem:[#allocation5 + $0x1a0] sm:$0xf]  ;;  %1925 = vmatpush.bf16.msrb.mxu2 %v6600_v17 }
 0x8d7   :  { %v1624_v24 = vpop.f32.mrf.mxu2  ;;  %v6588_v22 = vor.u32 %v8386_v19, %v6587_v18  ;;  %v8400_v19 = vld [vmem:[#allocation8 + $0x258] sm:$0xff] }
 0x8d8   :  { %v9096_v25 = vpack.c.bf16 %v1628_v21, %v1628_v21  ;;  %v6589_v21 = vld [vmem:[#allocation5 + $0x1a8] sm:$0xf0]  ;;  %v6579_v24 = vld [vmem:[#allocation5 + $0x190] sm:$0xf] }
 0x8d9   :  { %v6592_v23 = vor.u32 %v8385_v20, %v6589_v21  ;;  %1913 = vmatpush.bf16.msrb.mxu1 %v6588_v22  ;;  %v6580_v30 = vor.u32 %v8384_v27, %v6579_v24  ;;  %v2042_v20 = vld [vmem:[#allocation7 + $0x8] sm:$0x3]  ;;  %v8398_v24 = vld [vmem:[#allocation8 + $0x248] sm:$0xff] }
 0x8da   :  { %1708 = vmatmul.bf16.vlgmr.msra.gmra.mxu3 %v9096_v25  ;;  %v1716_v10 = vunpack.c.l.bf16 %v9096_v25  ;;  %v2044_v21 = vperm.slane %v2042_v20, 0  ;;  %v8399_v22 = vld [vmem:[#allocation8 + $0x250] sm:$0xff]  ;;  %v2045_v50 = vperm.slane %v2042_v20, 1 }
 0x8db   :  { %1926 = vmatpush.bf16.msrb.mxu2 %v6592_v23 }
 0x8dd   :  { %1914 = vmatpush.bf16.msrb.mxu1 %v6580_v30 }
 0x8df   :  { %1927 = vmatpush.bf16.msrb.mxu2 %v6584_v31  ;;  %v8397_v31 = vld [vmem:[#allocation8 + $0x240] sm:$0xff] }
 0x8e1   :  { %1915 = vmatpush.bf16.msrb.mxu1 %v6572_v38  ;;  %v8430_v38 = vld [vmem:[#allocation2 + $0x188] sm:$0xff] }
 0x8e3   :  { %1928 = vmatpush.bf16.msrb.mxu2 %v6576_v39  ;;  %v1822_v39 = vld [vmem:[#allocation7 + $0x6] sm:$0x3] }
 0x8e5   :  { %2141 = vmatpush.bf16.msra.mxu1 %v6728_v40  ;;  %v8429_v40 = vld [vmem:[#allocation2 + $0x180] sm:$0xff] }
 0x8e7   :  { %2227 = vmatpush.bf16.msra.mxu2 %v8428_v41  ;;  %v1824_v41 = vperm.slane %v1822_v39, 0 }
 0x8e9   :  { %2142 = vmatpush.bf16.msra.mxu1 %v6720_v44 }
 0x8eb   :  { %2228 = vmatpush.bf16.msra.mxu2 %v8427_v45 }
 0x8ed   :  { %2143 = vmatpush.bf16.msra.mxu1 %v6712_v48 }
 0x8ef   :  { %2229 = vmatpush.bf16.msra.mxu2 %v8426_v49 }
 0x8f1   :  { %2144 = vmatpush.bf16.msra.mxu1 %v6704_v52 }
 0x8f3   :  { %2230 = vmatpush.bf16.msra.mxu2 %v8425_v53 }
 0x8f7   :  { %2231 = vmatpush.bf16.msra.mxu2 %v8424_v57 }
 0x8fb   :  { %2232 = vmatpush.bf16.msra.mxu2 %v8423_v61  ;;  %v8444_v61 = vld [vmem:[#allocation8 + $0x2f8] sm:$0xff] }
 0x8ff   :  { %2233 = vmatpush.bf16.msra.mxu2 %v8422_v1  ;;  %v8440_v1 = vld [vmem:[#allocation8 + $0x2d8] sm:$0xff] }
 0x903   :  { %2234 = vmatpush.bf16.msra.mxu2 %v8421_v5  ;;  %v1825_v5 = vperm.slane %v1822_v39, 1 }
 0x95d   :  { %v1709_v62 = vpop.f32.mrf.mxu3 }
 0x95e   :  { %v1710_v0 = vadd.f32 %v8816_v56, %v1709_v62  ;;  %v6696_v56 = vor.u32 %v8411_v54, %v6693_v55  ;;  %v8407_v62 = vld [vmem:[#allocation5 + $0x214] sm:$0xf] }
 0x960   :  { %v1713_v6 = vmul.f32 0.2, %v1710_v0  ;;  %2145 = vmatpush.bf16.msra.mxu1 %v6696_v56 }
 0x962   :  { %v1714_v8 = vmax.f32 %v1710_v0, %v1713_v6  ;;  %v6680_v0 = vor.u32 %v8407_v62, %v6677_v63  ;;  %v8404_v6 = vld [vmem:[#allocation8 + $0x278] sm:$0xff]  ;;  %v8443_v62 = vld [vmem:[#allocation8 + $0x2f0] sm:$0xff]  ;;  %v8442_v63 = vld [vmem:[#allocation8 + $0x2e8] sm:$0xff] }
 0x963   :  { %2007 = vmatpush.bf16.msrb.mxu3 %v8404_v6  ;;  %v8819_v6 = vld [vmem:[#allocation10 + $0x9] ss:$0 sm:$0xff] }
 0x964   :  { %v1715_v14 = vpack.c.bf16 %v1714_v8, %v1714_v8  ;;  %2146 = vmatpush.bf16.msra.mxu1 %v6688_v60  ;;  %v8403_v8 = vld [vmem:[#allocation8 + $0x270] sm:$0xff] }
 0x965   :  { %v1711_v15 = vpop.f32.mrf.mxu3 }
 0x966   :  { %1795 = vmatmul.bf16.vlgmr.msrb.gmra.mxu0 %v1715_v14  ;;  %v8401_v15 = vld [vmem:[#allocation8 + $0x260] sm:$0xff] }
 0x967   :  { %2008 = vmatpush.bf16.msrb.mxu3 %v8403_v8  ;;  %2401 = vmatpush.bf16.msrb.mxu0 %v8444_v61  ;;  %v8474_v61 = vld [vmem:[#allocation8 + $0x368] sm:$0xff] }
 0x968   :  { %2147 = vmatpush.bf16.msra.mxu1 %v6680_v0  ;;  %v8441_v0 = vld [vmem:[#allocation8 + $0x2e0] sm:$0xff] }
 0x96b   :  { %2009 = vmatpush.bf16.msrb.mxu3 %v8402_v12  ;;  %2402 = vmatpush.bf16.msrb.mxu0 %v8443_v62  ;;  %v8451_v12 = vld [vmem:[#allocation2 + $0x1f0] sm:$0xff]  ;;  %v8473_v62 = vld [vmem:[#allocation8 + $0x360] sm:$0xff] }
 0x96c   :  { %2148 = vmatpush.bf16.msra.mxu1 %v6672_v4  ;;  %v8437_v4 = vld [vmem:[#allocation8 + $0x2c0] sm:$0xff] }
 0x96f   :  { %2010 = vmatpush.bf16.msrb.mxu3 %v8401_v15  ;;  %2403 = vmatpush.bf16.msrb.mxu0 %v8442_v63  ;;  %v8449_v15 = vld [vmem:[#allocation2 + $0x1e0] sm:$0xff]  ;;  %v8472_v63 = vld [vmem:[#allocation8 + $0x358] sm:$0xff] }
 0x973   :  { %2011 = vmatpush.bf16.msrb.mxu3 %v8400_v19  ;;  %2404 = vmatpush.bf16.msrb.mxu0 %v8441_v0  ;;  %v8823_v0 = vld [vmem:[#allocation10 + $0xc] ss:$0 sm:$0xff] }
 0x976   :  { %2136 = vmatmul.bf16.vlgmr.msra.gmra.mxu0 %v9105_v42 }
 0x977   :  { %2012 = vmatpush.bf16.msrb.mxu3 %v8399_v22  ;;  %2405 = vmatpush.bf16.msrb.mxu0 %v8440_v1  ;;  %v8471_v1 = vld [vmem:[#allocation8 + $0x350] sm:$0xff] }
 0x97b   :  { %2013 = vmatpush.bf16.msrb.mxu3 %v8398_v24  ;;  %2406 = vmatpush.bf16.msrb.mxu0 %v8439_v2  ;;  %v8446_v24 = vld [vmem:[#allocation2 + $0x1c8] sm:$0xff] }
 0x97f   :  { %2014 = vmatpush.bf16.msrb.mxu3 %v8397_v31  ;;  %2407 = vmatpush.bf16.msrb.mxu0 %v8438_v3  ;;  %v8457_v31 = vld [vmem:[#allocation8 + $0x320] sm:$0xff] }
 0x983   :  { %2314 = vmatpush.bf16.msra.mxu3 %v8436_v32  ;;  %2408 = vmatpush.bf16.msrb.mxu0 %v8437_v4  ;;  %v8456_v32 = vld [vmem:[#allocation8 + $0x318] sm:$0xff] }
 0x987   :  { %2315 = vmatpush.bf16.msra.mxu3 %v8435_v33  ;;  %v8821_v33 = vld [vmem:[#allocation10 + $0xb] ss:$0 sm:$0xff] }
 0x98b   :  { %2316 = vmatpush.bf16.msra.mxu3 %v8434_v34  ;;  %v8455_v34 = vld [vmem:[#allocation8 + $0x310] sm:$0xff] }
 0x98f   :  { %2317 = vmatpush.bf16.msra.mxu3 %v8433_v35 }
 0x993   :  { %2318 = vmatpush.bf16.msra.mxu3 %v8432_v36 }
 0x997   :  { %2319 = vmatpush.bf16.msra.mxu3 %v8431_v37 }
 0x99b   :  { %2320 = vmatpush.bf16.msra.mxu3 %v8430_v38 }
 0x99f   :  { %2321 = vmatpush.bf16.msra.mxu3 %v8429_v40 }
 0x9e3   :  { %v1796_v9 = vpop.f32.mrf.mxu0 }
 0x9e4   :  { %v1797_v11 = vadd.f32 %v8817_v7, %v1796_v9 }
 0x9e6   :  { %v1800_v13 = vadd.f32 %v1797_v11, %v1716_v10  ;;  %v8452_v10 = vld [vmem:[#allocation2 + $0x1f8] sm:$0xff] }
 0x9e8   :  { %v1801_v14 = vmul.f32 0.2, %v1800_v13 }
 0x9ea   :  { %v1802_v16 = vmax.f32 %v1800_v13, %v1801_v14  ;;  %v8450_v13 = vld [vmem:[#allocation2 + $0x1e8] sm:$0xff] }
 0x9eb   :  { %v1798_v17 = vpop.f32.mrf.mxu0 }
 0x9ec   :  { %v1803_v18 = vpack.c.bf16 %v1802_v16, %v1802_v16  ;;  %v8448_v16 = vld [vmem:[#allocation2 + $0x1d8] sm:$0xff]  ;;  %v8820_v17 = vld [vmem:[%s9189_s2 + $0x6] ss:$0 sm:$0xff] }
 0x9ee   :  { %1916 = vmatmul.bf16.vlgmr.msrb.gmra.mxu1 %v1803_v18  ;;  %1929 = vmatmul.bf16.vlgmr.msrb.gmra.mxu2 %v1803_v18 }
 0x9ef   :  { %2488 = vmatpush.bf16.msrb.mxu1 %v8452_v10  ;;  %v8470_v10 = vld [vmem:[#allocation8 + $0x348] sm:$0xff] }
 0x9f3   :  { %v2137_v23 = vpop.f32.mrf.mxu0  ;;  %2489 = vmatpush.bf16.msrb.mxu1 %v8451_v12  ;;  %v8469_v12 = vld [vmem:[#allocation8 + $0x340] sm:$0xff] }
 0x9f4   :  { %v2138_v25 = vadd.f32 %v2137_v23, %v2044_v21 }
 0x9f6   :  { %v2154_v27 = vmul.f32 0.2, %v2138_v25 }
 0x9f7   :  { %2490 = vmatpush.bf16.msrb.mxu1 %v8450_v13  ;;  %v7014_v13 = vld [vmem:[#allocation5 + $0x2f0] sm:$0xf] }
 0x9f8   :  { %v2155_v28 = vmax.f32 %v2138_v25, %v2154_v27  ;;  %v8447_v25 = vld [vmem:[#allocation2 + $0x1d0] sm:$0xff]  ;;  %v8445_v27 = vld [vmem:[#allocation2 + $0x1c0] sm:$0xff] }
 0x9fa   :  { %v2156_v30 = vpack.c.bf16 %v2155_v28, %v2155_v28  ;;  %v8460_v28 = vld [vmem:[#allocation8 + $0x338] sm:$0xff] }
 0x9fb   :  { %v2139_v29 = vpop.f32.mrf.mxu0  ;;  %2491 = vmatpush.bf16.msrb.mxu1 %v8449_v15  ;;  %2575 = vmatpush.bf16.msrb.mxu2 %v8460_v28  ;;  %v8491_v15 = vld [vmem:[#allocation5 + $0x2f4] sm:$0xf] }
 0x9fc   :  { %v8459_v29 = vld [vmem:[#allocation8 + $0x330] sm:$0xff]  ;;  %v8487_v28 = vld [vmem:[#allocation5 + $0x2d4] sm:$0xf] }
 0x9fe   :  { %2149 = vmatmul.bf16.vlgmr.msra.gmra.mxu1 %v9105_v42  ;;  %2235 = vmatmul.bf16.vlgmr.msra.gmra.mxu2 %v2156_v30  ;;  %v8458_v30 = vld [vmem:[#allocation8 + $0x328] sm:$0xff] }
 0x9ff   :  { %2492 = vmatpush.bf16.msrb.mxu1 %v8448_v16  ;;  %2576 = vmatpush.bf16.msrb.mxu2 %v8459_v29  ;;  %v7000_v29 = vld [vmem:[#allocation5 + $0x2d8] sm:$0xf0] }
 0xa03   :  { %2493 = vmatpush.bf16.msrb.mxu1 %v8447_v25  ;;  %2577 = vmatpush.bf16.msrb.mxu2 %v8458_v30 }
 0xa07   :  { %2494 = vmatpush.bf16.msrb.mxu1 %v8446_v24  ;;  %2578 = vmatpush.bf16.msrb.mxu2 %v8457_v31  ;;  %v6998_v24 = vld [vmem:[#allocation5 + $0x2d0] sm:$0xf]  ;;  %v7003_v31 = vor.u32 %v8487_v28, %v7000_v29  ;;  %v7112_v28 = vld [vmem:[#allocation5 + $0x378] sm:$0xf0]  ;;  %v7102_v29 = vld [vmem:[#allocation5 + $0x360] sm:$0xf] }
 0xa0b   :  { %2495 = vmatpush.bf16.msrb.mxu1 %v8445_v27  ;;  %2579 = vmatpush.bf16.msrb.mxu2 %v8456_v32  ;;  %v8488_v27 = vld [vmem:[#allocation5 + $0x2d4] sm:$0xf0]  ;;  %v6990_v32 = vld [vmem:[#allocation5 + $0x2c0] sm:$0xf] }
 0xa0c   :  { %v6999_v30 = vor.u32 %v8488_v27, %v6998_v24  ;;  %v8515_v24 = vld [vmem:[#allocation5 + $0x374] sm:$0xf] }
 0xa0f   :  { %2580 = vmatpush.bf16.msrb.mxu2 %v8455_v34  ;;  %v8485_v34 = vld [vmem:[#allocation5 + $0x2c4] sm:$0xf] }
 0xa6b   :  { %v1917_v42 = vpop.f32.mrf.mxu1 }
 0xa6c   :  { %v1918_v43 = vadd.f32 %v1917_v42, %v1824_v41 }
 0xa6e   :  { %v1934_v26 = vmul.f32 0.2, %v1918_v43 }
 0xa70   :  { %v1935_v44 = vmax.f32 %v1918_v43, %v1934_v26  ;;  %v8454_v43 = vld [vmem:[#allocation8 + $0x308] sm:$0xff]  ;;  %v8453_v26 = vld [vmem:[#allocation8 + $0x300] sm:$0xff] }
 0xa71   :  { %v1930_v45 = vpop.f32.mrf.mxu2  ;;  %2581 = vmatpush.bf16.msrb.mxu2 %v8454_v43 }
 0xa72   :  { %v1936_v46 = vpack.c.bf16 %v1935_v44, %v1935_v44  ;;  %v1931_v8 = vadd.f32 %v1930_v45, %v1825_v5  ;;  %v8468_v44 = vld [vmem:[#allocation2 + $0x238] sm:$0xff]  ;;  %v8467_v45 = vld [vmem:[#allocation2 + $0x230] sm:$0xff] }
 0xa73   :  { %v1919_v47 = vpop.f32.mrf.mxu1 }
 0xa74   :  { %2015 = vmatmul.bf16.vlgmr.msrb.gmra.mxu3 %v1936_v46  ;;  %v8466_v46 = vld [vmem:[#allocation2 + $0x228] sm:$0xff]  ;;  %v8465_v47 = vld [vmem:[#allocation2 + $0x220] sm:$0xff] }
 0xa75   :  { %2582 = vmatpush.bf16.msrb.mxu2 %v8453_v26  ;;  %2662 = vmatpush.bf16.msrb.mxu3 %v8468_v44  ;;  %v8824_v26 = vld [vmem:[%s9189_s2 + $0x8] ss:$0 sm:$0xff] }
 0xa79   :  { %v1932_v48 = vpop.f32.mrf.mxu2  ;;  %2663 = vmatpush.bf16.msrb.mxu3 %v8467_v45 }
 0xa7a   :  { %v8464_v48 = vld [vmem:[#allocation2 + $0x218] sm:$0xff] }
 0xa7b   :  { %v2150_v49 = vpop.f32.mrf.mxu1 }
 0xa7c   :  { %v2151_v52 = vadd.f32 %v2150_v49, %v2045_v50  ;;  %v8822_v49 = vld [vmem:[%s9189_s2 + $0x7] ss:$0 sm:$0xff] }
 0xa7d   :  { %2664 = vmatpush.bf16.msrb.mxu3 %v8466_v46 }
 0xa81   :  { %v2236_v53 = vpop.f32.mrf.mxu2  ;;  %2665 = vmatpush.bf16.msrb.mxu3 %v8465_v47 }
 0xa82   :  { %v2237_v54 = vadd.f32 %v8818_v51, %v2236_v53 }
 0xa83   :  { %v2152_v55 = vpop.f32.mrf.mxu1 }
 0xa84   :  { %v2240_v56 = vadd.f32 %v2237_v54, %v2151_v52 }
 0xa85   :  { %2666 = vmatpush.bf16.msrb.mxu3 %v8464_v48 }
 0xa86   :  { %v2241_v57 = vmul.f32 0.2, %v2240_v56 }
 0xa88   :  { %v2242_v58 = vmax.f32 %v2240_v56, %v2241_v57  ;;  %v8463_v56 = vld [vmem:[#allocation2 + $0x210] sm:$0xff]  ;;  %v8462_v57 = vld [vmem:[#allocation2 + $0x208] sm:$0xff] }
 0xa89   :  { %v2238_v59 = vpop.f32.mrf.mxu2  ;;  %2667 = vmatpush.bf16.msrb.mxu3 %v8463_v56  ;;  %v6966_v56 = vld [vmem:[#allocation5 + $0x290] sm:$0xf] }
 0xa8a   :  { %v9110_v60 = vpack.c.bf16 %v2242_v58, %v2242_v58  ;;  %v8461_v58 = vld [vmem:[#allocation2 + $0x200] sm:$0xff]  ;;  %v8476_v59 = vld [vmem:[#allocation8 + $0x378] sm:$0xff] }
 0xa8b   :  { %2749 = vmatpush.bf16.msra.mxu0 %v8476_v59 }
 0xa8c   :  { %2322 = vmatmul.bf16.vlgmr.msra.gmra.mxu3 %v9110_v60  ;;  %v2330_v36 = vunpack.c.l.bf16 %v9110_v60  ;;  %v8475_v60 = vld [vmem:[#allocation8 + $0x370] sm:$0xff] }
 0xa8d   :  { %2668 = vmatpush.bf16.msrb.mxu3 %v8462_v57  ;;  %v8480_v57 = vld [vmem:[#allocation5 + $0x294] sm:$0xf0] }
 0xa8e   :  { %v6967_v59 = vor.u32 %v8480_v57, %v6966_v56 }
 0xa8f   :  { %2750 = vmatpush.bf16.msra.mxu0 %v8475_v60  ;;  %v6968_v60 = vld [vmem:[#allocation5 + $0x298] sm:$0xf0] }
 0xa91   :  { %2669 = vmatpush.bf16.msrb.mxu3 %v8461_v58  ;;  %v8479_v58 = vld [vmem:[#allocation5 + $0x294] sm:$0xf] }
 0xa93   :  { %2751 = vmatpush.bf16.msra.mxu0 %v8474_v61  ;;  %v6971_v61 = vor.u32 %v8479_v58, %v6968_v60 }
 0xa97   :  { %2752 = vmatpush.bf16.msra.mxu0 %v8473_v62  ;;  %v6958_v62 = vld [vmem:[#allocation5 + $0x280] sm:$0xf] }
 0xa9b   :  { %2753 = vmatpush.bf16.msra.mxu0 %v8472_v63  ;;  %v8478_v63 = vld [vmem:[#allocation5 + $0x284] sm:$0xf0] }
 0xa9f   :  { %2754 = vmatpush.bf16.msra.mxu0 %v8471_v1  ;;  %v6959_v1 = vor.u32 %v8478_v63, %v6958_v62  ;;  %v7070_v62 = vld [vmem:[#allocation5 + $0x320] sm:$0xf]  ;;  %v8506_v63 = vld [vmem:[#allocation5 + $0x324] sm:$0xf0] }
 0xaa3   :  { %2755 = vmatpush.bf16.msra.mxu0 %v8470_v10  ;;  %v8825_v10 = vld [vmem:[#allocation10 + $0xd] ss:$0 sm:$0xff] }
 0xaa7   :  { %2756 = vmatpush.bf16.msra.mxu0 %v8469_v12  ;;  %v8495_v12 = vld [vmem:[#allocation8 + $0x390] sm:$0xff] }
 0xaf7   :  { %v2016_v7 = vpop.f32.mrf.mxu3 }
 0xaf8   :  { %v2017_v9 = vadd.f32 %v8819_v6, %v2016_v7 }
 0xafa   :  { %v9113_v11 = vadd.f32 %v2017_v9, %v1931_v8 }
 0xaff   :  { %v2018_v14 = vpop.f32.mrf.mxu3 }
 0xb00   :  { %v8492_v14 = vld [vmem:[#allocation5 + $0x2f4] sm:$0xf0] }
 0xb01   :  { %v7015_v16 = vor.u32 %v8492_v14, %v7014_v13 }
 0xb03   :  { %2870 = vmatpush.bf16.msra.mxu1 %v7015_v16 }
 0xb0f   :  { %v2323_v18 = vpop.f32.mrf.mxu3 }
 0xb10   :  { %v2324_v19 = vadd.f32 %v8820_v17, %v2323_v18  ;;  %v7016_v17 = vld [vmem:[#allocation5 + $0x2f8] sm:$0xf0]  ;;  %v7006_v18 = vld [vmem:[#allocation5 + $0x2e0] sm:$0xf] }
 0xb12   :  { %v2327_v20 = vmul.f32 0.2, %v2324_v19 }
 0xb14   :  { %v2328_v21 = vmax.f32 %v2324_v19, %v2327_v20  ;;  %v8490_v19 = vld [vmem:[#allocation5 + $0x2e4] sm:$0xf0]  ;;  %v7019_v20 = vor.u32 %v8491_v15, %v7016_v17 }
 0xb16   :  { %v2329_v22 = vpack.c.bf16 %v2328_v21, %v2328_v21  ;;  %v8489_v21 = vld [vmem:[#allocation5 + $0x2e4] sm:$0xf]  ;;  %2883 = vmatpush.bf16.msra.mxu2 %v7019_v20 }
 0xb17   :  { %v2325_v23 = vpop.f32.mrf.mxu3 }
 0xb18   :  { %2409 = vmatmul.bf16.vlgmr.msrb.gmra.mxu0 %v2329_v22  ;;  %v7008_v22 = vld [vmem:[#allocation5 + $0x2e8] sm:$0xf0]  ;;  %v7007_v23 = vor.u32 %v8490_v19, %v7006_v18 }
 0xb19   :  { %v7011_v25 = vor.u32 %v8489_v21, %v7008_v22  ;;  %v8494_v21 = vld [vmem:[#allocation8 + $0x388] sm:$0xff]  ;;  %v8493_v22 = vld [vmem:[#allocation8 + $0x380] sm:$0xff] }
 0xb1a   :  { %2871 = vmatpush.bf16.msra.mxu1 %v7007_v23  ;;  %v7110_v23 = vld [vmem:[#allocation5 + $0x370] sm:$0xf] }
 0xb1b   :  { %2884 = vmatpush.bf16.msra.mxu2 %v7011_v25  ;;  %v8516_v25 = vld [vmem:[#allocation5 + $0x374] sm:$0xf0] }
 0xb1c   :  { %v7111_v27 = vor.u32 %v8516_v25, %v7110_v23  ;;  %v8826_v25 = vld [vmem:[#allocation10 + $0xe] ss:$0 sm:$0xff] }
 0xb1e   :  { %2872 = vmatpush.bf16.msra.mxu1 %v6999_v30  ;;  %v7115_v30 = vor.u32 %v8515_v24, %v7112_v28  ;;  %3090 = vmatpush.bf16.msrb.mxu0 %v7111_v27  ;;  %v8519_v24 = vld [vmem:[#allocation8 + $0x3d0] sm:$0xff] }
 0xb1f   :  { %2885 = vmatpush.bf16.msra.mxu2 %v7003_v31  ;;  %v8513_v31 = vld [vmem:[#allocation5 + $0x364] sm:$0xf] }
 0xb95   :  { %v2410_v35 = vpop.f32.mrf.mxu0 }
 0xb96   :  { %v2411_v37 = vadd.f32 %v8821_v33, %v2410_v35  ;;  %v8486_v33 = vld [vmem:[#allocation5 + $0x2c4] sm:$0xf0]  ;;  %v6992_v35 = vld [vmem:[#allocation5 + $0x2c8] sm:$0xf0] }
 0xb98   :  { %v2414_v38 = vadd.f32 %v2411_v37, %v2330_v36  ;;  %v6991_v36 = vor.u32 %v8486_v33, %v6990_v32  ;;  %v6995_v37 = vor.u32 %v8485_v34, %v6992_v35  ;;  %v7104_v32 = vld [vmem:[#allocation5 + $0x368] sm:$0xf0]  ;;  %v7094_v35 = vld [vmem:[#allocation5 + $0x350] sm:$0xf] }
 0xb99   :  { %v7107_v34 = vor.u32 %v8513_v31, %v7104_v32 }
 0xb9a   :  { %v2415_v39 = vmul.f32 0.2, %v2414_v38  ;;  %2873 = vmatpush.bf16.msra.mxu1 %v6991_v36  ;;  %2886 = vmatpush.bf16.msra.mxu2 %v6995_v37  ;;  %v8512_v36 = vld [vmem:[#allocation5 + $0x354] sm:$0xf0]  ;;  %v8511_v37 = vld [vmem:[#allocation5 + $0x354] sm:$0xf] }
 0xb9c   :  { %v2416_v40 = vmax.f32 %v2414_v38, %v2415_v39  ;;  %v6982_v38 = vld [vmem:[#allocation5 + $0x2b0] sm:$0xf]  ;;  %v8484_v39 = vld [vmem:[#allocation5 + $0x2b4] sm:$0xf0] }
 0xb9d   :  { %v2412_v41 = vpop.f32.mrf.mxu0 }
 0xb9e   :  { %v2417_v42 = vpack.c.bf16 %v2416_v40, %v2416_v40  ;;  %v8483_v40 = vld [vmem:[#allocation5 + $0x2b4] sm:$0xf]  ;;  %v6984_v41 = vld [vmem:[#allocation5 + $0x2b8] sm:$0xf0] }
 0xb9f   :  { %v6987_v43 = vor.u32 %v8483_v40, %v6984_v41  ;;  %v7086_v41 = vld [vmem:[#allocation5 + $0x340] sm:$0xf] }
 0xba0   :  { %2496 = vmatmul.bf16.vlgmr.msrb.gmra.mxu1 %v2417_v42  ;;  %v2504_v3 = vunpack.c.l.bf16 %v2417_v42  ;;  %v6983_v42 = vor.u32 %v8484_v39, %v6982_v38  ;;  %v7096_v38 = vld [vmem:[#allocation5 + $0x358] sm:$0xf0]  ;;  %v7095_v39 = vor.u32 %v8512_v36, %v7094_v35 }
 0xba1   :  { %2887 = vmatpush.bf16.msra.mxu2 %v6987_v43  ;;  %v7099_v40 = vor.u32 %v8511_v37, %v7096_v38  ;;  %v8509_v43 = vld [vmem:[#allocation5 + $0x344] sm:$0xf]  ;;  %v8517_v35 = vld [vmem:[#allocation8 + $0x3c0] sm:$0xff]  ;;  %v8531_v37 = vld [vmem:[#allocation2 + $0x270] sm:$0xff] }
 0xba2   :  { %2874 = vmatpush.bf16.msra.mxu1 %v6983_v42  ;;  %v8510_v42 = vld [vmem:[#allocation5 + $0x344] sm:$0xf0]  ;;  %v8532_v36 = vld [vmem:[#allocation2 + $0x278] sm:$0xff] }
 0xba3   :  { %v8530_v38 = vld [vmem:[#allocation2 + $0x268] sm:$0xff] }
 0xc1d   :  { %v2497_v50 = vpop.f32.mrf.mxu1 }
 0xc1e   :  { %v2498_v51 = vadd.f32 %v8822_v49, %v2497_v50  ;;  %v6974_v50 = vld [vmem:[#allocation5 + $0x2a0] sm:$0xf] }
 0xc20   :  { %v2501_v52 = vmul.f32 0.2, %v2498_v51 }
 0xc22   :  { %v2502_v53 = vmax.f32 %v2498_v51, %v2501_v52  ;;  %v8482_v51 = vld [vmem:[#allocation5 + $0x2a4] sm:$0xf0]  ;;  %v8481_v52 = vld [vmem:[#allocation5 + $0x2a4] sm:$0xf] }
 0xc24   :  { %v2503_v54 = vpack.c.bf16 %v2502_v53, %v2502_v53  ;;  %v6975_v53 = vor.u32 %v8482_v51, %v6974_v50  ;;  %v7080_v50 = vld [vmem:[#allocation5 + $0x338] sm:$0xf0] }
 0xc25   :  { %v2499_v55 = vpop.f32.mrf.mxu1 }
 0xc26   :  { %2583 = vmatmul.bf16.vlgmr.msrb.gmra.mxu2 %v2503_v54  ;;  %v6976_v54 = vld [vmem:[#allocation5 + $0x2a8] sm:$0xf0]  ;;  %2875 = vmatpush.bf16.msra.mxu1 %v6975_v53 }
 0xc27   :  { %v6979_v55 = vor.u32 %v8481_v52, %v6976_v54 }
 0xc29   :  { %2888 = vmatpush.bf16.msra.mxu2 %v6979_v55 }
 0xc2a   :  { %2876 = vmatpush.bf16.msra.mxu1 %v6967_v59 }
 0xc2d   :  { %2889 = vmatpush.bf16.msra.mxu2 %v6971_v61 }
 0xc2e   :  { %2877 = vmatpush.bf16.msra.mxu1 %v6959_v1  ;;  %v7071_v1 = vor.u32 %v8506_v63, %v7070_v62 }
 0xc32   :  { %3103 = vmatpush.bf16.msrb.mxu1 %v7115_v30 }
 0xc36   :  { %3104 = vmatpush.bf16.msrb.mxu1 %v7107_v34  ;;  %v8518_v34 = vld [vmem:[#allocation8 + $0x3c8] sm:$0xff] }
 0xc3a   :  { %3105 = vmatpush.bf16.msrb.mxu1 %v7099_v40  ;;  %v8528_v40 = vld [vmem:[#allocation2 + $0x258] sm:$0xff] }
 0xca9   :  { %v2584_v2 = vpop.f32.mrf.mxu2 }
 0xcaa   :  { %v2585_v4 = vadd.f32 %v8823_v0, %v2584_v2  ;;  %v8477_v0 = vld [vmem:[#allocation5 + $0x284] sm:$0xf]  ;;  %v6960_v2 = vld [vmem:[#allocation5 + $0x288] sm:$0xf0] }
 0xcac   :  { %v2588_v5 = vadd.f32 %v2585_v4, %v2504_v3  ;;  %v6963_v3 = vor.u32 %v8477_v0, %v6960_v2  ;;  %v8500_v4 = vld [vmem:[#allocation8 + $0x3b8] sm:$0xff]  ;;  %v8505_v0 = vld [vmem:[#allocation5 + $0x324] sm:$0xf]  ;;  %v7072_v2 = vld [vmem:[#allocation5 + $0x328] sm:$0xf0] }
 0xcad   :  { %2969 = vmatpush.bf16.msra.mxu3 %v8500_v4  ;;  %v7062_v4 = vld [vmem:[#allocation5 + $0x310] sm:$0xf] }
 0xcae   :  { %v2589_v6 = vmul.f32 0.2, %v2588_v5  ;;  %2890 = vmatpush.bf16.msra.mxu2 %v6963_v3  ;;  %v7075_v3 = vor.u32 %v8505_v0, %v7072_v2 }
 0xcb0   :  { %v2590_v7 = vmax.f32 %v2588_v5, %v2589_v6  ;;  %v8499_v5 = vld [vmem:[#allocation8 + $0x3b0] sm:$0xff]  ;;  %v8498_v6 = vld [vmem:[#allocation8 + $0x3a8] sm:$0xff] }
 0xcb1   :  { %v2586_v8 = vpop.f32.mrf.mxu2  ;;  %2970 = vmatpush.bf16.msra.mxu3 %v8499_v5  ;;  %v8504_v5 = vld [vmem:[#allocation5 + $0x314] sm:$0xf0] }
 0xcb2   :  { %v9122_v9 = vpack.c.bf16 %v2590_v7, %v2590_v7  ;;  %v8497_v7 = vld [vmem:[#allocation8 + $0x3a0] sm:$0xff]  ;;  %v8496_v8 = vld [vmem:[#allocation8 + $0x398] sm:$0xff] }
 0xcb4   :  { %2670 = vmatmul.bf16.vlgmr.msrb.gmra.mxu3 %v9122_v9  ;;  %v2678_v14 = vunpack.c.l.bf16 %v9122_v9  ;;  %v8514_v9 = vld [vmem:[#allocation5 + $0x364] sm:$0xf0] }
 0xcb5   :  { %2971 = vmatpush.bf16.msra.mxu3 %v8498_v6  ;;  %v7103_v33 = vor.u32 %v8514_v9, %v7102_v29  ;;  %v8503_v6 = vld [vmem:[#allocation5 + $0x314] sm:$0xf] }
 0xcb7   :  { %3091 = vmatpush.bf16.msrb.mxu0 %v7103_v33 }
 0xcb9   :  { %2972 = vmatpush.bf16.msra.mxu3 %v8497_v7  ;;  %v7063_v7 = vor.u32 %v8504_v5, %v7062_v4  ;;  %v8534_v5 = vld [vmem:[#allocation8 + $0x408] sm:$0xff] }
 0xcbb   :  { %3092 = vmatpush.bf16.msrb.mxu0 %v7095_v39  ;;  %v8529_v39 = vld [vmem:[#allocation2 + $0x260] sm:$0xff] }
 0xcbd   :  { %2973 = vmatpush.bf16.msra.mxu3 %v8496_v8  ;;  %v7064_v8 = vld [vmem:[#allocation5 + $0x318] sm:$0xf0] }
 0xcc1   :  { %2974 = vmatpush.bf16.msra.mxu3 %v8495_v12  ;;  %v7054_v12 = vld [vmem:[#allocation5 + $0x300] sm:$0xf] }
 0xcc5   :  { %2975 = vmatpush.bf16.msra.mxu3 %v8494_v21  ;;  %v8521_v21 = vld [vmem:[#allocation8 + $0x3e0] sm:$0xff] }
 0xcc9   :  { %2976 = vmatpush.bf16.msra.mxu3 %v8493_v22  ;;  %v8520_v22 = vld [vmem:[#allocation8 + $0x3d8] sm:$0xff] }
 0xccd   :  { %3276 = vmatpush.bf16.msrb.mxu3 %v8532_v36 }
 0xcd1   :  { %3277 = vmatpush.bf16.msrb.mxu3 %v8531_v37 }
 0xcd5   :  { %3278 = vmatpush.bf16.msrb.mxu3 %v8530_v38 }
 0xcd9   :  { %3279 = vmatpush.bf16.msrb.mxu3 %v8529_v39  ;;  %v8550_v39 = vld [vmem:[#allocation8 + $0x448] sm:$0xff] }
 0xcdd   :  { %3280 = vmatpush.bf16.msrb.mxu3 %v8528_v40  ;;  %v8549_v40 = vld [vmem:[#allocation8 + $0x440] sm:$0xff] }
 0xd37   :  { %v2671_v44 = vpop.f32.mrf.mxu3 }
 0xd38   :  { %v2672_v45 = vadd.f32 %v8824_v26, %v2671_v44  ;;  %v7088_v26 = vld [vmem:[#allocation5 + $0x348] sm:$0xf0]  ;;  %v7087_v44 = vor.u32 %v8510_v42, %v7086_v41 }
 0xd39   :  { %v3004_v41 = vld [vmem:[#allocation7 + $0xc] sm:$0x3] }
 0xd3a   :  { %v2675_v46 = vmul.f32 0.2, %v2672_v45  ;;  %3093 = vmatpush.bf16.msrb.mxu0 %v7087_v44  ;;  %v3006_v42 = vperm.slane %v3004_v41, 0 }
 0xd3c   :  { %v2676_v47 = vmax.f32 %v2672_v45, %v2675_v46  ;;  %v2784_v45 = vld [vmem:[#allocation7 + $0xa] sm:$0x3]  ;;  %v7091_v46 = vor.u32 %v8509_v43, %v7088_v26 }
 0xd3d   :  { %v2786_v51 = vperm.slane %v2784_v45, 0  ;;  %v2787_v23 = vperm.slane %v2784_v45, 1 }
 0xd3e   :  { %v2677_v48 = vpack.c.bf16 %v2676_v47, %v2676_v47  ;;  %v7078_v47 = vld [vmem:[#allocation5 + $0x330] sm:$0xf]  ;;  %3106 = vmatpush.bf16.msrb.mxu1 %v7091_v46 }
 0xd3f   :  { %v2673_v49 = vpop.f32.mrf.mxu3 }
 0xd40   :  { %2757 = vmatmul.bf16.vlgmr.msra.gmra.mxu0 %v2677_v48  ;;  %v8508_v48 = vld [vmem:[#allocation5 + $0x334] sm:$0xf0]  ;;  %v8507_v49 = vld [vmem:[#allocation5 + $0x334] sm:$0xf] }
 0xd41   :  { %v7079_v52 = vor.u32 %v8508_v48, %v7078_v47  ;;  %v7083_v53 = vor.u32 %v8507_v49, %v7080_v50  ;;  %v8527_v50 = vld [vmem:[#allocation2 + $0x250] sm:$0xff] }
 0xd42   :  { %3281 = vmatpush.bf16.msrb.mxu3 %v8527_v50 }
 0xd43   :  { %3094 = vmatpush.bf16.msrb.mxu0 %v7079_v52  ;;  %3107 = vmatpush.bf16.msrb.mxu1 %v7083_v53  ;;  %v8525_v52 = vld [vmem:[#allocation2 + $0x240] sm:$0xff]  ;;  %v8540_v53 = vld [vmem:[#allocation8 + $0x438] sm:$0xff] }
 0xd47   :  { %3095 = vmatpush.bf16.msrb.mxu0 %v7071_v1  ;;  %3108 = vmatpush.bf16.msrb.mxu1 %v7075_v3 }
 0xd4b   :  { %3096 = vmatpush.bf16.msrb.mxu0 %v7063_v7  ;;  %v8548_v7 = vld [vmem:[#allocation2 + $0x2b8] sm:$0xff] }
 0xdbd   :  { %v2758_v13 = vpop.f32.mrf.mxu0 }
 0xdbe   :  { %v2759_v15 = vadd.f32 %v8825_v10, %v2758_v13  ;;  %v7067_v10 = vor.u32 %v8503_v6, %v7064_v8  ;;  %v8502_v13 = vld [vmem:[#allocation5 + $0x304] sm:$0xf0]  ;;  %v8533_v6 = vld [vmem:[#allocation8 + $0x400] sm:$0xff]  ;;  %v8547_v8 = vld [vmem:[#allocation2 + $0x2b0] sm:$0xff] }
 0xdc0   :  { %v2762_v16 = vadd.f32 %v2759_v15, %v2678_v14  ;;  %3109 = vmatpush.bf16.msrb.mxu1 %v7067_v10  ;;  %v8501_v14 = vld [vmem:[#allocation5 + $0x304] sm:$0xf]  ;;  %v7055_v15 = vor.u32 %v8502_v13, %v7054_v12  ;;  %v8546_v10 = vld [vmem:[#allocation2 + $0x2a8] sm:$0xff]  ;;  %v8544_v13 = vld [vmem:[#allocation2 + $0x298] sm:$0xff] }
 0xdc1   :  { %v8545_v12 = vld [vmem:[#allocation2 + $0x2a0] sm:$0xff] }
 0xdc2   :  { %v2763_v17 = vmul.f32 0.2, %v2762_v16  ;;  %3097 = vmatpush.bf16.msrb.mxu0 %v7055_v15 }
 0xdc4   :  { %v2764_v18 = vmax.f32 %v2762_v16, %v2763_v17  ;;  %v7056_v16 = vld [vmem:[#allocation5 + $0x308] sm:$0xf0] }
 0xdc5   :  { %v2760_v19 = vpop.f32.mrf.mxu0  ;;  %v7059_v17 = vor.u32 %v8501_v14, %v7056_v16  ;;  %v8828_v14 = vld [vmem:[%s9189_s2 + $0x9] ss:$0 sm:$0xff] }
 0xdc6   :  { %v2765_v20 = vpack.c.bf16 %v2764_v18, %v2764_v18  ;;  %v8524_v18 = vld [vmem:[#allocation8 + $0x3f8] sm:$0xff]  ;;  %v8523_v19 = vld [vmem:[#allocation8 + $0x3f0] sm:$0xff]  ;;  %3363 = vmatpush.bf16.msra.mxu0 %v8540_v53 }
 0xdc7   :  { %3110 = vmatpush.bf16.msrb.mxu1 %v7059_v17  ;;  %3189 = vmatpush.bf16.msrb.mxu2 %v8524_v18  ;;  %v8558_v53 = vld [vmem:[#allocation2 + $0x2c8] sm:$0xff] }
 0xdc8   :  { %2878 = vmatmul.bf16.vlgmr.msra.gmra.mxu1 %v2765_v20  ;;  %2891 = vmatmul.bf16.vlgmr.msra.gmra.mxu2 %v2765_v20  ;;  %v8522_v20 = vld [vmem:[#allocation8 + $0x3e8] sm:$0xff] }
 0xdcb   :  { %3190 = vmatpush.bf16.msrb.mxu2 %v8523_v19  ;;  %3450 = vmatpush.bf16.msra.mxu1 %v8548_v7 }
 0xdcf   :  { %3191 = vmatpush.bf16.msrb.mxu2 %v8522_v20  ;;  %3451 = vmatpush.bf16.msra.mxu1 %v8547_v8 }
 0xdd3   :  { %3192 = vmatpush.bf16.msrb.mxu2 %v8521_v21  ;;  %3452 = vmatpush.bf16.msra.mxu1 %v8546_v10  ;;  %v8543_v21 = vld [vmem:[#allocation2 + $0x290] sm:$0xff]  ;;  %v7489_v10 = vld [vmem:[#allocation5 + $0x460] sm:$0xf] }
 0xdd7   :  { %3193 = vmatpush.bf16.msrb.mxu2 %v8520_v22  ;;  %3453 = vmatpush.bf16.msra.mxu1 %v8545_v12  ;;  %v8542_v22 = vld [vmem:[#allocation2 + $0x288] sm:$0xff] }
 0xdd8   :  { %v8610_v12 = vld [vmem:[#allocation5 + $0x464] sm:$0xf0] }
 0xddb   :  { %3194 = vmatpush.bf16.msrb.mxu2 %v8519_v24  ;;  %3454 = vmatpush.bf16.msra.mxu1 %v8544_v13  ;;  %v8555_v24 = vld [vmem:[#allocation8 + $0x470] sm:$0xff] }
 0xddf   :  { %3195 = vmatpush.bf16.msrb.mxu2 %v8518_v34  ;;  %3455 = vmatpush.bf16.msra.mxu1 %v8543_v21 }
 0xde3   :  { %3196 = vmatpush.bf16.msrb.mxu2 %v8517_v35  ;;  %3456 = vmatpush.bf16.msra.mxu1 %v8542_v22  ;;  %v7465_v22 = vld [vmem:[#allocation5 + $0x430] sm:$0xf] }
 0xe45   :  { %v2879_v54 = vpop.f32.mrf.mxu1 }
 0xe46   :  { %v2880_v55 = vadd.f32 %v2879_v54, %v2786_v51  ;;  %v8526_v51 = vld [vmem:[#allocation2 + $0x248] sm:$0xff] }
 0xe47   :  { %3282 = vmatpush.bf16.msrb.mxu3 %v8526_v51  ;;  %v8539_v54 = vld [vmem:[#allocation8 + $0x430] sm:$0xff] }
 0xe48   :  { %v2896_v56 = vmul.f32 0.2, %v2880_v55  ;;  %3364 = vmatpush.bf16.msra.mxu0 %v8539_v54  ;;  %v8557_v54 = vld [vmem:[#allocation2 + $0x2c0] sm:$0xff] }
 0xe4a   :  { %v2897_v57 = vmax.f32 %v2880_v55, %v2896_v56  ;;  %v8538_v55 = vld [vmem:[#allocation8 + $0x428] sm:$0xff]  ;;  %v8537_v56 = vld [vmem:[#allocation8 + $0x420] sm:$0xff] }
 0xe4b   :  { %v2892_v58 = vpop.f32.mrf.mxu2  ;;  %3283 = vmatpush.bf16.msrb.mxu3 %v8525_v52  ;;  %v8559_v52 = vld [vmem:[#allocation2 + $0x2d0] sm:$0xff] }
 0xe4c   :  { %v2898_v59 = vpack.c.bf16 %v2897_v57, %v2897_v57  ;;  %v2893_v28 = vadd.f32 %v2892_v58, %v2787_v23  ;;  %3365 = vmatpush.bf16.msra.mxu0 %v8538_v55  ;;  %v8536_v57 = vld [vmem:[#allocation8 + $0x418] sm:$0xff]  ;;  %v3007_v58 = vperm.slane %v3004_v41, 1  ;;  %v8541_v23 = vld [vmem:[#allocation2 + $0x280] sm:$0xff]  ;;  %v8564_v41 = vld [vmem:[#allocation2 + $0x2f8] sm:$0xff] }
 0xe4d   :  { %v2881_v60 = vpop.f32.mrf.mxu1  ;;  %3457 = vmatpush.bf16.msra.mxu1 %v8541_v23  ;;  %v8572_v55 = vld [vmem:[#allocation8 + $0x4b8] sm:$0xff]  ;;  %v8604_v23 = vld [vmem:[#allocation5 + $0x434] sm:$0xf0] }
 0xe4e   :  { %2977 = vmatmul.bf16.vlgmr.msra.gmra.mxu3 %v2898_v59  ;;  %v8827_v59 = vld [vmem:[#allocation10 + $0xf] ss:$0 sm:$0xff]  ;;  %v8535_v60 = vld [vmem:[#allocation8 + $0x410] sm:$0xff] }
 0xe4f   :  { %3624 = vmatpush.bf16.msra.mxu3 %v8564_v41 }
 0xe50   :  { %3366 = vmatpush.bf16.msra.mxu0 %v8537_v56  ;;  %v8571_v56 = vld [vmem:[#allocation8 + $0x4b0] sm:$0xff] }
 0xe53   :  { %v2894_v61 = vpop.f32.mrf.mxu2 }
 0xe54   :  { %3367 = vmatpush.bf16.msra.mxu0 %v8536_v57  ;;  %v8570_v57 = vld [vmem:[#allocation8 + $0x4a8] sm:$0xff] }
 0xe58   :  { %3368 = vmatpush.bf16.msra.mxu0 %v8535_v60  ;;  %v8831_v60 = vld [vmem:[#allocation10 + $0x11] ss:$0 sm:$0xff] }
 0xe5c   :  { %3369 = vmatpush.bf16.msra.mxu0 %v8534_v5 }
 0xe60   :  { %3370 = vmatpush.bf16.msra.mxu0 %v8533_v6  ;;  %v8565_v6 = vld [vmem:[#allocation8 + $0x480] sm:$0xff] }
 0xed1   :  { %v2978_v27 = vpop.f32.mrf.mxu3 }
 0xed2   :  { %v2979_v29 = vadd.f32 %v8826_v25, %v2978_v27  ;;  %v8556_v25 = vld [vmem:[#allocation8 + $0x478] sm:$0xff]  ;;  %v8554_v27 = vld [vmem:[#allocation8 + $0x468] sm:$0xff] }
 0xed3   :  { %3537 = vmatpush.bf16.msra.mxu2 %v8556_v25  ;;  %v7466_v25 = vor.u32 %v8604_v23, %v7465_v22  ;;  %v8574_v22 = vld [vmem:[#allocation5 + $0x384] sm:$0xf0]  ;;  %v8573_v23 = vld [vmem:[#allocation5 + $0x384] sm:$0xf] }
 0xed4   :  { %v2982_v9 = vadd.f32 %v2979_v29, %v2893_v28  ;;  %v8553_v28 = vld [vmem:[#allocation8 + $0x460] sm:$0xff]  ;;  %v8552_v29 = vld [vmem:[#allocation8 + $0x458] sm:$0xff] }
 0xed6   :  { %v2983_v30 = vmul.f32 0.2, %v2982_v9 }
 0xed7   :  { %3538 = vmatpush.bf16.msra.mxu2 %v8555_v24  ;;  %v7457_v24 = vld [vmem:[#allocation5 + $0x420] sm:$0xf] }
 0xed8   :  { %v2984_v31 = vmax.f32 %v2982_v9, %v2983_v30  ;;  %v8829_v9 = vld [vmem:[#allocation10 + $0x10] ss:$0 sm:$0xff] }
 0xed9   :  { %v2980_v32 = vpop.f32.mrf.mxu3  ;;  %v8551_v30 = vld [vmem:[#allocation8 + $0x450] sm:$0xff] }
 0xeda   :  { %v2985_v33 = vpack.c.bf16 %v2984_v31, %v2984_v31 }
 0xedb   :  { %3539 = vmatpush.bf16.msra.mxu2 %v8554_v27  ;;  %v8602_v27 = vld [vmem:[#allocation5 + $0x424] sm:$0xf0] }
 0xedc   :  { %3098 = vmatmul.bf16.vlgmr.msrb.gmra.mxu0 %v2985_v33  ;;  %3111 = vmatmul.bf16.vlgmr.msrb.gmra.mxu1 %v2985_v33 }
 0xedd   :  { %3711 = vmatpush.bf16.msrb.mxu0 %v8572_v55  ;;  %v8582_v55 = vld [vmem:[#allocation5 + $0x3c4] sm:$0xf0] }
 0xedf   :  { %3540 = vmatpush.bf16.msra.mxu2 %v8553_v28  ;;  %v7458_v28 = vor.u32 %v8602_v27, %v7457_v24  ;;  %v8611_v24 = vld [vmem:[#allocation5 + $0x474] sm:$0xf]  ;;  %v7499_v27 = vld [vmem:[#allocation5 + $0x478] sm:$0xf0] }
 0xee1   :  { %3712 = vmatpush.bf16.msrb.mxu0 %v8571_v56  ;;  %v8581_v56 = vld [vmem:[#allocation5 + $0x3c4] sm:$0xf] }
 0xee3   :  { %3541 = vmatpush.bf16.msra.mxu2 %v8552_v29  ;;  %v7449_v29 = vld [vmem:[#allocation5 + $0x410] sm:$0xf] }
 0xee5   :  { %3713 = vmatpush.bf16.msrb.mxu0 %v8570_v57  ;;  %v7379_v57 = vld [vmem:[#allocation5 + $0x3c8] sm:$0xf0] }
 0xee7   :  { %3542 = vmatpush.bf16.msra.mxu2 %v8551_v30 }
 0xeeb   :  { %3543 = vmatpush.bf16.msra.mxu2 %v8550_v39  ;;  %v7393_v39 = vld [vmem:[#allocation5 + $0x3e0] sm:$0xf] }
 0xeef   :  { %3544 = vmatpush.bf16.msra.mxu2 %v8549_v40  ;;  %v8586_v40 = vld [vmem:[#allocation5 + $0x3e4] sm:$0xf0] }
 0xf59   :  { %v3099_v43 = vpop.f32.mrf.mxu0  ;;  %v3112_v26 = vpop.f32.mrf.mxu1 }
 0xf5a   :  { %v3100_v44 = vadd.f32 %v3099_v43, %v3006_v42  ;;  %v3113_v62 = vadd.f32 %v3112_v26, %v3007_v58  ;;  %v8563_v42 = vld [vmem:[#allocation2 + $0x2f0] sm:$0xff]  ;;  %v8562_v43 = vld [vmem:[#allocation2 + $0x2e8] sm:$0xff]  ;;  %v8561_v26 = vld [vmem:[#allocation2 + $0x2e0] sm:$0xff] }
 0xf5b   :  { %3625 = vmatpush.bf16.msra.mxu3 %v8563_v42  ;;  %v8569_v58 = vld [vmem:[#allocation8 + $0x4a0] sm:$0xff]  ;;  %v8585_v42 = vld [vmem:[#allocation5 + $0x3e4] sm:$0xf] }
 0xf5c   :  { %v3116_v45 = vmul.f32 0.2, %v3100_v44  ;;  %3714 = vmatpush.bf16.msrb.mxu0 %v8569_v58 }
 0xf5e   :  { %v3117_v46 = vmax.f32 %v3100_v44, %v3116_v45  ;;  %v8560_v44 = vld [vmem:[#allocation2 + $0x2d8] sm:$0xff]  ;;  %v8830_v45 = vld [vmem:[%s9189_s2 + $0xa] ss:$0 sm:$0xff] }
 0xf5f   :  { %3626 = vmatpush.bf16.msra.mxu3 %v8562_v43  ;;  %v7395_v43 = vld [vmem:[#allocation5 + $0x3e8] sm:$0xf0] }
 0xf60   :  { %v3118_v47 = vpack.c.bf16 %v3117_v46, %v3117_v46 }
 0xf61   :  { %v3101_v48 = vpop.f32.mrf.mxu0  ;;  %v3114_v49 = vpop.f32.mrf.mxu1 }
 0xf62   :  { %3197 = vmatmul.bf16.vlgmr.msrb.gmra.mxu2 %v3118_v47 }
 0xf63   :  { %3627 = vmatpush.bf16.msra.mxu3 %v8561_v26  ;;  %v7394_v26 = vor.u32 %v8586_v40, %v7393_v39  ;;  %v8618_v39 = vld [vmem:[#allocation8 + $0x528] sm:$0xff] }
 0xf64   :  { %v8605_v40 = vld [vmem:[#allocation5 + $0x444] sm:$0xf] }
 0xf67   :  { %3628 = vmatpush.bf16.msra.mxu3 %v8560_v44  ;;  %v8832_v44 = vld [vmem:[%s9189_s2 + $0xb] ss:$0 sm:$0xff] }
 0xf6b   :  { %3629 = vmatpush.bf16.msra.mxu3 %v8559_v52 }
 0xf6f   :  { %3630 = vmatpush.bf16.msra.mxu3 %v8558_v53 }
 0xf73   :  { %3631 = vmatpush.bf16.msra.mxu3 %v8557_v54  ;;  %v7377_v54 = vld [vmem:[#allocation5 + $0x3c0] sm:$0xf] }
 0xfe5   :  { %v3198_v61 = vpop.f32.mrf.mxu2 }
 0xfe6   :  { %v3199_v63 = vadd.f32 %v8827_v59, %v3198_v61  ;;  %v8568_v59 = vld [vmem:[#allocation8 + $0x498] sm:$0xff]  ;;  %v8567_v61 = vld [vmem:[#allocation8 + $0x490] sm:$0xff] }
 0xfe7   :  { %3715 = vmatpush.bf16.msrb.mxu0 %v8568_v59  ;;  %v7378_v59 = vor.u32 %v8582_v55, %v7377_v54  ;;  %v8614_v54 = vld [vmem:[#allocation8 + $0x508] sm:$0xff] }
 0xfe8   :  { %v3202_v0 = vadd.f32 %v3199_v63, %v3113_v62  ;;  %v8597_v55 = vld [vmem:[#allocation5 + $0x404] sm:$0xf] }
 0xfea   :  { %v3203_v1 = vmul.f32 0.2, %v3202_v0 }
 0xfeb   :  { %3716 = vmatpush.bf16.msrb.mxu0 %v8567_v61  ;;  %v7382_v61 = vor.u32 %v8581_v56, %v7379_v57  ;;  %v7443_v56 = vld [vmem:[#allocation5 + $0x408] sm:$0xf0] }
 0xfec   :  { %v3204_v2 = vmax.f32 %v3202_v0, %v3203_v1  ;;  %v8566_v1 = vld [vmem:[#allocation8 + $0x488] sm:$0xff]  ;;  %v7446_v57 = vor.u32 %v8597_v55, %v7443_v56  ;;  %v8632_v55 = vld [vmem:[#allocation8 + $0x558] sm:$0xff]  ;;  %v8631_v56 = vld [vmem:[#allocation8 + $0x550] sm:$0xff] }
 0xfed   :  { %v3200_v3 = vpop.f32.mrf.mxu2 }
 0xfee   :  { %v3205_v4 = vpack.c.bf16 %v3204_v2, %v3204_v2  ;;  %v7497_v3 = vld [vmem:[#allocation5 + $0x470] sm:$0xf] }
 0xfef   :  { %3717 = vmatpush.bf16.msrb.mxu0 %v8566_v1  ;;  %v7371_v1 = vld [vmem:[#allocation5 + $0x3b8] sm:$0xf0] }
 0xff0   :  { %3284 = vmatmul.bf16.vlgmr.msrb.gmra.mxu3 %v3205_v4  ;;  %v3292_v32 = vunpack.c.l.bf16 %v3205_v4  ;;  %v8612_v4 = vld [vmem:[#allocation5 + $0x474] sm:$0xf0] }
 0xff1   :  { %v7498_v7 = vor.u32 %v8612_v4, %v7497_v3 }
 0xff3   :  { %3718 = vmatpush.bf16.msrb.mxu0 %v8565_v6  ;;  %v7361_v6 = vld [vmem:[#allocation5 + $0x3a0] sm:$0xf] }
0x1073   :  { %v3285_v15 = vpop.f32.mrf.mxu3 }
0x1074   :  { %v3286_v16 = vadd.f32 %v8828_v14, %v3285_v15  ;;  %v7490_v15 = vor.u32 %v8610_v12, %v7489_v10  ;;  %v7363_v10 = vld [vmem:[#allocation5 + $0x3a8] sm:$0xf0] }
0x1076   :  { %v3289_v17 = vmul.f32 0.2, %v3286_v16 }
0x1078   :  { %v3290_v18 = vmax.f32 %v3286_v16, %v3289_v17  ;;  %v7481_v16 = vld [vmem:[#allocation5 + $0x450] sm:$0xf]  ;;  %v8608_v17 = vld [vmem:[#allocation5 + $0x454] sm:$0xf0] }
0x107a   :  { %v3291_v19 = vpack.c.bf16 %v3290_v18, %v3290_v18  ;;  %v7482_v18 = vor.u32 %v8608_v17, %v7481_v16  ;;  %v8576_v16 = vld [vmem:[#allocation5 + $0x394] sm:$0xf0]  ;;  %v8575_v17 = vld [vmem:[#allocation5 + $0x394] sm:$0xf] }
0x107b   :  { %v3287_v20 = vpop.f32.mrf.mxu3 }
0x107c   :  { %3371 = vmatmul.bf16.vlgmr.msra.gmra.mxu0 %v3291_v19  ;;  %v7473_v19 = vld [vmem:[#allocation5 + $0x440] sm:$0xf]  ;;  %v8606_v20 = vld [vmem:[#allocation5 + $0x444] sm:$0xf0] }
0x107d   :  { %4052 = vmatpush.bf16.msra.mxu0 %v7498_v7  ;;  %v7474_v21 = vor.u32 %v8606_v20, %v7473_v19  ;;  %v8578_v7 = vld [vmem:[#allocation5 + $0x3a4] sm:$0xf0] }
0x107e   :  { %v7362_v12 = vor.u32 %v8578_v7, %v7361_v6 }
0x1081   :  { %4053 = vmatpush.bf16.msra.mxu0 %v7490_v15  ;;  %v7353_v15 = vld [vmem:[#allocation5 + $0x390] sm:$0xf] }
0x1082   :  { %v7354_v19 = vor.u32 %v8576_v16, %v7353_v15  ;;  %v8590_v16 = vld [vmem:[#allocation8 + $0x4c8] sm:$0xff] }
0x1085   :  { %4054 = vmatpush.bf16.msra.mxu0 %v7482_v18  ;;  %v7355_v18 = vld [vmem:[#allocation5 + $0x398] sm:$0xf0] }
0x1086   :  { %v7358_v20 = vor.u32 %v8575_v17, %v7355_v18 }
0x1089   :  { %4055 = vmatpush.bf16.msra.mxu0 %v7474_v21  ;;  %v7345_v21 = vld [vmem:[#allocation5 + $0x380] sm:$0xf] }
0x108d   :  { %4056 = vmatpush.bf16.msra.mxu0 %v7466_v25  ;;  %v7347_v25 = vld [vmem:[#allocation5 + $0x388] sm:$0xf0] }
0x1091   :  { %4057 = vmatpush.bf16.msra.mxu0 %v7458_v28  ;;  %v7346_v28 = vor.u32 %v8574_v22, %v7345_v21  ;;  %v8589_v21 = vld [vmem:[#allocation8 + $0x4c0] sm:$0xff] }
0x1092   :  { %v8628_v22 = vld [vmem:[#allocation2 + $0x338] sm:$0xff] }
0x10f9   :  { %v3372_v31 = vpop.f32.mrf.mxu0 }
0x10fa   :  { %v3373_v33 = vadd.f32 %v8829_v9, %v3372_v31  ;;  %v8600_v9 = vld [vmem:[#allocation5 + $0x414] sm:$0xf0]  ;;  %v7441_v31 = vld [vmem:[#allocation5 + $0x400] sm:$0xf] }
0x10fb   :  { %v7450_v30 = vor.u32 %v8600_v9, %v7449_v29  ;;  %v7350_v29 = vor.u32 %v8573_v23, %v7347_v25  ;;  %v7502_v9 = vor.u32 %v8611_v24, %v7499_v27  ;;  %v8627_v23 = vld [vmem:[#allocation2 + $0x330] sm:$0xff]  ;;  %v8626_v25 = vld [vmem:[#allocation2 + $0x328] sm:$0xff]  ;;  %v8625_v24 = vld [vmem:[#allocation2 + $0x320] sm:$0xff] }
0x10fc   :  { %v3376_v34 = vadd.f32 %v3373_v33, %v3292_v32  ;;  %v8598_v32 = vld [vmem:[#allocation5 + $0x404] sm:$0xf0]  ;;  %v8624_v27 = vld [vmem:[#allocation2 + $0x318] sm:$0xff] }
0x10fd   :  { %4058 = vmatpush.bf16.msra.mxu0 %v7450_v30  ;;  %v7442_v33 = vor.u32 %v8598_v32, %v7441_v31  ;;  %v8620_v30 = vld [vmem:[#allocation8 + $0x538] sm:$0xff]  ;;  %v9144_v31 = vld [vmem:[%s9187_s0] sm:$0xf]  ;;  %v8609_v32 = vld [vmem:[#allocation5 + $0x464] sm:$0xf] }
0x10fe   :  { %v3377_v35 = vmul.f32 0.2, %v3376_v34 }
0x1100   :  { %v3378_v36 = vmax.f32 %v3376_v34, %v3377_v35  ;;  %v7401_v34 = vld [vmem:[#allocation5 + $0x3f0] sm:$0xf]  ;;  %v8588_v35 = vld [vmem:[#allocation5 + $0x3f4] sm:$0xf0] }
0x1101   :  { %v3374_v37 = vpop.f32.mrf.mxu0  ;;  %4059 = vmatpush.bf16.msra.mxu0 %v7442_v33  ;;  %v7491_v33 = vld [vmem:[#allocation5 + $0x468] sm:$0xf0] }
0x1102   :  { %v3379_v38 = vpack.c.bf16 %v3378_v36, %v3378_v36  ;;  %v8587_v36 = vld [vmem:[#allocation5 + $0x3f4] sm:$0xf]  ;;  %v7402_v37 = vor.u32 %v8588_v35, %v7401_v34  ;;  %v7494_v34 = vor.u32 %v8609_v32, %v7491_v33  ;;  %v8619_v35 = vld [vmem:[#allocation8 + $0x530] sm:$0xff] }
0x1104   :  { %3458 = vmatmul.bf16.vlgmr.msra.gmra.mxu1 %v3379_v38  ;;  %v3466_v63 = vunpack.c.l.bf16 %v3379_v38  ;;  %v7403_v38 = vld [vmem:[#allocation5 + $0x3f8] sm:$0xf0] }
0x1105   :  { %v7406_v41 = vor.u32 %v8587_v36, %v7403_v38  ;;  %3832 = vmatpush.bf16.msrb.mxu1 %v7402_v37  ;;  %v8607_v36 = vld [vmem:[#allocation5 + $0x454] sm:$0xf]  ;;  %v7483_v37 = vld [vmem:[#allocation5 + $0x458] sm:$0xf0] }
0x1106   :  { %v7486_v38 = vor.u32 %v8607_v36, %v7483_v37 }
0x1107   :  { %3845 = vmatpush.bf16.msrb.mxu2 %v7406_v41  ;;  %v7475_v41 = vld [vmem:[#allocation5 + $0x448] sm:$0xf0] }
0x1109   :  { %3833 = vmatpush.bf16.msrb.mxu1 %v7394_v26  ;;  %v8603_v26 = vld [vmem:[#allocation5 + $0x434] sm:$0xf] }
0x1181   :  { %v3459_v46 = vpop.f32.mrf.mxu1 }
0x1182   :  { %v3460_v47 = vadd.f32 %v8830_v45, %v3459_v46  ;;  %v7398_v45 = vor.u32 %v8585_v42, %v7395_v43  ;;  %v7385_v46 = vld [vmem:[#allocation5 + $0x3d0] sm:$0xf]  ;;  %v7478_v42 = vor.u32 %v8605_v40, %v7475_v41  ;;  %v8617_v43 = vld [vmem:[#allocation8 + $0x520] sm:$0xff] }
0x1184   :  { %v3463_v48 = vmul.f32 0.2, %v3460_v47  ;;  %3846 = vmatpush.bf16.msrb.mxu2 %v7398_v45 }
0x1186   :  { %v3464_v49 = vmax.f32 %v3460_v47, %v3463_v48  ;;  %v8584_v47 = vld [vmem:[#allocation5 + $0x3d4] sm:$0xf0]  ;;  %v8583_v48 = vld [vmem:[#allocation5 + $0x3d4] sm:$0xf] }
0x1188   :  { %v3465_v50 = vpack.c.bf16 %v3464_v49, %v3464_v49  ;;  %v7387_v49 = vld [vmem:[#allocation5 + $0x3d8] sm:$0xf0] }
0x1189   :  { %v3461_v51 = vpop.f32.mrf.mxu1  ;;  %v7390_v53 = vor.u32 %v8583_v48, %v7387_v49  ;;  %v7459_v48 = vld [vmem:[#allocation5 + $0x428] sm:$0xf0] }
0x118a   :  { %3545 = vmatmul.bf16.vlgmr.msra.gmra.mxu2 %v3465_v50  ;;  %v7386_v51 = vor.u32 %v8584_v47, %v7385_v46  ;;  %v8616_v46 = vld [vmem:[#allocation8 + $0x518] sm:$0xff]  ;;  %v8601_v47 = vld [vmem:[#allocation5 + $0x424] sm:$0xf] }
0x118b   :  { %3847 = vmatpush.bf16.msrb.mxu2 %v7390_v53  ;;  %v7462_v49 = vor.u32 %v8601_v47, %v7459_v48 }
0x118c   :  { %3834 = vmatpush.bf16.msrb.mxu1 %v7386_v51  ;;  %v8599_v51 = vld [vmem:[#allocation5 + $0x414] sm:$0xf] }
0x118f   :  { %3848 = vmatpush.bf16.msrb.mxu2 %v7382_v61  ;;  %v8595_v61 = vld [vmem:[#allocation8 + $0x4f0] sm:$0xff] }
0x1190   :  { %3835 = vmatpush.bf16.msrb.mxu1 %v7378_v59  ;;  %v8596_v59 = vld [vmem:[#allocation8 + $0x4f8] sm:$0xff] }
0x1191   :  { %3931 = vmatpush.bf16.msrb.mxu3 %v8596_v59 }
0x1195   :  { %3932 = vmatpush.bf16.msrb.mxu3 %v8595_v61 }
0x120d   :  { %v3546_v62 = vpop.f32.mrf.mxu2 }
0x120e   :  { %v3547_v0 = vadd.f32 %v8831_v60, %v3546_v62  ;;  %v7369_v62 = vld [vmem:[#allocation5 + $0x3b0] sm:$0xf] }
0x1210   :  { %v3550_v2 = vadd.f32 %v3547_v0, %v3466_v63  ;;  %v8580_v63 = vld [vmem:[#allocation5 + $0x3b4] sm:$0xf0]  ;;  %v8579_v0 = vld [vmem:[#allocation5 + $0x3b4] sm:$0xf] }
0x1211   :  { %v7370_v4 = vor.u32 %v8580_v63, %v7369_v62 }
0x1212   :  { %v3551_v5 = vmul.f32 0.2, %v3550_v2 }
0x1213   :  { %3836 = vmatpush.bf16.msrb.mxu1 %v7370_v4  ;;  %v8593_v4 = vld [vmem:[#allocation8 + $0x4e0] sm:$0xff] }
0x1214   :  { %v3552_v8 = vmax.f32 %v3550_v2, %v3551_v5  ;;  %v7374_v5 = vor.u32 %v8579_v0, %v7371_v1  ;;  %v8594_v1 = vld [vmem:[#allocation8 + $0x4e8] sm:$0xff] }
0x1215   :  { %v3548_v13 = vpop.f32.mrf.mxu2  ;;  %3933 = vmatpush.bf16.msrb.mxu3 %v8594_v1  ;;  %v2021_v1 = vmul.f32 0.2, %v9113_v11 }
0x1216   :  { %v9135_v14 = vpack.c.bf16 %v3552_v8, %v3552_v8  ;;  %v8577_v8 = vld [vmem:[#allocation5 + $0x3a4] sm:$0xf]  ;;  %3849 = vmatpush.bf16.msrb.mxu2 %v7374_v5 }
0x1217   :  { %v7366_v13 = vor.u32 %v8577_v8, %v7363_v10  ;;  %3837 = vmatpush.bf16.msrb.mxu1 %v7362_v12  ;;  %v8592_v8 = vld [vmem:[#allocation8 + $0x4d8] sm:$0xff] }
0x1218   :  { %3632 = vmatmul.bf16.vlgmr.msra.gmra.mxu3 %v9135_v14  ;;  %v3640_v63 = vunpack.c.l.bf16 %v9135_v14  ;;  %v3966_v10 = vld [vmem:[#allocation7 + $0x10] sm:$0x3] }
0x1219   :  { %3934 = vmatpush.bf16.msrb.mxu3 %v8593_v4  ;;  %v3968_v12 = vperm.slane %v3966_v10, 0  ;;  %v3969_v41 = vperm.slane %v3966_v10, 1 }
0x121a   :  { %3850 = vmatpush.bf16.msrb.mxu2 %v7366_v13  ;;  %v8591_v13 = vld [vmem:[#allocation8 + $0x4d0] sm:$0xff] }
0x121b   :  { %3838 = vmatpush.bf16.msrb.mxu1 %v7354_v19 }
0x121d   :  { %3935 = vmatpush.bf16.msrb.mxu3 %v8592_v8 }
0x121e   :  { %3851 = vmatpush.bf16.msrb.mxu2 %v7358_v20 }
0x121f   :  { %3839 = vmatpush.bf16.msrb.mxu1 %v7346_v28  ;;  %v8623_v28 = vld [vmem:[#allocation2 + $0x310] sm:$0xff] }
0x1221   :  { %3936 = vmatpush.bf16.msrb.mxu3 %v8591_v13  ;;  %v8640_v13 = vld [vmem:[#allocation2 + $0x358] sm:$0xff] }
0x1222   :  { %3852 = vmatpush.bf16.msrb.mxu2 %v7350_v29  ;;  %v8622_v29 = vld [vmem:[#allocation2 + $0x308] sm:$0xff] }
0x1223   :  { %4065 = vmatpush.bf16.msra.mxu1 %v7502_v9  ;;  %v3746_v9 = vld [vmem:[#allocation7 + $0xe] sm:$0x3] }
0x1224   :  { %v3749_v59 = vperm.slane %v3746_v9, 1 }
0x1225   :  { %3937 = vmatpush.bf16.msrb.mxu3 %v8590_v16 }
0x1226   :  { %4151 = vmatpush.bf16.msra.mxu2 %v8620_v30  ;;  %v8621_v30 = vld [vmem:[#allocation2 + $0x300] sm:$0xff] }
0x1227   :  { %4066 = vmatpush.bf16.msra.mxu1 %v7494_v34 }
0x1229   :  { %3938 = vmatpush.bf16.msrb.mxu3 %v8589_v21  ;;  %v8638_v21 = vld [vmem:[#allocation2 + $0x348] sm:$0xff] }
0x122a   :  { %4152 = vmatpush.bf16.msra.mxu2 %v8619_v35 }
0x122b   :  { %4067 = vmatpush.bf16.msra.mxu1 %v7486_v38 }
0x122d   :  { %4238 = vmatpush.bf16.msra.mxu3 %v8628_v22  ;;  %v8637_v22 = vld [vmem:[#allocation2 + $0x340] sm:$0xff] }
0x122e   :  { %4153 = vmatpush.bf16.msra.mxu2 %v8618_v39 }
0x122f   :  { %4068 = vmatpush.bf16.msra.mxu1 %v7478_v42  ;;  %v8834_v42 = vld [vmem:[#allocation10 + $0x14] ss:$0 sm:$0xff] }
0x1231   :  { %4239 = vmatpush.bf16.msra.mxu3 %v8627_v23  ;;  %v8652_v23 = vld [vmem:[#allocation8 + $0x5b8] sm:$0xff] }
0x1232   :  { %4154 = vmatpush.bf16.msra.mxu2 %v8617_v43 }
0x1235   :  { %4240 = vmatpush.bf16.msra.mxu3 %v8626_v25  ;;  %v8651_v25 = vld [vmem:[#allocation8 + $0x5b0] sm:$0xff] }
0x1236   :  { %4155 = vmatpush.bf16.msra.mxu2 %v8616_v46 }
0x1239   :  { %4241 = vmatpush.bf16.msra.mxu3 %v8625_v24  ;;  %v8650_v24 = vld [vmem:[#allocation8 + $0x5a8] sm:$0xff] }
0x123d   :  { %4242 = vmatpush.bf16.msra.mxu3 %v8624_v27  ;;  %v8649_v27 = vld [vmem:[#allocation8 + $0x5a0] sm:$0xff] }
0x1241   :  { %4243 = vmatpush.bf16.msra.mxu3 %v8623_v28  ;;  %v8648_v28 = vld [vmem:[#allocation8 + $0x598] sm:$0xff] }
0x1245   :  { %4244 = vmatpush.bf16.msra.mxu3 %v8622_v29  ;;  %v8837_v29 = vld [vmem:[#allocation10 + $0x15] ss:$0 sm:$0xff] }
0x1249   :  { %4245 = vmatpush.bf16.msra.mxu3 %v8621_v30 }
0x129b   :  { %v3633_v50 = vpop.f32.mrf.mxu3 }
0x129c   :  { %v3634_v52 = vadd.f32 %v8832_v44, %v3633_v50  ;;  %v7467_v44 = vld [vmem:[#allocation5 + $0x438] sm:$0xf0]  ;;  %v8615_v50 = vld [vmem:[#allocation8 + $0x510] sm:$0xff] }
0x129d   :  { %v7470_v45 = vor.u32 %v8603_v26, %v7467_v44  ;;  %4156 = vmatpush.bf16.msra.mxu2 %v8615_v50 }
0x129e   :  { %v3637_v58 = vmul.f32 0.2, %v3634_v52 }
0x129f   :  { %4069 = vmatpush.bf16.msra.mxu1 %v7470_v45 }
0x12a0   :  { %v3638_v60 = vmax.f32 %v3634_v52, %v3637_v58  ;;  %v7451_v52 = vld [vmem:[#allocation5 + $0x418] sm:$0xf0] }
0x12a1   :  { %v7454_v53 = vor.u32 %v8599_v51, %v7451_v52  ;;  %4157 = vmatpush.bf16.msra.mxu2 %v8614_v54  ;;  %v8613_v58 = vld [vmem:[#allocation8 + $0x500] sm:$0xff]  ;;  %v8636_v51 = vld [vmem:[#allocation8 + $0x578] sm:$0xff]  ;;  %v8635_v52 = vld [vmem:[#allocation8 + $0x570] sm:$0xff] }
0x12a2   :  { %v3639_v2 = vpack.c.bf16 %v3638_v60, %v3638_v60  ;;  %v8833_v60 = vld [vmem:[#allocation10 + $0x12] ss:$0 sm:$0xff]  ;;  %v8633_v54 = vld [vmem:[#allocation8 + $0x560] sm:$0xff] }
0x12a3   :  { %v3635_v3 = vpop.f32.mrf.mxu3  ;;  %4070 = vmatpush.bf16.msra.mxu1 %v7462_v49 }
0x12a4   :  { %3719 = vmatmul.bf16.vlgmr.msrb.gmra.mxu0 %v3639_v2 }
0x12a5   :  { %4158 = vmatpush.bf16.msra.mxu2 %v8613_v58  ;;  %4325 = vmatpush.bf16.msrb.mxu0 %v8636_v51  ;;  %v8629_v58 = vld [vmem:[#allocation8 + $0x540] sm:$0xff]  ;;  %v8655_v51 = vld [vmem:[#allocation2 + $0x390] sm:$0xff] }
0x12a7   :  { %4071 = vmatpush.bf16.msra.mxu1 %v7454_v53  ;;  %v8634_v53 = vld [vmem:[#allocation8 + $0x568] sm:$0xff] }
0x12a9   :  { %4326 = vmatpush.bf16.msrb.mxu0 %v8635_v52  ;;  %v8654_v52 = vld [vmem:[#allocation2 + $0x388] sm:$0xff] }
0x12ab   :  { %4072 = vmatpush.bf16.msra.mxu1 %v7446_v57  ;;  %v8630_v57 = vld [vmem:[#allocation8 + $0x548] sm:$0xff] }
0x12ad   :  { %4327 = vmatpush.bf16.msrb.mxu0 %v8634_v53  ;;  %v8653_v53 = vld [vmem:[#allocation2 + $0x380] sm:$0xff] }
0x12b1   :  { %4328 = vmatpush.bf16.msrb.mxu0 %v8633_v54  ;;  %v8668_v54 = vld [vmem:[#allocation8 + $0x5f8] sm:$0xff] }
0x12b4   :  { %4060 = vmatmul.bf16.vlgmr.msra.gmra.mxu0 %v9144_v31 }
0x12b5   :  { %4329 = vmatpush.bf16.msrb.mxu0 %v8632_v55  ;;  %v8667_v55 = vld [vmem:[#allocation8 + $0x5f0] sm:$0xff] }
0x12b9   :  { %4330 = vmatpush.bf16.msrb.mxu0 %v8631_v56  ;;  %v8666_v56 = vld [vmem:[#allocation8 + $0x5e8] sm:$0xff] }
0x12bd   :  { %4331 = vmatpush.bf16.msrb.mxu0 %v8630_v57  ;;  %v8665_v57 = vld [vmem:[#allocation8 + $0x5e0] sm:$0xff] }
0x12c1   :  { %4332 = vmatpush.bf16.msrb.mxu0 %v8629_v58  ;;  %v8664_v58 = vld [vmem:[#allocation8 + $0x5d8] sm:$0xff] }
0x12c5   :  { %4673 = vmatpush.bf16.msra.mxu0 %v8668_v54 }
0x12c9   :  { %4674 = vmatpush.bf16.msra.mxu0 %v8667_v55  ;;  %v7742_v55 = vld [vmem:[#allocation5 + $0x498] sm:$0xf0] }
0x12cd   :  { %4675 = vmatpush.bf16.msra.mxu0 %v8666_v56 }
0x12d1   :  { %4676 = vmatpush.bf16.msra.mxu0 %v8665_v57  ;;  %v7732_v57 = vld [vmem:[#allocation5 + $0x480] sm:$0xf] }
0x12d5   :  { %4677 = vmatpush.bf16.msra.mxu0 %v8664_v58  ;;  %v8670_v58 = vld [vmem:[#allocation5 + $0x484] sm:$0xf0] }
0x1321   :  { %v3720_v62 = vpop.f32.mrf.mxu0 }
0x1322   :  { %v3721_v0 = vadd.f32 %v8833_v60, %v3720_v62  ;;  %v8835_v60 = vld [vmem:[#allocation10 + $0x13] ss:$0 sm:$0xff] }
0x1324   :  { %v3724_v2 = vadd.f32 %v3721_v0, %v3640_v63  ;;  %v8644_v0 = vld [vmem:[#allocation2 + $0x378] sm:$0xff] }
0x1326   :  { %v3725_v3 = vmul.f32 0.2, %v3724_v2 }
0x1328   :  { %v3726_v5 = vmax.f32 %v3724_v2, %v3725_v3  ;;  %v8643_v3 = vld [vmem:[#allocation2 + $0x370] sm:$0xff] }
0x1329   :  { %v3722_v6 = vpop.f32.mrf.mxu0 }
0x132a   :  { %v3727_v7 = vpack.c.bf16 %v3726_v5, %v3726_v5  ;;  %v2022_v5 = vmax.f32 %v9113_v11, %v2021_v1 }
0x132c   :  { %3840 = vmatmul.bf16.vlgmr.msrb.gmra.mxu1 %v3727_v7  ;;  %3853 = vmatmul.bf16.vlgmr.msrb.gmra.mxu2 %v3727_v7  ;;  %v8642_v7 = vld [vmem:[#allocation2 + $0x368] sm:$0xff] }
0x132d   :  { %4412 = vmatpush.bf16.msrb.mxu1 %v8644_v0  ;;  %4499 = vmatpush.bf16.msrb.mxu2 %v8652_v23  ;;  %v8679_v23 = vld [vmem:[#allocation5 + $0x4d4] sm:$0xf] }
0x1331   :  { %v4061_v15 = vpop.f32.mrf.mxu0  ;;  %4413 = vmatpush.bf16.msrb.mxu1 %v8643_v3  ;;  %4500 = vmatpush.bf16.msrb.mxu2 %v8651_v25  ;;  %v7774_v25 = vld [vmem:[#allocation5 + $0x4d8] sm:$0xf0] }
0x1332   :  { %v4062_v14 = vadd.f32 %v4061_v15, %v3968_v12  ;;  %v8641_v12 = vld [vmem:[#allocation2 + $0x360] sm:$0xff]  ;;  %v8836_v15 = vld [vmem:[%s9189_s2 + $0xc] ss:$0 sm:$0xff] }
0x1334   :  { %v4078_v17 = vmul.f32 0.2, %v4062_v14 }
0x1335   :  { %4414 = vmatpush.bf16.msrb.mxu1 %v8642_v7  ;;  %4501 = vmatpush.bf16.msrb.mxu2 %v8650_v24  ;;  %v7788_v7 = vld [vmem:[#allocation5 + $0x4f0] sm:$0xf] }
0x1336   :  { %v4079_v18 = vmax.f32 %v4062_v14, %v4078_v17 }
0x1338   :  { %v4080_v20 = vpack.c.bf16 %v4079_v18, %v4079_v18 }
0x1339   :  { %v4063_v19 = vpop.f32.mrf.mxu0  ;;  %4415 = vmatpush.bf16.msrb.mxu1 %v8641_v12  ;;  %4502 = vmatpush.bf16.msrb.mxu2 %v8649_v27  ;;  %v8683_v12 = vld [vmem:[#allocation5 + $0x4f4] sm:$0xf]  ;;  %v7777_v27 = vor.u32 %v8679_v23, %v7774_v25  ;;  %v7886_v23 = vld [vmem:[#allocation5 + $0x578] sm:$0xf0]  ;;  %v7876_v25 = vld [vmem:[#allocation5 + $0x560] sm:$0xf] }
0x133c   :  { %4073 = vmatmul.bf16.vlgmr.msra.gmra.mxu1 %v9144_v31  ;;  %4159 = vmatmul.bf16.vlgmr.msra.gmra.mxu2 %v4080_v20  ;;  %v3748_v31 = vperm.slane %v3746_v9, 0  ;;  %v8639_v20 = vld [vmem:[#allocation2 + $0x350] sm:$0xff]  ;;  %v8647_v9 = vld [vmem:[#allocation8 + $0x590] sm:$0xff] }
0x133d   :  { %4416 = vmatpush.bf16.msrb.mxu1 %v8640_v13  ;;  %4503 = vmatpush.bf16.msrb.mxu2 %v8648_v28  ;;  %v7764_v28 = vld [vmem:[#allocation5 + $0x4c0] sm:$0xf] }
0x1341   :  { %4417 = vmatpush.bf16.msrb.mxu1 %v8639_v20  ;;  %4504 = vmatpush.bf16.msrb.mxu2 %v8647_v9  ;;  %v8677_v9 = vld [vmem:[#allocation5 + $0x4c4] sm:$0xf] }
0x1345   :  { %4418 = vmatpush.bf16.msrb.mxu1 %v8638_v21  ;;  %v7772_v21 = vld [vmem:[#allocation5 + $0x4d0] sm:$0xf] }
0x1349   :  { %4419 = vmatpush.bf16.msrb.mxu1 %v8637_v22  ;;  %v8680_v22 = vld [vmem:[#allocation5 + $0x4d4] sm:$0xf0] }
0x134a   :  { %v7773_v24 = vor.u32 %v8680_v22, %v7772_v21  ;;  %v8707_v21 = vld [vmem:[#allocation5 + $0x574] sm:$0xf] }
0x13a9   :  { %v3841_v32 = vpop.f32.mrf.mxu1 }
0x13aa   :  { %v3842_v33 = vadd.f32 %v3841_v32, %v3748_v31 }
0x13ac   :  { %v3858_v34 = vmul.f32 0.2, %v3842_v33 }
0x13ae   :  { %v3859_v35 = vmax.f32 %v3842_v33, %v3858_v34 }
0x13af   :  { %v3854_v36 = vpop.f32.mrf.mxu2 }
0x13b0   :  { %v3860_v37 = vpack.c.bf16 %v3859_v35, %v3859_v35  ;;  %v3855_v62 = vadd.f32 %v3854_v36, %v3749_v59  ;;  %v8839_v59 = vld [vmem:[#allocation10 + $0x16] ss:$0 sm:$0xff] }
0x13b1   :  { %v3843_v38 = vpop.f32.mrf.mxu1 }
0x13b2   :  { %3939 = vmatmul.bf16.vlgmr.msrb.gmra.mxu3 %v3860_v37  ;;  %v8646_v38 = vld [vmem:[#allocation8 + $0x588] sm:$0xff] }
0x13b3   :  { %4505 = vmatpush.bf16.msrb.mxu2 %v8646_v38 }
0x13b7   :  { %v3856_v39 = vpop.f32.mrf.mxu2 }
0x13b8   :  { %v8645_v39 = vld [vmem:[#allocation8 + $0x580] sm:$0xff] }
0x13b9   :  { %v4074_v40 = vpop.f32.mrf.mxu1  ;;  %4506 = vmatpush.bf16.msrb.mxu2 %v8645_v39  ;;  %v8840_v39 = vld [vmem:[%s9189_s2 + $0xe] ss:$0 sm:$0xff] }
0x13ba   :  { %v4075_v43 = vadd.f32 %v4074_v40, %v3969_v41  ;;  %v8660_v40 = vld [vmem:[#allocation2 + $0x3b8] sm:$0xff]  ;;  %v8659_v41 = vld [vmem:[#allocation2 + $0x3b0] sm:$0xff] }
0x13bb   :  { %4586 = vmatpush.bf16.msrb.mxu3 %v8660_v40 }
0x13bf   :  { %v4160_v26 = vpop.f32.mrf.mxu2  ;;  %4587 = vmatpush.bf16.msrb.mxu3 %v8659_v41 }
0x13c0   :  { %v4161_v44 = vadd.f32 %v8834_v42, %v4160_v26  ;;  %v8658_v42 = vld [vmem:[#allocation2 + $0x3a8] sm:$0xff]  ;;  %v8656_v26 = vld [vmem:[#allocation2 + $0x398] sm:$0xff] }
0x13c1   :  { %v4076_v45 = vpop.f32.mrf.mxu1 }
0x13c2   :  { %v4164_v46 = vadd.f32 %v4161_v44, %v4075_v43  ;;  %v8657_v43 = vld [vmem:[#allocation2 + $0x3a0] sm:$0xff]  ;;  %v8838_v44 = vld [vmem:[%s9189_s2 + $0xd] ss:$0 sm:$0xff] }
0x13c3   :  { %4588 = vmatpush.bf16.msrb.mxu3 %v8658_v42 }
0x13c4   :  { %v4165_v47 = vmul.f32 0.2, %v4164_v46 }
0x13c6   :  { %v4166_v48 = vmax.f32 %v4164_v46, %v4165_v47 }
0x13c7   :  { %v4162_v49 = vpop.f32.mrf.mxu2  ;;  %4589 = vmatpush.bf16.msrb.mxu3 %v8657_v43 }
0x13c8   :  { %v9149_v50 = vpack.c.bf16 %v4166_v48, %v4166_v48 }
0x13ca   :  { %4246 = vmatmul.bf16.vlgmr.msra.gmra.mxu3 %v9149_v50  ;;  %v4254_v31 = vunpack.c.l.bf16 %v9149_v50 }
0x13cb   :  { %4590 = vmatpush.bf16.msrb.mxu3 %v8656_v26 }
0x13cf   :  { %4591 = vmatpush.bf16.msrb.mxu3 %v8655_v51  ;;  %v7740_v51 = vld [vmem:[#allocation5 + $0x490] sm:$0xf] }
0x13d3   :  { %4592 = vmatpush.bf16.msrb.mxu3 %v8654_v52  ;;  %v8672_v52 = vld [vmem:[#allocation5 + $0x494] sm:$0xf0] }
0x13d4   :  { %v7741_v54 = vor.u32 %v8672_v52, %v7740_v51 }
0x13d7   :  { %4593 = vmatpush.bf16.msrb.mxu3 %v8653_v53  ;;  %v8671_v53 = vld [vmem:[#allocation5 + $0x494] sm:$0xf] }
0x13d8   :  { %v7745_v56 = vor.u32 %v8671_v53, %v7742_v55 }
0x1435   :  { %v3940_v61 = vpop.f32.mrf.mxu3 }
0x1436   :  { %v3941_v63 = vadd.f32 %v8835_v60, %v3940_v61  ;;  %v8663_v60 = vld [vmem:[#allocation8 + $0x5d0] sm:$0xff] }
0x1437   :  { %4678 = vmatpush.bf16.msra.mxu0 %v8663_v60  ;;  %v7733_v60 = vor.u32 %v8670_v58, %v7732_v57  ;;  %v7844_v57 = vld [vmem:[#allocation5 + $0x520] sm:$0xf]  ;;  %v8698_v58 = vld [vmem:[#allocation5 + $0x524] sm:$0xf0] }
0x1438   :  { %v3944_v2 = vadd.f32 %v3941_v63, %v3855_v62 }
0x143a   :  { %v3945_v4 = vmul.f32 0.2, %v3944_v2 }
0x143c   :  { %v3946_v6 = vmax.f32 %v3944_v2, %v3945_v4 }
0x143d   :  { %v3942_v8 = vpop.f32.mrf.mxu3 }
0x143e   :  { %v9154_v10 = vadd.f32 %v3946_v6, %v2022_v5  ;;  %v8662_v5 = vld [vmem:[#allocation8 + $0x5c8] sm:$0xff]  ;;  %v8661_v6 = vld [vmem:[#allocation8 + $0x5c0] sm:$0xff] }
0x143f   :  { %4679 = vmatpush.bf16.msra.mxu0 %v8662_v5  ;;  %v8684_v8 = vld [vmem:[#allocation5 + $0x4f4] sm:$0xf0]  ;;  %v8841_v5 = vld [vmem:[#allocation10 + $0x17] ss:$0 sm:$0xff] }
0x1440   :  { %v7789_v13 = vor.u32 %v8684_v8, %v7788_v7 }
0x1442   :  { %4794 = vmatpush.bf16.msra.mxu1 %v7789_v13 }
0x1443   :  { %4680 = vmatpush.bf16.msra.mxu0 %v8661_v6  ;;  %v8687_v6 = vld [vmem:[#allocation8 + $0x610] sm:$0xff] }
0x144d   :  { %v4247_v14 = vpop.f32.mrf.mxu3 }
0x144e   :  { %v4248_v16 = vadd.f32 %v8836_v15, %v4247_v14  ;;  %v7790_v15 = vld [vmem:[#allocation5 + $0x4f8] sm:$0xf0]  ;;  %v7780_v14 = vld [vmem:[#allocation5 + $0x4e0] sm:$0xf] }
0x1450   :  { %v4251_v17 = vmul.f32 0.2, %v4248_v16 }
0x1452   :  { %v4252_v18 = vmax.f32 %v4248_v16, %v4251_v17  ;;  %v8682_v16 = vld [vmem:[#allocation5 + $0x4e4] sm:$0xf0]  ;;  %v7793_v17 = vor.u32 %v8683_v12, %v7790_v15 }
0x1454   :  { %v4253_v11 = vpack.c.bf16 %v4252_v18, %v4252_v18  ;;  %v8681_v18 = vld [vmem:[#allocation5 + $0x4e4] sm:$0xf]  ;;  %4807 = vmatpush.bf16.msra.mxu2 %v7793_v17 }
0x1455   :  { %v4249_v19 = vpop.f32.mrf.mxu3 }
0x1456   :  { %4333 = vmatmul.bf16.vlgmr.msrb.gmra.mxu0 %v4253_v11  ;;  %v7782_v11 = vld [vmem:[#allocation5 + $0x4e8] sm:$0xf0]  ;;  %v7781_v19 = vor.u32 %v8682_v16, %v7780_v14 }
0x1457   :  { %v7785_v20 = vor.u32 %v8681_v18, %v7782_v11  ;;  %v8686_v18 = vld [vmem:[#allocation8 + $0x608] sm:$0xff]  ;;  %v8685_v11 = vld [vmem:[#allocation8 + $0x600] sm:$0xff] }
0x1458   :  { %4795 = vmatpush.bf16.msra.mxu1 %v7781_v19  ;;  %v7884_v19 = vld [vmem:[#allocation5 + $0x570] sm:$0xf] }
0x1459   :  { %4808 = vmatpush.bf16.msra.mxu2 %v7785_v20  ;;  %v8708_v20 = vld [vmem:[#allocation5 + $0x574] sm:$0xf0] }
0x145a   :  { %v7885_v22 = vor.u32 %v8708_v20, %v7884_v19  ;;  %v8842_v20 = vld [vmem:[#allocation10 + $0x18] ss:$0 sm:$0xff] }
0x145c   :  { %4796 = vmatpush.bf16.msra.mxu1 %v7773_v24  ;;  %v7889_v24 = vor.u32 %v8707_v21, %v7886_v23  ;;  %5014 = vmatpush.bf16.msrb.mxu0 %v7885_v22  ;;  %v8711_v21 = vld [vmem:[#allocation8 + $0x650] sm:$0xff] }
0x145d   :  { %4809 = vmatpush.bf16.msra.mxu2 %v7777_v27  ;;  %v8705_v27 = vld [vmem:[#allocation5 + $0x564] sm:$0xf] }
0x14d3   :  { %v4334_v30 = vpop.f32.mrf.mxu0 }
0x14d4   :  { %v4335_v32 = vadd.f32 %v8837_v29, %v4334_v30  ;;  %v8678_v29 = vld [vmem:[#allocation5 + $0x4c4] sm:$0xf0]  ;;  %v7766_v30 = vld [vmem:[#allocation5 + $0x4c8] sm:$0xf0] }
0x14d6   :  { %v4338_v33 = vadd.f32 %v4335_v32, %v4254_v31  ;;  %v7765_v31 = vor.u32 %v8678_v29, %v7764_v28  ;;  %v7769_v32 = vor.u32 %v8677_v9, %v7766_v30  ;;  %v7878_v28 = vld [vmem:[#allocation5 + $0x568] sm:$0xf0]  ;;  %v7868_v30 = vld [vmem:[#allocation5 + $0x550] sm:$0xf] }
0x14d7   :  { %v7881_v9 = vor.u32 %v8705_v27, %v7878_v28 }
0x14d8   :  { %v4339_v34 = vmul.f32 0.2, %v4338_v33  ;;  %4797 = vmatpush.bf16.msra.mxu1 %v7765_v31  ;;  %4810 = vmatpush.bf16.msra.mxu2 %v7769_v32  ;;  %v8704_v31 = vld [vmem:[#allocation5 + $0x554] sm:$0xf0]  ;;  %v8703_v32 = vld [vmem:[#allocation5 + $0x554] sm:$0xf] }
0x14da   :  { %v4340_v35 = vmax.f32 %v4338_v33, %v4339_v34  ;;  %v7756_v33 = vld [vmem:[#allocation5 + $0x4b0] sm:$0xf]  ;;  %v8676_v34 = vld [vmem:[#allocation5 + $0x4b4] sm:$0xf0] }
0x14db   :  { %v4336_v36 = vpop.f32.mrf.mxu0 }
0x14dc   :  { %v4341_v37 = vpack.c.bf16 %v4340_v35, %v4340_v35  ;;  %v8675_v35 = vld [vmem:[#allocation5 + $0x4b4] sm:$0xf]  ;;  %v7758_v36 = vld [vmem:[#allocation5 + $0x4b8] sm:$0xf0] }
0x14dd   :  { %v7761_v38 = vor.u32 %v8675_v35, %v7758_v36  ;;  %v7860_v36 = vld [vmem:[#allocation5 + $0x540] sm:$0xf] }
0x14de   :  { %4420 = vmatmul.bf16.vlgmr.msrb.gmra.mxu1 %v4341_v37  ;;  %v4428_v62 = vunpack.c.l.bf16 %v4341_v37  ;;  %v7757_v37 = vor.u32 %v8676_v34, %v7756_v33  ;;  %v7870_v33 = vld [vmem:[#allocation5 + $0x558] sm:$0xf0]  ;;  %v7869_v34 = vor.u32 %v8704_v31, %v7868_v30 }
0x14df   :  { %4811 = vmatpush.bf16.msra.mxu2 %v7761_v38  ;;  %v7873_v35 = vor.u32 %v8703_v32, %v7870_v33  ;;  %v8701_v38 = vld [vmem:[#allocation5 + $0x544] sm:$0xf]  ;;  %v8709_v30 = vld [vmem:[#allocation8 + $0x640] sm:$0xff]  ;;  %v8723_v32 = vld [vmem:[#allocation2 + $0x3f0] sm:$0xff] }
0x14e0   :  { %4798 = vmatpush.bf16.msra.mxu1 %v7757_v37  ;;  %v8702_v37 = vld [vmem:[#allocation5 + $0x544] sm:$0xf0]  ;;  %v8724_v31 = vld [vmem:[#allocation2 + $0x3f8] sm:$0xff] }
0x14e1   :  { %v8722_v33 = vld [vmem:[#allocation2 + $0x3e8] sm:$0xff] }
0x155b   :  { %v4421_v45 = vpop.f32.mrf.mxu1 }
0x155c   :  { %v4422_v46 = vadd.f32 %v8838_v44, %v4421_v45  ;;  %v7748_v45 = vld [vmem:[#allocation5 + $0x4a0] sm:$0xf] }
0x155e   :  { %v4425_v47 = vmul.f32 0.2, %v4422_v46 }
0x1560   :  { %v4426_v48 = vmax.f32 %v4422_v46, %v4425_v47  ;;  %v8674_v46 = vld [vmem:[#allocation5 + $0x4a4] sm:$0xf0]  ;;  %v8673_v47 = vld [vmem:[#allocation5 + $0x4a4] sm:$0xf] }
0x1562   :  { %v4427_v49 = vpack.c.bf16 %v4426_v48, %v4426_v48  ;;  %v7749_v48 = vor.u32 %v8674_v46, %v7748_v45  ;;  %v7854_v45 = vld [vmem:[#allocation5 + $0x538] sm:$0xf0] }
0x1563   :  { %v4423_v50 = vpop.f32.mrf.mxu1 }
0x1564   :  { %4507 = vmatmul.bf16.vlgmr.msrb.gmra.mxu2 %v4427_v49  ;;  %v7750_v49 = vld [vmem:[#allocation5 + $0x4a8] sm:$0xf0]  ;;  %4799 = vmatpush.bf16.msra.mxu1 %v7749_v48 }
0x1565   :  { %v7753_v50 = vor.u32 %v8673_v47, %v7750_v49 }
0x1567   :  { %4812 = vmatpush.bf16.msra.mxu2 %v7753_v50 }
0x1568   :  { %4800 = vmatpush.bf16.msra.mxu1 %v7741_v54 }
0x156b   :  { %4813 = vmatpush.bf16.msra.mxu2 %v7745_v56 }
0x156c   :  { %4801 = vmatpush.bf16.msra.mxu1 %v7733_v60  ;;  %v7845_v60 = vor.u32 %v8698_v58, %v7844_v57 }
0x1570   :  { %5027 = vmatpush.bf16.msrb.mxu1 %v7889_v24 }
0x1574   :  { %5028 = vmatpush.bf16.msrb.mxu1 %v7881_v9  ;;  %v8710_v9 = vld [vmem:[#allocation8 + $0x648] sm:$0xff] }
0x1578   :  { %5029 = vmatpush.bf16.msrb.mxu1 %v7873_v35  ;;  %v8720_v35 = vld [vmem:[#allocation2 + $0x3d8] sm:$0xff] }
0x15e7   :  { %v4508_v61 = vpop.f32.mrf.mxu2 }
0x15e8   :  { %v4509_v63 = vadd.f32 %v8839_v59, %v4508_v61  ;;  %v8669_v59 = vld [vmem:[#allocation5 + $0x484] sm:$0xf]  ;;  %v7734_v61 = vld [vmem:[#allocation5 + $0x488] sm:$0xf0] }
0x15ea   :  { %v4512_v0 = vadd.f32 %v4509_v63, %v4428_v62  ;;  %v7737_v62 = vor.u32 %v8669_v59, %v7734_v61  ;;  %v8692_v63 = vld [vmem:[#allocation8 + $0x638] sm:$0xff]  ;;  %v8697_v59 = vld [vmem:[#allocation5 + $0x524] sm:$0xf]  ;;  %v7846_v61 = vld [vmem:[#allocation5 + $0x528] sm:$0xf0] }
0x15eb   :  { %4893 = vmatpush.bf16.msra.mxu3 %v8692_v63  ;;  %v7836_v63 = vld [vmem:[#allocation5 + $0x510] sm:$0xf] }
0x15ec   :  { %v4513_v1 = vmul.f32 0.2, %v4512_v0  ;;  %4814 = vmatpush.bf16.msra.mxu2 %v7737_v62  ;;  %v7849_v62 = vor.u32 %v8697_v59, %v7846_v61 }
0x15ee   :  { %v4514_v2 = vmax.f32 %v4512_v0, %v4513_v1  ;;  %v8691_v0 = vld [vmem:[#allocation8 + $0x630] sm:$0xff]  ;;  %v8690_v1 = vld [vmem:[#allocation8 + $0x628] sm:$0xff] }
0x15ef   :  { %v4510_v3 = vpop.f32.mrf.mxu2  ;;  %4894 = vmatpush.bf16.msra.mxu3 %v8691_v0  ;;  %v8696_v0 = vld [vmem:[#allocation5 + $0x514] sm:$0xf0] }
0x15f0   :  { %v9163_v4 = vpack.c.bf16 %v4514_v2, %v4514_v2  ;;  %v8689_v2 = vld [vmem:[#allocation8 + $0x620] sm:$0xff]  ;;  %v8688_v3 = vld [vmem:[#allocation8 + $0x618] sm:$0xff] }
0x15f2   :  { %4594 = vmatmul.bf16.vlgmr.msrb.gmra.mxu3 %v9163_v4  ;;  %v4602_v8 = vunpack.c.l.bf16 %v9163_v4  ;;  %v8706_v4 = vld [vmem:[#allocation5 + $0x564] sm:$0xf0] }
0x15f3   :  { %4895 = vmatpush.bf16.msra.mxu3 %v8690_v1  ;;  %v7877_v29 = vor.u32 %v8706_v4, %v7876_v25  ;;  %v8695_v1 = vld [vmem:[#allocation5 + $0x514] sm:$0xf] }
0x15f5   :  { %5015 = vmatpush.bf16.msrb.mxu0 %v7877_v29 }
0x15f7   :  { %4896 = vmatpush.bf16.msra.mxu3 %v8689_v2  ;;  %v7837_v2 = vor.u32 %v8696_v0, %v7836_v63  ;;  %v8726_v0 = vld [vmem:[#allocation8 + $0x688] sm:$0xff] }
0x15f9   :  { %5016 = vmatpush.bf16.msrb.mxu0 %v7869_v34  ;;  %v8721_v34 = vld [vmem:[#allocation2 + $0x3e0] sm:$0xff] }
0x15fb   :  { %4897 = vmatpush.bf16.msra.mxu3 %v8688_v3  ;;  %v7838_v3 = vld [vmem:[#allocation5 + $0x518] sm:$0xf0] }
0x15ff   :  { %4898 = vmatpush.bf16.msra.mxu3 %v8687_v6  ;;  %v7828_v6 = vld [vmem:[#allocation5 + $0x500] sm:$0xf] }
0x1603   :  { %4899 = vmatpush.bf16.msra.mxu3 %v8686_v18  ;;  %v8713_v18 = vld [vmem:[#allocation8 + $0x660] sm:$0xff] }
0x1607   :  { %4900 = vmatpush.bf16.msra.mxu3 %v8685_v11  ;;  %v8712_v11 = vld [vmem:[#allocation8 + $0x658] sm:$0xff] }
0x160b   :  { %5200 = vmatpush.bf16.msrb.mxu3 %v8724_v31 }
0x160f   :  { %5201 = vmatpush.bf16.msrb.mxu3 %v8723_v32 }
0x1613   :  { %5202 = vmatpush.bf16.msrb.mxu3 %v8722_v33 }
0x1617   :  { %5203 = vmatpush.bf16.msrb.mxu3 %v8721_v34  ;;  %v8742_v34 = vld [vmem:[#allocation8 + $0x6c8] sm:$0xff] }
0x161b   :  { %5204 = vmatpush.bf16.msrb.mxu3 %v8720_v35  ;;  %v8741_v35 = vld [vmem:[#allocation8 + $0x6c0] sm:$0xff] }
0x1675   :  { %v4595_v40 = vpop.f32.mrf.mxu3 }
0x1676   :  { %v4596_v41 = vadd.f32 %v8840_v39, %v4595_v40  ;;  %v7862_v39 = vld [vmem:[#allocation5 + $0x548] sm:$0xf0]  ;;  %v7861_v40 = vor.u32 %v8702_v37, %v7860_v36  ;;  %v4928_v36 = vld [vmem:[#allocation7 + $0x14] sm:$0x3] }
0x1677   :  { %v4930_v37 = vperm.slane %v4928_v36, 0 }
0x1678   :  { %v4599_v42 = vmul.f32 0.2, %v4596_v41  ;;  %5017 = vmatpush.bf16.msrb.mxu0 %v7861_v40 }
0x167a   :  { %v4600_v43 = vmax.f32 %v4596_v41, %v4599_v42  ;;  %v4708_v41 = vld [vmem:[#allocation7 + $0x12] sm:$0x3]  ;;  %v7865_v42 = vor.u32 %v8701_v38, %v7862_v39 }
0x167b   :  { %v4710_v46 = vperm.slane %v4708_v41, 0  ;;  %v4711_v19 = vperm.slane %v4708_v41, 1 }
0x167c   :  { %v4601_v26 = vpack.c.bf16 %v4600_v43, %v4600_v43  ;;  %v7852_v43 = vld [vmem:[#allocation5 + $0x530] sm:$0xf]  ;;  %5030 = vmatpush.bf16.msrb.mxu1 %v7865_v42 }
0x167d   :  { %v4597_v44 = vpop.f32.mrf.mxu3 }
0x167e   :  { %4681 = vmatmul.bf16.vlgmr.msra.gmra.mxu0 %v4601_v26  ;;  %v8700_v26 = vld [vmem:[#allocation5 + $0x534] sm:$0xf0]  ;;  %v8699_v44 = vld [vmem:[#allocation5 + $0x534] sm:$0xf] }
0x167f   :  { %v7853_v47 = vor.u32 %v8700_v26, %v7852_v43  ;;  %v7857_v48 = vor.u32 %v8699_v44, %v7854_v45  ;;  %v8719_v45 = vld [vmem:[#allocation2 + $0x3d0] sm:$0xff] }
0x1680   :  { %5205 = vmatpush.bf16.msrb.mxu3 %v8719_v45 }
0x1681   :  { %5018 = vmatpush.bf16.msrb.mxu0 %v7853_v47  ;;  %5031 = vmatpush.bf16.msrb.mxu1 %v7857_v48  ;;  %v8717_v47 = vld [vmem:[#allocation2 + $0x3c0] sm:$0xff]  ;;  %v8732_v48 = vld [vmem:[#allocation8 + $0x6b8] sm:$0xff] }
0x1685   :  { %5019 = vmatpush.bf16.msrb.mxu0 %v7845_v60  ;;  %5032 = vmatpush.bf16.msrb.mxu1 %v7849_v62 }
0x1689   :  { %5020 = vmatpush.bf16.msrb.mxu0 %v7837_v2  ;;  %v8740_v2 = vld [vmem:[#allocation2 + $0x438] sm:$0xff] }
0x16fb   :  { %v4682_v7 = vpop.f32.mrf.mxu0 }
0x16fc   :  { %v4683_v12 = vadd.f32 %v8841_v5, %v4682_v7  ;;  %v7841_v5 = vor.u32 %v8695_v1, %v7838_v3  ;;  %v8694_v7 = vld [vmem:[#allocation5 + $0x504] sm:$0xf0]  ;;  %v8725_v1 = vld [vmem:[#allocation8 + $0x680] sm:$0xff]  ;;  %v8739_v3 = vld [vmem:[#allocation2 + $0x430] sm:$0xff] }
0x16fe   :  { %v4686_v13 = vadd.f32 %v4683_v12, %v4602_v8  ;;  %5033 = vmatpush.bf16.msrb.mxu1 %v7841_v5  ;;  %v8693_v8 = vld [vmem:[#allocation5 + $0x504] sm:$0xf]  ;;  %v7829_v12 = vor.u32 %v8694_v7, %v7828_v6  ;;  %v8738_v5 = vld [vmem:[#allocation2 + $0x428] sm:$0xff]  ;;  %v8736_v7 = vld [vmem:[#allocation2 + $0x418] sm:$0xff] }
0x16ff   :  { %v8737_v6 = vld [vmem:[#allocation2 + $0x420] sm:$0xff] }
0x1700   :  { %v4687_v15 = vmul.f32 0.2, %v4686_v13  ;;  %5021 = vmatpush.bf16.msrb.mxu0 %v7829_v12 }
0x1702   :  { %v4688_v14 = vmax.f32 %v4686_v13, %v4687_v15  ;;  %v7830_v13 = vld [vmem:[#allocation5 + $0x508] sm:$0xf0] }
0x1703   :  { %v4684_v16 = vpop.f32.mrf.mxu0  ;;  %v7833_v15 = vor.u32 %v8693_v8, %v7830_v13  ;;  %v8844_v8 = vld [vmem:[%s9189_s2 + $0xf] ss:$0 sm:$0xff] }
0x1704   :  { %v4689_v17 = vpack.c.bf16 %v4688_v14, %v4688_v14  ;;  %v8716_v14 = vld [vmem:[#allocation8 + $0x678] sm:$0xff]  ;;  %v8715_v16 = vld [vmem:[#allocation8 + $0x670] sm:$0xff]  ;;  %5287 = vmatpush.bf16.msra.mxu0 %v8732_v48 }
0x1705   :  { %5034 = vmatpush.bf16.msrb.mxu1 %v7833_v15  ;;  %5113 = vmatpush.bf16.msrb.mxu2 %v8716_v14  ;;  %v8750_v48 = vld [vmem:[#allocation2 + $0x448] sm:$0xff] }
0x1706   :  { %4802 = vmatmul.bf16.vlgmr.msra.gmra.mxu1 %v4689_v17  ;;  %4815 = vmatmul.bf16.vlgmr.msra.gmra.mxu2 %v4689_v17  ;;  %v8714_v17 = vld [vmem:[#allocation8 + $0x668] sm:$0xff] }
0x1709   :  { %5114 = vmatpush.bf16.msrb.mxu2 %v8715_v16  ;;  %5374 = vmatpush.bf16.msra.mxu1 %v8740_v2  ;;  %v8757_v2 = vld [vmem:[#allocation8 + $0x700] sm:$0xff] }
0x170d   :  { %5115 = vmatpush.bf16.msrb.mxu2 %v8714_v17  ;;  %5375 = vmatpush.bf16.msra.mxu1 %v8739_v3  ;;  %v8175_v3 = vld [vmem:[#allocation5 + $0x5f0] sm:$0xf] }
0x1711   :  { %5116 = vmatpush.bf16.msrb.mxu2 %v8713_v18  ;;  %5376 = vmatpush.bf16.msra.mxu1 %v8738_v5  ;;  %v8735_v18 = vld [vmem:[#allocation2 + $0x410] sm:$0xff]  ;;  %v8780_v5 = vld [vmem:[#allocation5 + $0x5f4] sm:$0xf0] }
0x1715   :  { %5117 = vmatpush.bf16.msrb.mxu2 %v8712_v11  ;;  %5377 = vmatpush.bf16.msra.mxu1 %v8737_v6  ;;  %v8734_v11 = vld [vmem:[#allocation2 + $0x408] sm:$0xff]  ;;  %v8779_v6 = vld [vmem:[#allocation5 + $0x5f4] sm:$0xf] }
0x1719   :  { %5118 = vmatpush.bf16.msrb.mxu2 %v8711_v21  ;;  %5378 = vmatpush.bf16.msra.mxu1 %v8736_v7  ;;  %v8747_v21 = vld [vmem:[#allocation8 + $0x6f0] sm:$0xff]  ;;  %v8176_v7 = vor.u32 %v8780_v5, %v8175_v3 }
0x171d   :  { %5119 = vmatpush.bf16.msrb.mxu2 %v8710_v9  ;;  %5379 = vmatpush.bf16.msra.mxu1 %v8735_v18 }
0x1721   :  { %5120 = vmatpush.bf16.msrb.mxu2 %v8709_v30  ;;  %5380 = vmatpush.bf16.msra.mxu1 %v8734_v11  ;;  %v8159_v11 = vld [vmem:[#allocation5 + $0x5d0] sm:$0xf] }
0x1783   :  { %v4803_v49 = vpop.f32.mrf.mxu1 }
0x1784   :  { %v4804_v50 = vadd.f32 %v4803_v49, %v4710_v46  ;;  %v8718_v46 = vld [vmem:[#allocation2 + $0x3c8] sm:$0xff] }
0x1785   :  { %5206 = vmatpush.bf16.msrb.mxu3 %v8718_v46  ;;  %v8731_v49 = vld [vmem:[#allocation8 + $0x6b0] sm:$0xff] }
0x1786   :  { %v4820_v51 = vmul.f32 0.2, %v4804_v50  ;;  %5288 = vmatpush.bf16.msra.mxu0 %v8731_v49  ;;  %v8749_v49 = vld [vmem:[#allocation2 + $0x440] sm:$0xff] }
0x1788   :  { %v4821_v52 = vmax.f32 %v4804_v50, %v4820_v51  ;;  %v8730_v50 = vld [vmem:[#allocation8 + $0x6a8] sm:$0xff]  ;;  %v8729_v51 = vld [vmem:[#allocation8 + $0x6a0] sm:$0xff] }
0x1789   :  { %v4816_v53 = vpop.f32.mrf.mxu2  ;;  %5207 = vmatpush.bf16.msrb.mxu3 %v8717_v47  ;;  %v8751_v47 = vld [vmem:[#allocation2 + $0x450] sm:$0xff] }
0x178a   :  { %v4822_v54 = vpack.c.bf16 %v4821_v52, %v4821_v52  ;;  %v4817_v23 = vadd.f32 %v4816_v53, %v4711_v19  ;;  %5289 = vmatpush.bf16.msra.mxu0 %v8730_v50  ;;  %v8728_v52 = vld [vmem:[#allocation8 + $0x698] sm:$0xff]  ;;  %v4931_v53 = vperm.slane %v4928_v36, 1  ;;  %v8733_v19 = vld [vmem:[#allocation2 + $0x400] sm:$0xff]  ;;  %v8756_v36 = vld [vmem:[#allocation2 + $0x478] sm:$0xff] }
0x178b   :  { %v4805_v55 = vpop.f32.mrf.mxu1  ;;  %5381 = vmatpush.bf16.msra.mxu1 %v8733_v19  ;;  %v8764_v50 = vld [vmem:[#allocation8 + $0x738] sm:$0xff]  ;;  %v8776_v19 = vld [vmem:[#allocation5 + $0x5d4] sm:$0xf0] }
0x178c   :  { %4901 = vmatmul.bf16.vlgmr.msra.gmra.mxu3 %v4822_v54  ;;  %v8843_v54 = vld [vmem:[#allocation10 + $0x19] ss:$0 sm:$0xff]  ;;  %v8727_v55 = vld [vmem:[#allocation8 + $0x690] sm:$0xff] }
0x178d   :  { %5548 = vmatpush.bf16.msra.mxu3 %v8756_v36 }
0x178e   :  { %5290 = vmatpush.bf16.msra.mxu0 %v8729_v51  ;;  %v8763_v51 = vld [vmem:[#allocation8 + $0x730] sm:$0xff] }
0x1791   :  { %v4818_v56 = vpop.f32.mrf.mxu2 }
0x1792   :  { %5291 = vmatpush.bf16.msra.mxu0 %v8728_v52  ;;  %v8762_v52 = vld [vmem:[#allocation8 + $0x728] sm:$0xff] }
0x1796   :  { %5292 = vmatpush.bf16.msra.mxu0 %v8727_v55  ;;  %v8847_v55 = vld [vmem:[#allocation10 + $0x1b] ss:$0 sm:$0xff] }
0x179a   :  { %5293 = vmatpush.bf16.msra.mxu0 %v8726_v0 }
0x179e   :  { %5294 = vmatpush.bf16.msra.mxu0 %v8725_v1  ;;  %v8758_v1 = vld [vmem:[#allocation8 + $0x708] sm:$0xff] }
0x180f   :  { %v4902_v22 = vpop.f32.mrf.mxu3 }
0x1810   :  { %v4903_v25 = vadd.f32 %v8842_v20, %v4902_v22  ;;  %v8748_v20 = vld [vmem:[#allocation8 + $0x6f8] sm:$0xff]  ;;  %v8746_v22 = vld [vmem:[#allocation8 + $0x6e8] sm:$0xff] }
0x1811   :  { %5461 = vmatpush.bf16.msra.mxu2 %v8748_v20  ;;  %v8775_v20 = vld [vmem:[#allocation5 + $0x5d4] sm:$0xf] }
0x1812   :  { %v4906_v4 = vadd.f32 %v4903_v25, %v4817_v23  ;;  %v8745_v23 = vld [vmem:[#allocation8 + $0x6e0] sm:$0xff]  ;;  %v8744_v25 = vld [vmem:[#allocation8 + $0x6d8] sm:$0xff] }
0x1814   :  { %v4907_v24 = vmul.f32 0.2, %v4906_v4 }
0x1815   :  { %5462 = vmatpush.bf16.msra.mxu2 %v8747_v21  ;;  %v8161_v21 = vld [vmem:[#allocation5 + $0x5d8] sm:$0xf0] }
0x1816   :  { %v4908_v27 = vmax.f32 %v4906_v4, %v4907_v24  ;;  %v8845_v4 = vld [vmem:[#allocation10 + $0x1a] ss:$0 sm:$0xff]  ;;  %v8743_v24 = vld [vmem:[#allocation8 + $0x6d0] sm:$0xff] }
0x1817   :  { %v4904_v28 = vpop.f32.mrf.mxu3 }
0x1818   :  { %v4909_v29 = vpack.c.bf16 %v4908_v27, %v4908_v27 }
0x1819   :  { %5463 = vmatpush.bf16.msra.mxu2 %v8746_v22  ;;  %v8160_v22 = vor.u32 %v8776_v19, %v8159_v11 }
0x181a   :  { %5022 = vmatmul.bf16.vlgmr.msrb.gmra.mxu0 %v4909_v29  ;;  %5035 = vmatmul.bf16.vlgmr.msrb.gmra.mxu1 %v4909_v29 }
0x181b   :  { %5635 = vmatpush.bf16.msrb.mxu0 %v8764_v50  ;;  %5756 = vmatpush.bf16.msrb.mxu1 %v8176_v7 }
0x181d   :  { %5464 = vmatpush.bf16.msra.mxu2 %v8745_v23  ;;  %v8164_v23 = vor.u32 %v8775_v20, %v8161_v21 }
0x181f   :  { %5636 = vmatpush.bf16.msrb.mxu0 %v8763_v51  ;;  %v8129_v51 = vld [vmem:[#allocation5 + $0x598] sm:$0xf0] }
0x1821   :  { %5465 = vmatpush.bf16.msra.mxu2 %v8744_v25  ;;  %v8151_v25 = vld [vmem:[#allocation5 + $0x5c0] sm:$0xf] }
0x1823   :  { %5637 = vmatpush.bf16.msrb.mxu0 %v8762_v52 }
0x1825   :  { %5466 = vmatpush.bf16.msra.mxu2 %v8743_v24  ;;  %v8773_v24 = vld [vmem:[#allocation5 + $0x5c4] sm:$0xf] }
0x1829   :  { %5467 = vmatpush.bf16.msra.mxu2 %v8742_v34 }
0x182d   :  { %5468 = vmatpush.bf16.msra.mxu2 %v8741_v35  ;;  %v8848_v35 = vld [vmem:[%s9189_s2 + $0x11] ss:$0 sm:$0xff] }
0x1897   :  { %v5023_v38 = vpop.f32.mrf.mxu0  ;;  %v5036_v39 = vpop.f32.mrf.mxu1 }
0x1898   :  { %v5024_v40 = vadd.f32 %v5023_v38, %v4930_v37  ;;  %v5037_v57 = vadd.f32 %v5036_v39, %v4931_v53  ;;  %v8755_v37 = vld [vmem:[#allocation2 + $0x470] sm:$0xff]  ;;  %v8754_v38 = vld [vmem:[#allocation2 + $0x468] sm:$0xff]  ;;  %v8753_v39 = vld [vmem:[#allocation2 + $0x460] sm:$0xff] }
0x1899   :  { %5549 = vmatpush.bf16.msra.mxu3 %v8755_v37  ;;  %v8761_v53 = vld [vmem:[#allocation8 + $0x720] sm:$0xff] }
0x189a   :  { %v5040_v41 = vmul.f32 0.2, %v5024_v40  ;;  %5638 = vmatpush.bf16.msrb.mxu0 %v8761_v53  ;;  %v8119_v53 = vld [vmem:[#allocation5 + $0x580] sm:$0xf] }
0x189c   :  { %v5041_v42 = vmax.f32 %v5024_v40, %v5040_v41  ;;  %v8752_v40 = vld [vmem:[#allocation2 + $0x458] sm:$0xff]  ;;  %v8846_v41 = vld [vmem:[%s9189_s2 + $0x10] ss:$0 sm:$0xff]  ;;  %s9018_s2 = smov [#allocation11]  }
0x189d   :  { %5550 = vmatpush.bf16.msra.mxu3 %v8754_v38  ;;  %s5878_s18 = sshll.u32 %s9018_s2, 4  ;;  %s5879_s18 = int_to_ptr.vmem [resolvable:$true] %s5878_s18 }
0x189e   :  { %v5042_v43 = vpack.c.bf16 %v5041_v42, %v5041_v42 }
0x189f   :  { %v5025_v26 = vpop.f32.mrf.mxu0  ;;  %v5038_v44 = vpop.f32.mrf.mxu1 }
0x18a0   :  { %5121 = vmatmul.bf16.vlgmr.msrb.gmra.mxu2 %v5042_v43 }
0x18a1   :  { %5551 = vmatpush.bf16.msra.mxu3 %v8753_v39 }
0x18a5   :  { %5552 = vmatpush.bf16.msra.mxu3 %v8752_v40 }
0x18a9   :  { %5553 = vmatpush.bf16.msra.mxu3 %v8751_v47  ;;  %v8127_v47 = vld [vmem:[#allocation5 + $0x590] sm:$0xf] }
0x18ad   :  { %5554 = vmatpush.bf16.msra.mxu3 %v8750_v48  ;;  %v8768_v48 = vld [vmem:[#allocation5 + $0x594] sm:$0xf0] }
0x18ae   :  { %v8128_v50 = vor.u32 %v8768_v48, %v8127_v47 }
0x18b1   :  { %5555 = vmatpush.bf16.msra.mxu3 %v8749_v49  ;;  %v8767_v49 = vld [vmem:[#allocation5 + $0x594] sm:$0xf] }
0x18b2   :  { %v8132_v52 = vor.u32 %v8767_v49, %v8129_v51 }
0x1923   :  { %v5122_v56 = vpop.f32.mrf.mxu2 }
0x1924   :  { %v5123_v58 = vadd.f32 %v8843_v54, %v5122_v56  ;;  %v8760_v54 = vld [vmem:[#allocation8 + $0x718] sm:$0xff]  ;;  %v8759_v56 = vld [vmem:[#allocation8 + $0x710] sm:$0xff] }
0x1925   :  { %5639 = vmatpush.bf16.msrb.mxu0 %v8760_v54  ;;  %v8766_v54 = vld [vmem:[#allocation5 + $0x584] sm:$0xf0] }
0x1926   :  { %v5126_v59 = vadd.f32 %v5123_v58, %v5037_v57 }
0x1928   :  { %v5127_v60 = vmul.f32 0.2, %v5126_v59 }
0x1929   :  { %5640 = vmatpush.bf16.msrb.mxu0 %v8759_v56  ;;  %v8120_v56 = vor.u32 %v8766_v54, %v8119_v53 }
0x192a   :  { %v5128_v61 = vmax.f32 %v5126_v59, %v5127_v60 }
0x192b   :  { %v5124_v62 = vpop.f32.mrf.mxu2 }
0x192c   :  { %v5129_v63 = vpack.c.bf16 %v5128_v61, %v5128_v61 }
0x192d   :  { %5641 = vmatpush.bf16.msrb.mxu0 %v8758_v1  ;;  %v8849_v1 = vld [vmem:[#allocation10 + $0x1c] ss:$0 sm:$0xff] }
0x192e   :  { %5208 = vmatmul.bf16.vlgmr.msrb.gmra.mxu3 %v5129_v63  ;;  %v5216_v28 = vunpack.c.l.bf16 %v5129_v63 }
0x1931   :  { %5642 = vmatpush.bf16.msrb.mxu0 %v8757_v2  ;;  %v8783_v2 = vld [vmem:[#allocation8 + $0x750] sm:$0xff] }
0x19b1   :  { %v5209_v12 = vpop.f32.mrf.mxu3 }
0x19b2   :  { %v5210_v13 = vadd.f32 %v8844_v8, %v5209_v12  ;;  %v8177_v8 = vld [vmem:[#allocation5 + $0x5f8] sm:$0xf0]  ;;  %v8167_v12 = vld [vmem:[#allocation5 + $0x5e0] sm:$0xf] }
0x19b4   :  { %v5213_v15 = vmul.f32 0.2, %v5210_v13 }
0x19b6   :  { %v5214_v14 = vmax.f32 %v5210_v13, %v5213_v15  ;;  %v8778_v13 = vld [vmem:[#allocation5 + $0x5e4] sm:$0xf0]  ;;  %v8180_v15 = vor.u32 %v8779_v6, %v8177_v8 }
0x19b8   :  { %v5215_v16 = vpack.c.bf16 %v5214_v14, %v5214_v14  ;;  %v8777_v14 = vld [vmem:[#allocation5 + $0x5e4] sm:$0xf]  ;;  %5769 = vmatpush.bf16.msrb.mxu2 %v8180_v15 }
0x19b9   :  { %v5211_v17 = vpop.f32.mrf.mxu3 }
0x19ba   :  { %5295 = vmatmul.bf16.vlgmr.msra.gmra.mxu0 %v5215_v16  ;;  %v8169_v16 = vld [vmem:[#allocation5 + $0x5e8] sm:$0xf0]  ;;  %v8168_v17 = vor.u32 %v8778_v13, %v8167_v12 }
0x19bb   :  { %v8172_v18 = vor.u32 %v8777_v14, %v8169_v16  ;;  %v8782_v14 = vld [vmem:[#allocation8 + $0x748] sm:$0xff]  ;;  %v8781_v16 = vld [vmem:[#allocation8 + $0x740] sm:$0xff] }
0x19bc   :  { %5757 = vmatpush.bf16.msrb.mxu1 %v8168_v17  ;;  %v5670_v17 = vld [vmem:[#allocation7 + $0x16] sm:$0x3] }
0x19bd   :  { %5770 = vmatpush.bf16.msrb.mxu2 %v8172_v18  ;;  %v5672_v18 = vperm.slane %v5670_v17, 0 }
0x19c0   :  { %5758 = vmatpush.bf16.msrb.mxu1 %v8160_v22 }
0x19c1   :  { %5771 = vmatpush.bf16.msrb.mxu2 %v8164_v23 }
0x1a37   :  { %v5296_v27 = vpop.f32.mrf.mxu0 }
0x1a38   :  { %v5297_v29 = vadd.f32 %v8845_v4, %v5296_v27  ;;  %v8774_v4 = vld [vmem:[#allocation5 + $0x5c4] sm:$0xf0]  ;;  %v8153_v27 = vld [vmem:[#allocation5 + $0x5c8] sm:$0xf0] }
0x1a3a   :  { %v5300_v9 = vadd.f32 %v5297_v29, %v5216_v28  ;;  %v8152_v28 = vor.u32 %v8774_v4, %v8151_v25  ;;  %v8156_v29 = vor.u32 %v8773_v24, %v8153_v27  ;;  %v5673_v4 = vperm.slane %v5670_v17, 1  ;;  %v8850_v24 = vld [vmem:[#allocation10 + $0x1d] ss:$0 sm:$0xff] }
0x1a3c   :  { %v5301_v30 = vmul.f32 0.2, %v5300_v9  ;;  %5759 = vmatpush.bf16.msrb.mxu1 %v8152_v28  ;;  %5772 = vmatpush.bf16.msrb.mxu2 %v8156_v29 }
0x1a3e   :  { %v5302_v31 = vmax.f32 %v5300_v9, %v5301_v30  ;;  %v8143_v9 = vld [vmem:[#allocation5 + $0x5b0] sm:$0xf]  ;;  %v8772_v30 = vld [vmem:[#allocation5 + $0x5b4] sm:$0xf0] }
0x1a3f   :  { %v5298_v32 = vpop.f32.mrf.mxu0 }
0x1a40   :  { %v5303_v33 = vpack.c.bf16 %v5302_v31, %v5302_v31  ;;  %v8771_v31 = vld [vmem:[#allocation5 + $0x5b4] sm:$0xf]  ;;  %v8145_v32 = vld [vmem:[#allocation5 + $0x5b8] sm:$0xf0] }
0x1a41   :  { %v8148_v34 = vor.u32 %v8771_v31, %v8145_v32 }
0x1a42   :  { %5382 = vmatmul.bf16.vlgmr.msra.gmra.mxu1 %v5303_v33  ;;  %v5390_v58 = vunpack.c.l.bf16 %v5303_v33  ;;  %v8144_v33 = vor.u32 %v8772_v30, %v8143_v9 }
0x1a43   :  { %5773 = vmatpush.bf16.msrb.mxu2 %v8148_v34 }
0x1a44   :  { %5760 = vmatpush.bf16.msrb.mxu1 %v8144_v33 }
0x1abf   :  { %v5383_v42 = vpop.f32.mrf.mxu1 }
0x1ac0   :  { %v5384_v43 = vadd.f32 %v8846_v41, %v5383_v42  ;;  %v8135_v42 = vld [vmem:[#allocation5 + $0x5a0] sm:$0xf] }
0x1ac2   :  { %v5387_v26 = vmul.f32 0.2, %v5384_v43 }
0x1ac4   :  { %v5388_v44 = vmax.f32 %v5384_v43, %v5387_v26  ;;  %v8770_v43 = vld [vmem:[#allocation5 + $0x5a4] sm:$0xf0]  ;;  %v8769_v26 = vld [vmem:[#allocation5 + $0x5a4] sm:$0xf] }
0x1ac6   :  { %v5389_v45 = vpack.c.bf16 %v5388_v44, %v5388_v44  ;;  %v8136_v44 = vor.u32 %v8770_v43, %v8135_v42 }
0x1ac7   :  { %v5385_v46 = vpop.f32.mrf.mxu1 }
0x1ac8   :  { %5469 = vmatmul.bf16.vlgmr.msra.gmra.mxu2 %v5389_v45  ;;  %v8137_v45 = vld [vmem:[#allocation5 + $0x5a8] sm:$0xf0]  ;;  %5761 = vmatpush.bf16.msrb.mxu1 %v8136_v44 }
0x1ac9   :  { %v8140_v46 = vor.u32 %v8769_v26, %v8137_v45 }
0x1acb   :  { %5774 = vmatpush.bf16.msrb.mxu2 %v8140_v46 }
0x1acc   :  { %5762 = vmatpush.bf16.msrb.mxu1 %v8128_v50 }
0x1acf   :  { %5775 = vmatpush.bf16.msrb.mxu2 %v8132_v52 }
0x1ad0   :  { %5763 = vmatpush.bf16.msrb.mxu1 %v8120_v56 }
0x1b4b   :  { %v5470_v57 = vpop.f32.mrf.mxu2 }
0x1b4c   :  { %v5471_v59 = vadd.f32 %v8847_v55, %v5470_v57  ;;  %v8765_v55 = vld [vmem:[#allocation5 + $0x584] sm:$0xf]  ;;  %v8121_v57 = vld [vmem:[#allocation5 + $0x588] sm:$0xf0] }
0x1b4e   :  { %v5474_v60 = vadd.f32 %v5471_v59, %v5390_v58  ;;  %v8124_v58 = vor.u32 %v8765_v55, %v8121_v57  ;;  %v8788_v59 = vld [vmem:[#allocation8 + $0x778] sm:$0xff] }
0x1b4f   :  { %5855 = vmatpush.bf16.msrb.mxu3 %v8788_v59 }
0x1b50   :  { %v5475_v61 = vmul.f32 0.2, %v5474_v60  ;;  %5776 = vmatpush.bf16.msrb.mxu2 %v8124_v58 }
0x1b52   :  { %v5476_v62 = vmax.f32 %v5474_v60, %v5475_v61  ;;  %v8787_v60 = vld [vmem:[#allocation8 + $0x770] sm:$0xff]  ;;  %v8786_v61 = vld [vmem:[#allocation8 + $0x768] sm:$0xff] }
0x1b53   :  { %v5472_v63 = vpop.f32.mrf.mxu2  ;;  %5856 = vmatpush.bf16.msrb.mxu3 %v8787_v60 }
0x1b54   :  { %v9176_v0 = vpack.c.bf16 %v5476_v62, %v5476_v62  ;;  %v8785_v62 = vld [vmem:[#allocation8 + $0x760] sm:$0xff]  ;;  %v8784_v63 = vld [vmem:[#allocation8 + $0x758] sm:$0xff] }
0x1b56   :  { %5556 = vmatmul.bf16.vlgmr.msra.gmra.mxu3 %v9176_v0  ;;  %v5564_v5 = vunpack.c.l.bf16 %v9176_v0 }
0x1b57   :  { %5857 = vmatpush.bf16.msrb.mxu3 %v8786_v61 }
0x1b5b   :  { %5858 = vmatpush.bf16.msrb.mxu3 %v8785_v62 }
0x1b5f   :  { %5859 = vmatpush.bf16.msrb.mxu3 %v8784_v63 }
0x1b63   :  { %5860 = vmatpush.bf16.msrb.mxu3 %v8783_v2 }
0x1b67   :  { %5861 = vmatpush.bf16.msrb.mxu3 %v8782_v14 }
0x1b6b   :  { %5862 = vmatpush.bf16.msrb.mxu3 %v8781_v16 }
0x1bd9   :  { %v5557_v36 = vpop.f32.mrf.mxu3 }
0x1bda   :  { %v5558_v37 = vadd.f32 %v8848_v35, %v5557_v36 }
0x1bdc   :  { %v5561_v38 = vmul.f32 0.2, %v5558_v37 }
0x1bde   :  { %v5562_v39 = vmax.f32 %v5558_v37, %v5561_v38 }
0x1be0   :  { %v5563_v40 = vpack.c.bf16 %v5562_v39, %v5562_v39 }
0x1be1   :  { %v5559_v41 = vpop.f32.mrf.mxu3 }
0x1be2   :  { %5643 = vmatmul.bf16.vlgmr.msrb.gmra.mxu0 %v5563_v40 }
0x1c5f   :  { %v5644_v3 = vpop.f32.mrf.mxu0 }
0x1c60   :  { %v5645_v6 = vadd.f32 %v8849_v1, %v5644_v3 }
0x1c62   :  { %v5648_v7 = vadd.f32 %v5645_v6, %v5564_v5 }
0x1c64   :  { %v5649_v8 = vmul.f32 0.2, %v5648_v7 }
0x1c66   :  { %v5650_v12 = vmax.f32 %v5648_v7, %v5649_v8 }
0x1c67   :  { %v5646_v13 = vpop.f32.mrf.mxu0 }
0x1c68   :  { %v5651_v15 = vpack.c.bf16 %v5650_v12, %v5650_v12 }
0x1c6a   :  { %5764 = vmatmul.bf16.vlgmr.msrb.gmra.mxu1 %v5651_v15  ;;  %5777 = vmatmul.bf16.vlgmr.msrb.gmra.mxu2 %v5651_v15 }
0x1ce7   :  { %v5765_v11 = vpop.f32.mrf.mxu1 }
0x1ce8   :  { %v5766_v19 = vadd.f32 %v5765_v11, %v5672_v18 }
0x1cea   :  { %v5782_v20 = vmul.f32 0.2, %v5766_v19 }
0x1cec   :  { %v5783_v21 = vmax.f32 %v5766_v19, %v5782_v20 }
0x1ced   :  { %v5778_v0 = vpop.f32.mrf.mxu2 }
0x1cee   :  { %v5784_v22 = vpack.c.bf16 %v5783_v21, %v5783_v21  ;;  %v5779_v28 = vadd.f32 %v5778_v0, %v5673_v4 }
0x1cef   :  { %v5767_v23 = vpop.f32.mrf.mxu1 }
0x1cf0   :  { %5863 = vmatmul.bf16.vlgmr.msrb.gmra.mxu3 %v5784_v22 }
0x1cf5   :  { %v5780_v25 = vpop.f32.mrf.mxu2 }
0x1d73   :  { %v5864_v27 = vpop.f32.mrf.mxu3 }
0x1d74   :  { %v5865_v29 = vadd.f32 %v8850_v24, %v5864_v27 }
0x1d76   :  { %v5868_v9 = vadd.f32 %v5865_v29, %v5779_v28 }
0x1d78   :  { %v5869_v30 = vmul.f32 0.2, %v5868_v9 }
0x1d7a   :  { %v5870_v31 = vmax.f32 %v5868_v9, %v5869_v30 }
0x1d7b   :  { %v5866_v32 = vpop.f32.mrf.mxu3 }
0x1d7c   :  { %v5871_v33 = vadd.f32 %v5870_v31, %v9154_v10 }
0x1d7e   :  { %5872 = vst [vmem:[#allocation11] sm:$0xff] %v5871_v33 }
0x1d7f   :  { %5883 = dma.vmem_to_hbm [thread:$0]  %s5879_s18, 128, %s5881_s21, [#allocation4]  }
0x1d80   :  { %9003 = dma.done.wait [#allocation4], 128  }
0x1d81   :  { %9004 = vsyncadd [#allocation4], 4294967168 }
0x1d82   :  { %5888 = vsyncpa [#allocation3], 1 }
0x1d83   :  { %5889 = vsyncpa [#allocation6], 1 }
0x1d84   :  { %5890 = vsyncpa [#allocation9], 1 }
0x1d85   :  { %5891 = vsyncpa [#allocation4], 1 }

</bundles_post_ra>
